<compile_context>
chip_gen: v7x
topology: tpu7x:2x2x1
jax: 0.10.0
libtpu: 0.0.40
codegen_flags: <defaults>
</compile_context>

<pallas_src>
import jax
import jax.numpy as jnp
import numpy as np
from jax.experimental import pallas as pl
from jax.experimental.pallas import tpu as pltpu

# ---------------------------------------------------------------------------
# Model dimensions
# ---------------------------------------------------------------------------
VISION_C, VISION_HW = 4, 16
CONV1_C, CONV2_C = 8, 16
VIS_EMB = 128
PROP_IN, PROP_EMB = 4, 32
PROP_IN_PAD, PROP_EMB_PAD = 8, 128                 # lane/sublane-padded proprio path
FUSION_DIM, LATENT_DIM = 256, 128
VIS_FLAT = VISION_C * VISION_HW * VISION_HW        # 1024
HEAD_OUT = 2 * LATENT_DIM                          # 256 = [mu | log_var]
DEC_OUT = VIS_FLAT + PROP_EMB_PAD                  # 1152 = [vision | padded proprio]
COMPUTE_DTYPE = jnp.bfloat16                       # MXU operand dtype
IO_DTYPE = jnp.bfloat16                            # lane-heavy activation I/O dtype

_WEIGHT_ORDER = ("a1", "b1", "a2", "b2", "wfc", "bfc", "wpe", "bpe",
                 "wfv", "wfp", "bfu", "whead", "bhead", "wz", "bz",
                 "wdec", "bdec")


# ---------------------------------------------------------------------------
# Fused Pallas kernel: entire forward pass, one launch
# ---------------------------------------------------------------------------
def _fused_vae_kernel(xv_ref, xp_ref, eps_ref,
                      a1_ref, b1_ref, a2_ref, b2_ref, wfc_ref, bfc_ref,
                      wpe_ref, bpe_ref, wfv_ref, wfp_ref, bfu_ref,
                      whead_ref, bhead_ref, wz_ref, bz_ref, wdec_ref, bdec_ref,
                      mulv_ref, z_ref, recon_ref):
    f32 = jnp.float32

    def mm(x, w_ref):
        # bf16 MXU operands, f32 accumulation.
        return jnp.dot(x.astype(w_ref.dtype), w_ref[...],
                       preferred_element_type=f32)

    # ---- vision encoder (convs folded into dense operators a1 / a2) --------
    xv = xv_ref[...]                                                # bf16 (bm, 1024)
    h1 = jnp.maximum(mm(xv, a1_ref) + b1_ref[...], 0.0)            # (bm, 512)
    h2 = jnp.maximum(mm(h1, a2_ref) + b2_ref[...], 0.0)            # (bm, 256)
    v_emb = jnp.maximum(mm(h2, wfc_ref) + bfc_ref[...], 0.0)       # (bm, 128)

    # ---- proprio encoder (lane-padded to 128) -------------------------------
    p_emb = jnp.maximum(mm(xp_ref[...], wpe_ref) + bpe_ref[...], 0.0)  # (bm, 128)

    # ---- fusion (split weight, no concat) -----------------------------------
    fusion = jnp.maximum(mm(v_emb, wfv_ref) + mm(p_emb, wfp_ref)
                         + bfu_ref[...], 0.0)                       # (bm, 256)

    # ---- fused VAE head: [mu | log_var] in one MXU pass + reparameterize ----
    head = mm(fusion, whead_ref) + bhead_ref[...]                   # (bm, 256)
    mu = head[:, :LATENT_DIM]
    lv = head[:, LATENT_DIM:]
    std = jnp.exp(0.5 * lv)                                         # f32 EUP
    z = eps_ref[...].astype(f32) * std + mu                         # (bm, 128)

    # ---- fused decoder: z -> fusion state -> [vision | proprio] -------------
    dec = mm(z, wz_ref) + bz_ref[...]                               # (bm, 256)
    dec_out = mm(dec, wdec_ref) + bdec_ref[...]                     # (bm, 1152)
    col = jax.lax.broadcasted_iota(jnp.int32, dec_out.shape, 1)
    recon = jnp.where(col < VIS_FLAT, jax.nn.sigmoid(dec_out), dec_out)

    mulv_ref[...] = head.astype(mulv_ref.dtype)
    z_ref[...] = z.astype(z_ref.dtype)
    recon_ref[...] = recon.astype(recon_ref.dtype)


# ---------------------------------------------------------------------------
# Parameter construction (PyTorch-layout) and kernel-ready preparation
# ---------------------------------------------------------------------------
def init_params(key):
    """Parameters in PyTorch conventions (Linear weights stored (in, out))."""
    ks = jax.random.split(key, 16)
    s = 0.05
    p = {}
    p["ve_conv1_w"] = s * jax.random.normal(ks[0], (CONV1_C, VISION_C, 3, 3), jnp.float32)
    p["ve_conv1_b"] = jnp.zeros((CONV1_C,), jnp.float32)
    p["ve_conv2_w"] = s * jax.random.normal(ks[1], (CONV2_C, CONV1_C, 3, 3), jnp.float32)
    p["ve_conv2_b"] = jnp.zeros((CONV2_C,), jnp.float32)
    p["ve_fc_w"] = s * jax.random.normal(ks[2], (CONV2_C * 4 * 4, VIS_EMB), jnp.float32)
    p["ve_fc_b"] = jnp.zeros((VIS_EMB,), jnp.float32)
    p["pe_fc_w"] = s * jax.random.normal(ks[3], (PROP_IN, PROP_EMB), jnp.float32)
    p["pe_fc_b"] = jnp.zeros((PROP_EMB,), jnp.float32)
    p["fusion_w"] = s * jax.random.normal(ks[4], (VIS_EMB + PROP_EMB, FUSION_DIM), jnp.float32)
    p["fusion_b"] = jnp.zeros((FUSION_DIM,), jnp.float32)
    p["mu_w"] = s * jax.random.normal(ks[5], (FUSION_DIM, LATENT_DIM), jnp.float32)
    p["mu_b"] = jnp.zeros((LATENT_DIM,), jnp.float32)
    p["var_w"] = s * jax.random.normal(ks[6], (FUSION_DIM, LATENT_DIM), jnp.float32)
    p["var_b"] = jnp.zeros((LATENT_DIM,), jnp.float32)
    p["z2f_w"] = s * jax.random.normal(ks[7], (LATENT_DIM, FUSION_DIM), jnp.float32)
    p["z2f_b"] = jnp.zeros((FUSION_DIM,), jnp.float32)
    p["vd_fc_w"] = s * jax.random.normal(ks[8], (FUSION_DIM, VIS_FLAT), jnp.float32)
    p["vd_fc_b"] = jnp.zeros((VIS_FLAT,), jnp.float32)
    p["pd_fc_w"] = s * jax.random.normal(ks[9], (FUSION_DIM, PROP_IN), jnp.float32)
    p["pd_fc_b"] = jnp.zeros((PROP_IN,), jnp.float32)
    return p


def _conv2d_as_dense(w, bias, hw, stride, pad):
    """Fold a Conv2d (PyTorch (Cout,Cin,kh,kw), NCHW flatten) into a dense matrix.

    Returns A of shape (Cin*H*W, Cout*Ho*Wo) such that
        y_flat = x_flat @ A + repeat(bias, Ho*Wo)
    reproduces the conv exactly (including zero padding), with both x_flat and
    y_flat in PyTorch NCHW flatten order.
    """
    w = np.asarray(w, np.float32)
    cout, cin, kh_n, kw_n = w.shape
    H = W = hw
    Ho = (H + 2 * pad - kh_n) // stride + 1
    Wo = (W + 2 * pad - kw_n) // stride + 1
    A = np.zeros((cin * H * W, cout * Ho * Wo), np.float32)
    ci_idx = np.arange(cin) * H * W
    co_idx = np.arange(cout) * Ho * Wo
    for kh in range(kh_n):
        for kw in range(kw_n):
            tap = w[:, :, kh, kw].T          # (Cin, Cout)
            for ho in range(Ho):
                hi = stride * ho + kh - pad
                if hi < 0 or hi >= H:
                    continue
                for wo in range(Wo):
                    wi = stride * wo + kw - pad
                    if wi < 0 or wi >= W:
                        continue
                    A[np.ix_(ci_idx + hi * W + wi, co_idx + ho * Wo + wo)] += tap
    b_exp = np.repeat(np.asarray(bias, np.float32), Ho * Wo)
    return A, b_exp


def prepare_params(params):
    """One-time transform of PyTorch-layout params into kernel-ready arrays."""
    a1, b1 = _conv2d_as_dense(params["ve_conv1_w"], params["ve_conv1_b"], VISION_HW, 2, 1)
    a2, b2 = _conv2d_as_dense(params["ve_conv2_w"], params["ve_conv2_b"], 8, 2, 1)

    # Fusion weight split (kills the concat) + proprio half padded to 128 rows.
    fusion_w = np.asarray(params["fusion_w"], np.float32)
    wfv = fusion_w[:VIS_EMB]                                    # (128, 256)
    wfp = np.zeros((PROP_EMB_PAD, FUSION_DIM), np.float32)      # (128, 256)
    wfp[:PROP_EMB] = fusion_w[VIS_EMB:]

    # Proprio encoder padded to sublane/lane tiles: K 4->8, N 32->128.
    wpe = np.zeros((PROP_IN_PAD, PROP_EMB_PAD), np.float32)
    wpe[:PROP_IN, :PROP_EMB] = np.asarray(params["pe_fc_w"], np.float32)
    bpe = np.zeros((PROP_EMB_PAD,), np.float32)
    bpe[:PROP_EMB] = np.asarray(params["pe_fc_b"], np.float32)

    # Fused VAE head: [mu | log_var] -> one (256, 256) weight.
    whead = np.concatenate([np.asarray(params["mu_w"], np.float32),
                            np.asarray(params["var_w"], np.float32)], axis=1)
    bhead = np.concatenate([np.asarray(params["mu_b"], np.float32),
                            np.asarray(params["var_b"], np.float32)])

    # Fused decoder output: [vision (1024) | proprio padded to 128] -> (256, 1152).
    wpd = np.zeros((FUSION_DIM, PROP_EMB_PAD), np.float32)
    wpd[:, :PROP_IN] = np.asarray(params["pd_fc_w"], np.float32)
    bpd = np.zeros((PROP_EMB_PAD,), np.float32)
    bpd[:PROP_IN] = np.asarray(params["pd_fc_b"], np.float32)
    wdec = np.concatenate([np.asarray(params["vd_fc_w"], np.float32), wpd], axis=1)
    bdec = np.concatenate([np.asarray(params["vd_fc_b"], np.float32), bpd])

    def W(x):   # matmul operands stored in bf16
        return jnp.asarray(np.asarray(x, np.float32), COMPUTE_DTYPE)

    def Bv(x):  # biases stay f32, shaped (1, N) for in-kernel broadcast
        return jnp.asarray(np.asarray(x, np.float32).reshape(1, -1))

    return {
        "a1": W(a1), "b1": Bv(b1),
        "a2": W(a2), "b2": Bv(b2),
        "wfc": W(params["ve_fc_w"]), "bfc": Bv(params["ve_fc_b"]),
        "wpe": W(wpe), "bpe": Bv(bpe),
        "wfv": W(wfv), "wfp": W(wfp), "bfu": Bv(params["fusion_b"]),
        "whead": W(whead), "bhead": Bv(bhead),
        "wz": W(params["z2f_w"]), "bz": Bv(params["z2f_b"]),
        "wdec": W(wdec), "bdec": Bv(bdec),
    }


# ---------------------------------------------------------------------------
# Forward pass (single pallas_call)
# ---------------------------------------------------------------------------
def _round_up(x, m):
    return ((x + m - 1) // m) * m


def _pick_bm(b_pad):
    # Tiny batches: single step (block == full array rows, latency-bound anyway).
    if b_pad <= 16:
        return b_pad
    # Otherwise aim for >=2 grid steps (engages both v7x TensorCores via the
    # "parallel" grid axis), 16-row aligned for bf16 sublane packing, capped at
    # 512 rows to keep VMEM buffers comfortable while filling the MXU M dim.
    return min(512, _round_up((b_pad + 1) // 2, 16))


def multimodal_beta_vae_forward(kparams, observations, eps):
    xv = observations["vision"]
    B = xv.shape[0]

    b_pad = _round_up(max(B, 8), 8)              # sublane-pad the batch
    pad = b_pad - B

    xv = xv.reshape(B, VIS_FLAT).astype(IO_DTYPE)        # NCHW flatten, bf16 stream
    xp = observations["proprio"].astype(jnp.float32)
    eps = eps.astype(jnp.float32)
    xp = jnp.pad(xp, ((0, pad), (0, PROP_IN_PAD - PROP_IN)))
    if pad:
        xv = jnp.pad(xv, ((0, pad), (0, 0)))
        eps = jnp.pad(eps, ((0, pad), (0, 0)))

    bm = _pick_bm(b_pad)
    grid = (pl.cdiv(b_pad, bm),)

    def row_spec(n):
        return pl.BlockSpec((bm, n), lambda i: (i, 0))

    def weight_spec(arr):
        # Constant index map: weight tile stays VMEM-resident across all steps.
        return pl.BlockSpec(arr.shape, lambda i: (0, 0))

    w_args = [kparams[k] for k in _WEIGHT_ORDER]
    in_specs = [row_spec(VIS_FLAT), row_spec(PROP_IN_PAD), row_spec(LATENT_DIM)]
    in_specs += [weight_spec(w) for w in w_args]

    out_shape = (
        jax.ShapeDtypeStruct((b_pad, HEAD_OUT), jnp.float32),     # [mu | log_var]
        jax.ShapeDtypeStruct((b_pad, LATENT_DIM), jnp.float32),   # z
        jax.ShapeDtypeStruct((b_pad, DEC_OUT), IO_DTYPE),         # [vision | proprio]
    )
    out_specs = (row_spec(HEAD_OUT), row_spec(LATENT_DIM), row_spec(DEC_OUT))

    # Explicit scoped-VMEM budget: keeps larger tiles alive on v5e's 16 MiB
    # default and stays well under v7x's 64 MiB physical VMEM.
    vmem_limit = (40 if bm > 256 else 32) * 1024 * 1024

    mulv, z, recon = pl.pallas_call(
        _fused_vae_kernel,
        out_shape=out_shape,
        grid=grid,
        in_specs=in_specs,
        out_specs=out_specs,
        compiler_params=pltpu.CompilerParams(
            dimension_semantics=("parallel",),
            vmem_limit_bytes=vmem_limit),
    )(xv, xp, eps, *w_args)

    mu = mulv[:B, :LATENT_DIM]
    log_var = mulv[:B, LATENT_DIM:]
    z = z[:B]
    vis = recon[:B, :VIS_FLAT].astype(jnp.float32).reshape(
        B, VISION_C, VISION_HW, VISION_HW)
    prop = recon[:B, VIS_FLAT:VIS_FLAT + PROP_IN].astype(jnp.float32)
    reco_observations = {"vision": vis, "proprio": prop}
    return mu, log_var, z, reco_observations


# ---------------------------------------------------------------------------
# Pure-JAX f32 reference (for correctness check of the fused kernel)
# ---------------------------------------------------------------------------
def reference_forward(params, observations, eps):
    xv = observations["vision"]
    h = jax.lax.conv_general_dilated(
        xv, params["ve_conv1_w"], (2, 2), ((1, 1), (1, 1)),
        dimension_numbers=("NCHW", "OIHW", "NCHW"))
    h = jax.nn.relu(h + params["ve_conv1_b"][None, :, None, None])
    h = jax.lax.conv_general_dilated(
        h, params["ve_conv2_w"], (2, 2), ((1, 1), (1, 1)),
        dimension_numbers=("NCHW", "OIHW", "NCHW"))
    h = jax.nn.relu(h + params["ve_conv2_b"][None, :, None, None])
    h = h.reshape(h.shape[0], -1)
    v = jax.nn.relu(h @ params["ve_fc_w"] + params["ve_fc_b"])
    p = jax.nn.relu(observations["proprio"] @ params["pe_fc_w"] + params["pe_fc_b"])
    f = jax.nn.relu(jnp.concatenate([v, p], -1) @ params["fusion_w"] + params["fusion_b"])
    mu = f @ params["mu_w"] + params["mu_b"]
    lv = f @ params["var_w"] + params["var_b"]
    z = eps * jnp.exp(0.5 * lv) + mu
    dec = z @ params["z2f_w"] + params["z2f_b"]
    vis = jax.nn.sigmoid(dec @ params["vd_fc_w"] + params["vd_fc_b"])
    vis = vis.reshape(-1, VISION_C, VISION_HW, VISION_HW)
    pr = dec @ params["pd_fc_w"] + params["pd_fc_b"]
    return mu, lv, z, {"vision": vis, "proprio": pr}


# ---------------------------------------------------------------------------
if __name__ == "__main__":
    key = jax.random.PRNGKey(0)
    k_param, k_vis, k_prop, k_eps = jax.random.split(key, 4)

    params = init_params(k_param)
    kparams = prepare_params(params)        # one-time weight-layout transform

    B = 2
    observations = {
        "vision": jax.random.normal(k_vis, (B, VISION_C, VISION_HW, VISION_HW), jnp.float32),
        "proprio": jax.random.normal(k_prop, (B, PROP_IN), jnp.float32),
    }
    # eps for the reparameterization trick (torch.randn_like equivalent).
    eps = jax.random.normal(k_eps, (B, LATENT_DIM), jnp.float32)

    fwd = jax.jit(multimodal_beta_vae_forward)
    mu, log_var, z, reco = fwd(kparams, observations, eps)
    jax.block_until_ready((mu, log_var, z, reco))

    assert mu.shape == (B, LATENT_DIM) and log_var.shape == (B, LATENT_DIM)
    assert z.shape == (B, LATENT_DIM)
    assert reco["vision"].shape == (B, VISION_C, VISION_HW, VISION_HW)
    assert reco["proprio"].shape == (B, PROP_IN)

    # Correctness check against pure-JAX f32 reference (loose tol for bf16 MXU ops
    # and bf16 activation I/O).
    r_mu, r_lv, r_z, r_reco = jax.jit(reference_forward)(params, observations, eps)
    jax.block_until_ready((r_mu, r_lv, r_z, r_reco))

    def max_abs_diff(a, b):
        return float(jnp.max(jnp.abs(a.astype(jnp.float32) - b.astype(jnp.float32))))

    tol = 5e-2
    assert max_abs_diff(mu, r_mu) < tol
    assert max_abs_diff(log_var, r_lv) < tol
    assert max_abs_diff(z, r_z) < tol
    assert max_abs_diff(reco["vision"], r_reco["vision"]) < tol
    assert max_abs_diff(reco["proprio"], r_reco["proprio"]) < tol

    print("KERNEL_OK")
</pallas_src>

<mosaic_0001>
module attributes {stable_mosaic.version = 11 : i64} {
  func.func @_fused_vae_kernel(%arg0: i32, %arg1: memref<8x1024xbf16, #tpu.memory_space<vmem>>, %arg2: memref<8x8xf32, #tpu.memory_space<vmem>>, %arg3: memref<8x128xf32, #tpu.memory_space<vmem>>, %arg4: memref<1024x512xbf16, #tpu.memory_space<vmem>>, %arg5: memref<1x512xf32, #tpu.memory_space<vmem>>, %arg6: memref<512x256xbf16, #tpu.memory_space<vmem>>, %arg7: memref<1x256xf32, #tpu.memory_space<vmem>>, %arg8: memref<256x128xbf16, #tpu.memory_space<vmem>>, %arg9: memref<1x128xf32, #tpu.memory_space<vmem>>, %arg10: memref<8x128xbf16, #tpu.memory_space<vmem>>, %arg11: memref<1x128xf32, #tpu.memory_space<vmem>>, %arg12: memref<128x256xbf16, #tpu.memory_space<vmem>>, %arg13: memref<128x256xbf16, #tpu.memory_space<vmem>>, %arg14: memref<1x256xf32, #tpu.memory_space<vmem>>, %arg15: memref<256x256xbf16, #tpu.memory_space<vmem>>, %arg16: memref<1x256xf32, #tpu.memory_space<vmem>>, %arg17: memref<128x256xbf16, #tpu.memory_space<vmem>>, %arg18: memref<1x256xf32, #tpu.memory_space<vmem>>, %arg19: memref<256x1152xbf16, #tpu.memory_space<vmem>>, %arg20: memref<1x1152xf32, #tpu.memory_space<vmem>>, %arg21: memref<8x256xf32, #tpu.memory_space<vmem>>, %arg22: memref<8x128xf32, #tpu.memory_space<vmem>>, %arg23: memref<8x1152xbf16, #tpu.memory_space<vmem>>) attributes {dimension_semantics = [#tpu.dimension_semantics<parallel>], iteration_bounds = array<i64: 1>, scalar_prefetch = 0 : i64, scratch_operands = 0 : i64, tpu.core_type = #tpu.core_type<tc>, window_params = [{transform_indices = @transform_0, window_bounds = array<i64: 8, 1024>}, {transform_indices = @transform_1, window_bounds = array<i64: 8, 8>}, {transform_indices = @transform_2, window_bounds = array<i64: 8, 128>}, {pipeline_mode = #tpu.pipeline_mode<synchronous>, transform_indices = @transform_3, window_bounds = array<i64: 1024, 512>}, {pipeline_mode = #tpu.pipeline_mode<synchronous>, transform_indices = @transform_4, window_bounds = array<i64: 1, 512>}, {pipeline_mode = #tpu.pipeline_mode<synchronous>, transform_indices = @transform_5, window_bounds = array<i64: 512, 256>}, {pipeline_mode = #tpu.pipeline_mode<synchronous>, transform_indices = @transform_6, window_bounds = array<i64: 1, 256>}, {pipeline_mode = #tpu.pipeline_mode<synchronous>, transform_indices = @transform_7, window_bounds = array<i64: 256, 128>}, {pipeline_mode = #tpu.pipeline_mode<synchronous>, transform_indices = @transform_8, window_bounds = array<i64: 1, 128>}, {pipeline_mode = #tpu.pipeline_mode<synchronous>, transform_indices = @transform_9, window_bounds = array<i64: 8, 128>}, {pipeline_mode = #tpu.pipeline_mode<synchronous>, transform_indices = @transform_10, window_bounds = array<i64: 1, 128>}, {pipeline_mode = #tpu.pipeline_mode<synchronous>, transform_indices = @transform_11, window_bounds = array<i64: 128, 256>}, {pipeline_mode = #tpu.pipeline_mode<synchronous>, transform_indices = @transform_12, window_bounds = array<i64: 128, 256>}, {pipeline_mode = #tpu.pipeline_mode<synchronous>, transform_indices = @transform_13, window_bounds = array<i64: 1, 256>}, {pipeline_mode = #tpu.pipeline_mode<synchronous>, transform_indices = @transform_14, window_bounds = array<i64: 256, 256>}, {pipeline_mode = #tpu.pipeline_mode<synchronous>, transform_indices = @transform_15, window_bounds = array<i64: 1, 256>}, {pipeline_mode = #tpu.pipeline_mode<synchronous>, transform_indices = @transform_16, window_bounds = array<i64: 128, 256>}, {pipeline_mode = #tpu.pipeline_mode<synchronous>, transform_indices = @transform_17, window_bounds = array<i64: 1, 256>}, {pipeline_mode = #tpu.pipeline_mode<synchronous>, transform_indices = @transform_18, window_bounds = array<i64: 256, 1152>}, {pipeline_mode = #tpu.pipeline_mode<synchronous>, transform_indices = @transform_19, window_bounds = array<i64: 1, 1152>}, {transform_indices = @transform_20, window_bounds = array<i64: 8, 256>}, {transform_indices = @transform_21, window_bounds = array<i64: 8, 128>}, {transform_indices = @transform_22, window_bounds = array<i64: 8, 1152>}]} {
    %c0 = arith.constant 0 : index
    %c0_0 = arith.constant 0 : index
    %0 = vector.load %arg1[%c0, %c0_0] : memref<8x1024xbf16, #tpu.memory_space<vmem>>, vector<8x1024xbf16>
    %c0_1 = arith.constant 0 : index
    %c0_2 = arith.constant 0 : index
    %1 = vector.load %arg4[%c0_1, %c0_2] : memref<1024x512xbf16, #tpu.memory_space<vmem>>, vector<1024x512xbf16>
    %cst = arith.constant dense<0.000000e+00> : vector<8x512xf32>
    %2 = tpu.matmul %0, %1, %cst {dimension_numbers = #tpu.dot_dimension_numbers<[1], [0], [0], [1], [0, 0, 1, 1], [], []>} : vector<8x1024xbf16>, vector<1024x512xbf16>, vector<8x512xf32> -> vector<8x512xf32>
    %c0_3 = arith.constant 0 : index
    %c0_4 = arith.constant 0 : index
    %3 = vector.load %arg5[%c0_3, %c0_4] : memref<1x512xf32, #tpu.memory_space<vmem>>, vector<1x512xf32>
    %4 = vector.broadcast %3 : vector<1x512xf32> to vector<8x512xf32>
    %5 = arith.addf %2, %4 : vector<8x512xf32>
    %cst_5 = arith.constant 0.000000e+00 : f32
    %6 = vector.broadcast %cst_5 : f32 to vector<8x512xf32>
    %7 = arith.maximumf %5, %6 : vector<8x512xf32>
    %8 = arith.truncf %7 : vector<8x512xf32> to vector<8x512xbf16>
    %c0_6 = arith.constant 0 : index
    %c0_7 = arith.constant 0 : index
    %9 = vector.load %arg6[%c0_6, %c0_7] : memref<512x256xbf16, #tpu.memory_space<vmem>>, vector<512x256xbf16>
    %cst_8 = arith.constant dense<0.000000e+00> : vector<8x256xf32>
    %10 = tpu.matmul %8, %9, %cst_8 {dimension_numbers = #tpu.dot_dimension_numbers<[1], [0], [0], [1], [0, 0, 1, 1], [], []>} : vector<8x512xbf16>, vector<512x256xbf16>, vector<8x256xf32> -> vector<8x256xf32>
    %c0_9 = arith.constant 0 : index
    %c0_10 = arith.constant 0 : index
    %11 = vector.load %arg7[%c0_9, %c0_10] : memref<1x256xf32, #tpu.memory_space<vmem>>, vector<1x256xf32>
    %12 = vector.broadcast %11 : vector<1x256xf32> to vector<8x256xf32>
    %13 = arith.addf %10, %12 : vector<8x256xf32>
    %cst_11 = arith.constant 0.000000e+00 : f32
    %14 = vector.broadcast %cst_11 : f32 to vector<8x256xf32>
    %15 = arith.maximumf %13, %14 : vector<8x256xf32>
    %16 = arith.truncf %15 : vector<8x256xf32> to vector<8x256xbf16>
    %c0_12 = arith.constant 0 : index
    %c0_13 = arith.constant 0 : index
    %17 = vector.load %arg8[%c0_12, %c0_13] : memref<256x128xbf16, #tpu.memory_space<vmem>>, vector<256x128xbf16>
    %cst_14 = arith.constant dense<0.000000e+00> : vector<8x128xf32>
    %18 = tpu.matmul %16, %17, %cst_14 {dimension_numbers = #tpu.dot_dimension_numbers<[1], [0], [0], [1], [0, 0, 1, 1], [], []>} : vector<8x256xbf16>, vector<256x128xbf16>, vector<8x128xf32> -> vector<8x128xf32>
    %c0_15 = arith.constant 0 : index
    %c0_16 = arith.constant 0 : index
    %19 = vector.load %arg9[%c0_15, %c0_16] : memref<1x128xf32, #tpu.memory_space<vmem>>, vector<1x128xf32>
    %20 = vector.broadcast %19 : vector<1x128xf32> to vector<8x128xf32>
    %21 = arith.addf %18, %20 : vector<8x128xf32>
    %cst_17 = arith.constant 0.000000e+00 : f32
    %22 = vector.broadcast %cst_17 : f32 to vector<8x128xf32>
    %23 = arith.maximumf %21, %22 : vector<8x128xf32>
    %c0_18 = arith.constant 0 : index
    %c0_19 = arith.constant 0 : index
    %24 = vector.load %arg2[%c0_18, %c0_19] : memref<8x8xf32, #tpu.memory_space<vmem>>, vector<8x8xf32>
    %25 = arith.truncf %24 : vector<8x8xf32> to vector<8x8xbf16>
    %c0_20 = arith.constant 0 : index
    %c0_21 = arith.constant 0 : index
    %26 = vector.load %arg10[%c0_20, %c0_21] : memref<8x128xbf16, #tpu.memory_space<vmem>>, vector<8x128xbf16>
    %cst_22 = arith.constant dense<0.000000e+00> : vector<8x128xf32>
    %27 = tpu.matmul %25, %26, %cst_22 {dimension_numbers = #tpu.dot_dimension_numbers<[1], [0], [0], [1], [0, 0, 1, 1], [], []>} : vector<8x8xbf16>, vector<8x128xbf16>, vector<8x128xf32> -> vector<8x128xf32>
    %c0_23 = arith.constant 0 : index
    %c0_24 = arith.constant 0 : index
    %28 = vector.load %arg11[%c0_23, %c0_24] : memref<1x128xf32, #tpu.memory_space<vmem>>, vector<1x128xf32>
    %29 = vector.broadcast %28 : vector<1x128xf32> to vector<8x128xf32>
    %30 = arith.addf %27, %29 : vector<8x128xf32>
    %cst_25 = arith.constant 0.000000e+00 : f32
    %31 = vector.broadcast %cst_25 : f32 to vector<8x128xf32>
    %32 = arith.maximumf %30, %31 : vector<8x128xf32>
    %33 = arith.truncf %23 : vector<8x128xf32> to vector<8x128xbf16>
    %c0_26 = arith.constant 0 : index
    %c0_27 = arith.constant 0 : index
    %34 = vector.load %arg12[%c0_26, %c0_27] : memref<128x256xbf16, #tpu.memory_space<vmem>>, vector<128x256xbf16>
    %cst_28 = arith.constant dense<0.000000e+00> : vector<8x256xf32>
    %35 = tpu.matmul %33, %34, %cst_28 {dimension_numbers = #tpu.dot_dimension_numbers<[1], [0], [0], [1], [0, 0, 1, 1], [], []>} : vector<8x128xbf16>, vector<128x256xbf16>, vector<8x256xf32> -> vector<8x256xf32>
    %36 = arith.truncf %32 : vector<8x128xf32> to vector<8x128xbf16>
    %c0_29 = arith.constant 0 : index
    %c0_30 = arith.constant 0 : index
    %37 = vector.load %arg13[%c0_29, %c0_30] : memref<128x256xbf16, #tpu.memory_space<vmem>>, vector<128x256xbf16>
    %cst_31 = arith.constant dense<0.000000e+00> : vector<8x256xf32>
    %38 = tpu.matmul %36, %37, %cst_31 {dimension_numbers = #tpu.dot_dimension_numbers<[1], [0], [0], [1], [0, 0, 1, 1], [], []>} : vector<8x128xbf16>, vector<128x256xbf16>, vector<8x256xf32> -> vector<8x256xf32>
    %39 = arith.addf %35, %38 : vector<8x256xf32>
    %c0_32 = arith.constant 0 : index
    %c0_33 = arith.constant 0 : index
    %40 = vector.load %arg14[%c0_32, %c0_33] : memref<1x256xf32, #tpu.memory_space<vmem>>, vector<1x256xf32>
    %41 = vector.broadcast %40 : vector<1x256xf32> to vector<8x256xf32>
    %42 = arith.addf %39, %41 : vector<8x256xf32>
    %cst_34 = arith.constant 0.000000e+00 : f32
    %43 = vector.broadcast %cst_34 : f32 to vector<8x256xf32>
    %44 = arith.maximumf %42, %43 : vector<8x256xf32>
    %45 = arith.truncf %44 : vector<8x256xf32> to vector<8x256xbf16>
    %c0_35 = arith.constant 0 : index
    %c0_36 = arith.constant 0 : index
    %46 = vector.load %arg15[%c0_35, %c0_36] : memref<256x256xbf16, #tpu.memory_space<vmem>>, vector<256x256xbf16>
    %cst_37 = arith.constant dense<0.000000e+00> : vector<8x256xf32>
    %47 = tpu.matmul %45, %46, %cst_37 {dimension_numbers = #tpu.dot_dimension_numbers<[1], [0], [0], [1], [0, 0, 1, 1], [], []>} : vector<8x256xbf16>, vector<256x256xbf16>, vector<8x256xf32> -> vector<8x256xf32>
    %c0_38 = arith.constant 0 : index
    %c0_39 = arith.constant 0 : index
    %48 = vector.load %arg16[%c0_38, %c0_39] : memref<1x256xf32, #tpu.memory_space<vmem>>, vector<1x256xf32>
    %49 = vector.broadcast %48 : vector<1x256xf32> to vector<8x256xf32>
    %50 = arith.addf %47, %49 : vector<8x256xf32>
    %51 = vector.extract_strided_slice %50 {offsets = [0, 0], sizes = [8, 128], strides = [1, 1]} : vector<8x256xf32> to vector<8x128xf32>
    %52 = vector.extract_strided_slice %50 {offsets = [0, 128], sizes = [8, 128], strides = [1, 1]} : vector<8x256xf32> to vector<8x128xf32>
    %cst_40 = arith.constant 5.000000e-01 : f32
    %53 = vector.broadcast %cst_40 : f32 to vector<8x128xf32>
    %54 = arith.mulf %53, %52 : vector<8x128xf32>
    %55 = math.exp %54 : vector<8x128xf32>
    %c0_41 = arith.constant 0 : index
    %c0_42 = arith.constant 0 : index
    %56 = vector.load %arg3[%c0_41, %c0_42] : memref<8x128xf32, #tpu.memory_space<vmem>>, vector<8x128xf32>
    %57 = arith.mulf %56, %55 : vector<8x128xf32>
    %58 = arith.addf %57, %51 : vector<8x128xf32>
    %59 = arith.truncf %58 : vector<8x128xf32> to vector<8x128xbf16>
    %c0_43 = arith.constant 0 : index
    %c0_44 = arith.constant 0 : index
    %60 = vector.load %arg17[%c0_43, %c0_44] : memref<128x256xbf16, #tpu.memory_space<vmem>>, vector<128x256xbf16>
    %cst_45 = arith.constant dense<0.000000e+00> : vector<8x256xf32>
    %61 = tpu.matmul %59, %60, %cst_45 {dimension_numbers = #tpu.dot_dimension_numbers<[1], [0], [0], [1], [0, 0, 1, 1], [], []>} : vector<8x128xbf16>, vector<128x256xbf16>, vector<8x256xf32> -> vector<8x256xf32>
    %c0_46 = arith.constant 0 : index
    %c0_47 = arith.constant 0 : index
    %62 = vector.load %arg18[%c0_46, %c0_47] : memref<1x256xf32, #tpu.memory_space<vmem>>, vector<1x256xf32>
    %63 = vector.broadcast %62 : vector<1x256xf32> to vector<8x256xf32>
    %64 = arith.addf %61, %63 : vector<8x256xf32>
    %65 = arith.truncf %64 : vector<8x256xf32> to vector<8x256xbf16>
    %c0_48 = arith.constant 0 : index
    %c0_49 = arith.constant 0 : index
    %66 = vector.load %arg19[%c0_48, %c0_49] : memref<256x1152xbf16, #tpu.memory_space<vmem>>, vector<256x1152xbf16>
    %cst_50 = arith.constant dense<0.000000e+00> : vector<8x1152xf32>
    %67 = tpu.matmul %65, %66, %cst_50 {dimension_numbers = #tpu.dot_dimension_numbers<[1], [0], [0], [1], [0, 0, 1, 1], [], []>} : vector<8x256xbf16>, vector<256x1152xbf16>, vector<8x1152xf32> -> vector<8x1152xf32>
    %c0_51 = arith.constant 0 : index
    %c0_52 = arith.constant 0 : index
    %68 = vector.load %arg20[%c0_51, %c0_52] : memref<1x1152xf32, #tpu.memory_space<vmem>>, vector<1x1152xf32>
    %69 = vector.broadcast %68 : vector<1x1152xf32> to vector<8x1152xf32>
    %70 = arith.addf %67, %69 : vector<8x1152xf32>
    %71 = tpu.iota {dimensions = array<i32: 1>} : vector<8x1152xi32>
    %c1024_i32 = arith.constant 1024 : i32
    %72 = vector.broadcast %c1024_i32 : i32 to vector<8x1152xi32>
    %73 = arith.cmpi slt, %71, %72 : vector<8x1152xi32>
    %74 = arith.negf %70 : vector<8x1152xf32>
    %75 = math.exp %74 : vector<8x1152xf32>
    %cst_53 = arith.constant 1.000000e+00 : f32
    %76 = vector.broadcast %cst_53 : f32 to vector<8x1152xf32>
    %77 = arith.addf %76, %75 : vector<8x1152xf32>
    %78 = arith.divf %76, %77 : vector<8x1152xf32>
    %79 = arith.select %73, %78, %70 : vector<8x1152xi1>, vector<8x1152xf32>
    %c0_54 = arith.constant 0 : index
    %c0_55 = arith.constant 0 : index
    %80 = vector.load %arg21[%c0_54, %c0_55] : memref<8x256xf32, #tpu.memory_space<vmem>>, vector<8x256xf32>
    tpu.vector_store %arg21[%c0_54, %c0_55], %50 {strides = array<i32>} : memref<8x256xf32, #tpu.memory_space<vmem>>, vector<8x256xf32>,
    %c0_56 = arith.constant 0 : index
    %c0_57 = arith.constant 0 : index
    %81 = vector.load %arg22[%c0_56, %c0_57] : memref<8x128xf32, #tpu.memory_space<vmem>>, vector<8x128xf32>
    tpu.vector_store %arg22[%c0_56, %c0_57], %58 {strides = array<i32>} : memref<8x128xf32, #tpu.memory_space<vmem>>, vector<8x128xf32>,
    %82 = arith.truncf %79 : vector<8x1152xf32> to vector<8x1152xbf16>
    %c0_58 = arith.constant 0 : index
    %c0_59 = arith.constant 0 : index
    %83 = vector.load %arg23[%c0_58, %c0_59] : memref<8x1152xbf16, #tpu.memory_space<vmem>>, vector<8x1152xbf16>
    tpu.vector_store %arg23[%c0_58, %c0_59], %82 {strides = array<i32>} : memref<8x1152xbf16, #tpu.memory_space<vmem>>, vector<8x1152xbf16>,
    return
  }
  func.func @transform_0(%arg0: i32) -> (i32, i32) {
    %c0_i32 = arith.constant 0 : i32
    %c0_i32_0 = arith.constant 0 : i32
    return %arg0, %c0_i32 : i32, i32
  }
  func.func @transform_1(%arg0: i32) -> (i32, i32) {
    %c0_i32 = arith.constant 0 : i32
    %c0_i32_0 = arith.constant 0 : i32
    return %arg0, %c0_i32 : i32, i32
  }
  func.func @transform_2(%arg0: i32) -> (i32, i32) {
    %c0_i32 = arith.constant 0 : i32
    %c0_i32_0 = arith.constant 0 : i32
    return %arg0, %c0_i32 : i32, i32
  }
  func.func @transform_3(%arg0: i32) -> (i32, i32) {
    %c0_i32 = arith.constant 0 : i32
    %c0_i32_0 = arith.constant 0 : i32
    %c0_i32_1 = arith.constant 0 : i32
    return %c0_i32, %c0_i32_0 : i32, i32
  }
  func.func @transform_4(%arg0: i32) -> (i32, i32) {
    %c0_i32 = arith.constant 0 : i32
    %c0_i32_0 = arith.constant 0 : i32
    %c0_i32_1 = arith.constant 0 : i32
    return %c0_i32, %c0_i32_0 : i32, i32
  }
  func.func @transform_5(%arg0: i32) -> (i32, i32) {
    %c0_i32 = arith.constant 0 : i32
    %c0_i32_0 = arith.constant 0 : i32
    %c0_i32_1 = arith.constant 0 : i32
    return %c0_i32, %c0_i32_0 : i32, i32
  }
  func.func @transform_6(%arg0: i32) -> (i32, i32) {
    %c0_i32 = arith.constant 0 : i32
    %c0_i32_0 = arith.constant 0 : i32
    %c0_i32_1 = arith.constant 0 : i32
    return %c0_i32, %c0_i32_0 : i32, i32
  }
  func.func @transform_7(%arg0: i32) -> (i32, i32) {
    %c0_i32 = arith.constant 0 : i32
    %c0_i32_0 = arith.constant 0 : i32
    %c0_i32_1 = arith.constant 0 : i32
    return %c0_i32, %c0_i32_0 : i32, i32
  }
  func.func @transform_8(%arg0: i32) -> (i32, i32) {
    %c0_i32 = arith.constant 0 : i32
    %c0_i32_0 = arith.constant 0 : i32
    %c0_i32_1 = arith.constant 0 : i32
    return %c0_i32, %c0_i32_0 : i32, i32
  }
  func.func @transform_9(%arg0: i32) -> (i32, i32) {
    %c0_i32 = arith.constant 0 : i32
    %c0_i32_0 = arith.constant 0 : i32
    %c0_i32_1 = arith.constant 0 : i32
    return %c0_i32, %c0_i32_0 : i32, i32
  }
  func.func @transform_10(%arg0: i32) -> (i32, i32) {
    %c0_i32 = arith.constant 0 : i32
    %c0_i32_0 = arith.constant 0 : i32
    %c0_i32_1 = arith.constant 0 : i32
    return %c0_i32, %c0_i32_0 : i32, i32
  }
  func.func @transform_11(%arg0: i32) -> (i32, i32) {
    %c0_i32 = arith.constant 0 : i32
    %c0_i32_0 = arith.constant 0 : i32
    %c0_i32_1 = arith.constant 0 : i32
    return %c0_i32, %c0_i32_0 : i32, i32
  }
  func.func @transform_12(%arg0: i32) -> (i32, i32) {
    %c0_i32 = arith.constant 0 : i32
    %c0_i32_0 = arith.constant 0 : i32
    %c0_i32_1 = arith.constant 0 : i32
    return %c0_i32, %c0_i32_0 : i32, i32
  }
  func.func @transform_13(%arg0: i32) -> (i32, i32) {
    %c0_i32 = arith.constant 0 : i32
    %c0_i32_0 = arith.constant 0 : i32
    %c0_i32_1 = arith.constant 0 : i32
    return %c0_i32, %c0_i32_0 : i32, i32
  }
  func.func @transform_14(%arg0: i32) -> (i32, i32) {
    %c0_i32 = arith.constant 0 : i32
    %c0_i32_0 = arith.constant 0 : i32
    %c0_i32_1 = arith.constant 0 : i32
    return %c0_i32, %c0_i32_0 : i32, i32
  }
  func.func @transform_15(%arg0: i32) -> (i32, i32) {
    %c0_i32 = arith.constant 0 : i32
    %c0_i32_0 = arith.constant 0 : i32
    %c0_i32_1 = arith.constant 0 : i32
    return %c0_i32, %c0_i32_0 : i32, i32
  }
  func.func @transform_16(%arg0: i32) -> (i32, i32) {
    %c0_i32 = arith.constant 0 : i32
    %c0_i32_0 = arith.constant 0 : i32
    %c0_i32_1 = arith.constant 0 : i32
    return %c0_i32, %c0_i32_0 : i32, i32
  }
  func.func @transform_17(%arg0: i32) -> (i32, i32) {
    %c0_i32 = arith.constant 0 : i32
    %c0_i32_0 = arith.constant 0 : i32
    %c0_i32_1 = arith.constant 0 : i32
    return %c0_i32, %c0_i32_0 : i32, i32
  }
  func.func @transform_18(%arg0: i32) -> (i32, i32) {
    %c0_i32 = arith.constant 0 : i32
    %c0_i32_0 = arith.constant 0 : i32
    %c0_i32_1 = arith.constant 0 : i32
    return %c0_i32, %c0_i32_0 : i32, i32
  }
  func.func @transform_19(%arg0: i32) -> (i32, i32) {
    %c0_i32 = arith.constant 0 : i32
    %c0_i32_0 = arith.constant 0 : i32
    %c0_i32_1 = arith.constant 0 : i32
    return %c0_i32, %c0_i32_0 : i32, i32
  }
  func.func @transform_20(%arg0: i32) -> (i32, i32) {
    %c0_i32 = arith.constant 0 : i32
    %c0_i32_0 = arith.constant 0 : i32
    return %arg0, %c0_i32 : i32, i32
  }
  func.func @transform_21(%arg0: i32) -> (i32, i32) {
    %c0_i32 = arith.constant 0 : i32
    %c0_i32_0 = arith.constant 0 : i32
    return %arg0, %c0_i32 : i32, i32
  }
  func.func @transform_22(%arg0: i32) -> (i32, i32) {
    %c0_i32 = arith.constant 0 : i32
    %c0_i32_0 = arith.constant 0 : i32
    return %arg0, %c0_i32 : i32, i32
  }
}

</mosaic_0001>

<bundles_post_ra>
// kernel: multimodal_beta_vae_forward.1
= control target key start
LH: loop header
LB: loop body
LE: loop exit
PB: predicated region body
PF: predicated region fallthrough
CT: control target
= control target key end

     0   :  { %s7311_s0 = inlined_call_operand.vmem [shape: bf16[8,1024], index: 0, kind: input, shape index: {}]   ;;  %s7312_s1 = inlined_call_operand.vmem [shape: f32[8,8], index: 1, kind: input, shape index: {}]   ;;  %s7313_s2 = inlined_call_operand.vmem [shape: f32[8,128], index: 2, kind: input, shape index: {}]   ;;  %s7314_s3 = inlined_call_operand.hbm [shape: bf16[1024,512], index: 3, kind: input, shape index: {}]   ;;  %s7315_s4 = inlined_call_operand.hbm [shape: f32[1,512], index: 4, kind: input, shape index: {}]   ;;  %s7316_s5 = inlined_call_operand.hbm [shape: bf16[512,256], index: 5, kind: input, shape index: {}]   ;;  %s7317_s6 = inlined_call_operand.vmem [shape: f32[1,256], index: 6, kind: input, shape index: {}]   ;;  %s7318_s7 = inlined_call_operand.hbm [shape: bf16[256,128], index: 7, kind: input, shape index: {}]   ;;  %s7319_s8 = inlined_call_operand.vmem [shape: f32[1,128], index: 8, kind: input, shape index: {}]   ;;  %s7320_s9 = inlined_call_operand.hbm [shape: bf16[8,128], index: 9, kind: input, shape index: {}]   ;;  %s7321_s10 = inlined_call_operand.hbm [shape: f32[1,128], index: 10, kind: input, shape index: {}]   ;;  %s7322_s11 = inlined_call_operand.hbm [shape: bf16[128,256], index: 11, kind: input, shape index: {}]   ;;  %s7323_s12 = inlined_call_operand.hbm [shape: bf16[128,256], index: 12, kind: input, shape index: {}]   ;;  %s7324_s13 = inlined_call_operand.hbm [shape: f32[1,256], index: 13, kind: input, shape index: {}]   ;;  %s7325_s14 = inlined_call_operand.vmem [shape: bf16[256,256], index: 14, kind: input, shape index: {}]   ;;  %s7326_s15 = inlined_call_operand.hbm [shape: f32[1,256], index: 15, kind: input, shape index: {}]   ;;  %s7327_s16 = inlined_call_operand.vmem [shape: bf16[128,256], index: 16, kind: input, shape index: {}]   ;;  %s7328_s17 = inlined_call_operand.hbm [shape: f32[1,256], index: 17, kind: input, shape index: {}]   ;;  %s7329_s18 = inlined_call_operand.hbm [shape: bf16[256,1152], index: 18, kind: input, shape index: {}]   ;;  %s7330_s19 = inlined_call_operand.hbm [shape: f32[1,1152], index: 19, kind: input, shape index: {}]   ;;  %s7331_s20 = inlined_call_operand.vmem [shape: f32[8,256], index: 20, kind: output, shape index: {0}]   ;;  %s7332_s21 = inlined_call_operand.vmem [shape: f32[8,128], index: 21, kind: output, shape index: {1}]   ;;  %s7333_s22 = inlined_call_operand.vmem [shape: bf16[8,1152], index: 22, kind: output, shape index: {2}]  }
   0x1   :  { %7338 = sst [smem:[#allocation29_spill]] %s7311_s0 }
   0x2   :  { %7339 = sst [smem:[#allocation30_spill]] %s7312_s1 }
   0x3   :  { %7340 = sst [smem:[#allocation31_spill]] %s7313_s2 }
   0x4   :  { %7341 = sst [smem:[#allocation32_spill]] %s7314_s3 }
   0x5   :  { %7342 = sst [smem:[#allocation33_spill]] %s7315_s4 }
   0x6   :  { %7343 = sst [smem:[#allocation34_spill]] %s7316_s5 }
   0x7   :  { %7344 = sst [smem:[#allocation35_spill]] %s7317_s6 }
   0x8   :  { %28 = vsyncpa [#allocation3], 0 }
   0x9   :  { %29 = vsyncpa [#allocation5], 0 }
   0xa   :  { %30 = vsyncpa [#allocation8], 0 }
   0xb   :  { %31 = vsyncpa [#allocation11], 0 }
   0xc   :  { %32 = vsyncpa [#allocation14], 0 }
   0xd   :  { %33 = vsyncpa [#allocation17], 0 }
   0xe   :  { %34 = vsyncpa [#allocation20], 0  ;;  %s6733_s3 = smov [#allocation4]   ;;  %s6734_s29 = smov [#allocation7]  }
   0xf   :  { %s59_s28 = sshll.u32 %s6733_s3, 4  ;;  %s82_s30 = sshll.u32 %s6734_s29, 4  ;;  %s60_s28 = int_to_ptr.vmem [resolvable:$true] %s59_s28  ;;  %s6872_s30 = int_to_ptr.vmem [resolvable:$true] %s82_s30 }
  0x10   :  { %s7345_s23 = sld [smem:[#allocation33_spill]] }
  0x16   :  { %s6433_s1 = scalar_lea.hbm %s7345_s23, 64 }
  0x17   :  { %p6434_p0 = scmp.ne.s32.totalorder %s7345_s23, %s6433_s1  ;;  %p6437_p1 = scmp.lt.u32.totalorder %s6433_s1, %s7345_s23 }
  0x19   :  { %p6439_p2 = pnand %p6437_p1, %p6434_p0 }
  0x1b   :  { %6442 = shalt.err (!%p6439_p2)
}
  0x1c   :  { %s6443_s26 = scalar_lea.vmem %s60_s28, 64  ;;  %p6448_p4 = scmp.lt.s32.totalorder %s60_s28, %s60_s28 }
  0x1d   :  { %p6444_p3 = scmp.ne.s32.totalorder %s60_s28, %s6443_s26  ;;  %p6449_p5 = scmp.lt.s32.totalorder %s6443_s26, %s6443_s26 }
  0x1f   :  { %p6450_p6 = por %p6449_p5, %p6448_p4 }
  0x21   :  { %p6451_p7 = pnand %p6450_p6, %p6444_p3 }
  0x23   :  { %6454 = shalt.err (!%p6451_p7)
}
  0x24   :  { %62 = dma.hbm_to_vmem [thread:$0]  %s7345_s23, 64, %s60_s28, [#allocation5]  }
  0x25   :  { %s6455_s4 = scalar_lea.hbm %s7318_s7, 2048 }
  0x26   :  { %p6456_p8 = scmp.ne.s32.totalorder %s7318_s7, %s6455_s4  ;;  %p6459_p9 = scmp.lt.u32.totalorder %s6455_s4, %s7318_s7 }
  0x28   :  { %p6461_p10 = pnand %p6459_p9, %p6456_p8 }
  0x2a   :  { %6464 = shalt.err (!%p6461_p10)
}
  0x2b   :  { %s6465_s6 = scalar_lea.vmem %s6872_s30, 2048  ;;  %p6470_p12 = scmp.lt.s32.totalorder %s6872_s30, %s6872_s30 }
  0x2c   :  { %p6466_p11 = scmp.ne.s32.totalorder %s6872_s30, %s6465_s6  ;;  %p6471_p13 = scmp.lt.s32.totalorder %s6465_s6, %s6465_s6 }
  0x2e   :  { %p6472_p0 = por %p6471_p13, %p6470_p12 }
  0x30   :  { %p6473_p1 = pnand %p6472_p0, %p6466_p11 }
  0x32   :  { %6476 = shalt.err (!%p6473_p1)
}
  0x33   :  { %s6735_s28 = smov 64   ;;  %s6736_s23 = smov 4  }
  0x34   :  { %88 = dma.hbm_to_vmem [thread:$0]  %s7318_s7, 2048, %s6872_s30, [#allocation8], %s6735_s28, %s6735_s28, %s6736_s23  }
  0x35   :  { %s6737_s2 = smov [#allocation10]   ;;  %s6477_s4 = scalar_lea.hbm %s7321_s10, 16 }
  0x36   :  { %s107_s27 = sshll.u32 %s6737_s2, 4  ;;  %p6478_p2 = scmp.ne.s32.totalorder %s7321_s10, %s6477_s4  ;;  %s108_s27 = int_to_ptr.vmem [resolvable:$true] %s107_s27 }
  0x37   :  { %p6481_p3 = scmp.lt.u32.totalorder %s6477_s4, %s7321_s10 }
  0x39   :  { %p6483_p4 = pnand %p6481_p3, %p6478_p2 }
  0x3b   :  { %6486 = shalt.err (!%p6483_p4)
}
  0x3c   :  { %s6487_s6 = scalar_lea.vmem %s108_s27, 16  ;;  %s6491_s7 = scalar_lea.vmem %s108_s27, 32 }
  0x3d   :  { %p6488_p5 = scmp.ne.s32.totalorder %s108_s27, %s6487_s6  ;;  %p6492_p6 = scmp.lt.s32.totalorder %s108_s27, %s108_s27 }
  0x3e   :  { %p6493_p7 = scmp.lt.s32.totalorder %s6491_s7, %s6487_s6 }
  0x40   :  { %p6494_p8 = por %p6493_p7, %p6492_p6 }
  0x42   :  { %p6495_p9 = pnand %p6494_p8, %p6488_p5 }
  0x44   :  { %6498 = shalt.err (!%p6495_p9)
}
  0x45   :  { %110 = dma.hbm_to_vmem [thread:$0]  %s7321_s10, 16, %s108_s27, [#allocation11]  }
  0x46   :  { %s6738_s23 = smov [#allocation13]   ;;  %s6739_s26 = smov [#allocation16]  }
  0x47   :  { %s128_s25 = sshll.u32 %s6738_s23, 4  ;;  %s153_s2 = sshll.u32 %s6739_s26, 4  ;;  %s129_s25 = int_to_ptr.vmem [resolvable:$true] %s128_s25  ;;  %s154_s2 = int_to_ptr.vmem [resolvable:$true] %s153_s2 }
  0x48   :  { %s6499_s4 = scalar_lea.hbm %s7323_s12, 2048 }
  0x49   :  { %p6500_p10 = scmp.ne.s32.totalorder %s7323_s12, %s6499_s4  ;;  %p6503_p11 = scmp.lt.u32.totalorder %s6499_s4, %s7323_s12 }
  0x4b   :  { %p6505_p12 = pnand %p6503_p11, %p6500_p10 }
  0x4d   :  { %6508 = shalt.err (!%p6505_p12)
}
  0x4e   :  { %s6509_s10 = scalar_lea.vmem %s129_s25, 2048  ;;  %p6514_p0 = scmp.lt.s32.totalorder %s129_s25, %s129_s25 }
  0x4f   :  { %p6510_p13 = scmp.ne.s32.totalorder %s129_s25, %s6509_s10  ;;  %p6515_p1 = scmp.lt.s32.totalorder %s6509_s10, %s6509_s10 }
  0x51   :  { %p6516_p2 = por %p6515_p1, %p6514_p0 }
  0x53   :  { %p6517_p3 = pnand %p6516_p2, %p6510_p13 }
  0x55   :  { %6520 = shalt.err (!%p6517_p3)
}
  0x56   :  { %s6740_s27 = smov 128   ;;  %s6741_s6 = smov 8  }
  0x57   :  { %134 = dma.hbm_to_vmem [thread:$0]  %s7323_s12, 2048, %s129_s25, [#allocation14], %s6740_s27, %s6740_s27, %s6741_s6  }
  0x58   :  { %s6521_s26 = scalar_lea.hbm %s7326_s15, 32 }
  0x59   :  { %p6522_p4 = scmp.ne.s32.totalorder %s7326_s15, %s6521_s26  ;;  %p6525_p5 = scmp.lt.u32.totalorder %s6521_s26, %s7326_s15 }
  0x5b   :  { %p6527_p6 = pnand %p6525_p5, %p6522_p4 }
  0x5d   :  { %6530 = shalt.err (!%p6527_p6)
}
  0x5e   :  { %s6531_s5 = scalar_lea.vmem %s154_s2, 32  ;;  %p6536_p8 = scmp.lt.s32.totalorder %s154_s2, %s154_s2 }
  0x5f   :  { %p6532_p7 = scmp.ne.s32.totalorder %s154_s2, %s6531_s5  ;;  %p6537_p9 = scmp.lt.s32.totalorder %s6531_s5, %s6531_s5 }
  0x61   :  { %p6538_p10 = por %p6537_p9, %p6536_p8 }
  0x63   :  { %p6539_p11 = pnand %p6538_p10, %p6532_p7 }
  0x65   :  { %6542 = shalt.err (!%p6539_p11)
}
  0x66   :  { %156 = dma.hbm_to_vmem [thread:$0]  %s7326_s15, 32, %s154_s2, [#allocation17]  }
  0x67   :  { %s6742_s1 = smov [#allocation19]   ;;  %s6543_s30 = scalar_lea.hbm %s7329_s18, 18432 }
  0x68   :  { %s174_s24 = sshll.u32 %s6742_s1, 4  ;;  %p6544_p12 = scmp.ne.s32.totalorder %s7329_s18, %s6543_s30  ;;  %s175_s24 = int_to_ptr.vmem [resolvable:$true] %s174_s24 }
  0x69   :  { %p6547_p13 = scmp.lt.u32.totalorder %s6543_s30, %s7329_s18 }
  0x6b   :  { %p6549_p0 = pnand %p6547_p13, %p6544_p12 }
  0x6d   :  { %6552 = shalt.err (!%p6549_p0)
}
  0x6e   :  { %s6553_s29 = scalar_lea.vmem %s175_s24, 18432  ;;  %p6558_p2 = scmp.lt.s32.totalorder %s175_s24, %s175_s24 }
  0x6f   :  { %p6554_p1 = scmp.ne.s32.totalorder %s175_s24, %s6553_s29  ;;  %p6559_p3 = scmp.lt.s32.totalorder %s6553_s29, %s6553_s29 }
  0x71   :  { %p6560_p4 = por %p6559_p3, %p6558_p2 }
  0x73   :  { %p6561_p5 = pnand %p6560_p4, %p6554_p1 }
  0x75   :  { %6564 = shalt.err (!%p6561_p5)
}
  0x76   :  { %s6743_s15 = smov 576   ;;  %s6744_s2 = smov 36  }
  0x77   :  { %180 = dma.hbm_to_vmem [thread:$0]  %s7329_s18, 18432, %s175_s24, [#allocation20], %s6743_s15, %s6743_s15, %s6744_s2  }
  0x78   :  { %s6745_s5 = smov [#allocation2]   ;;  %s7346_s10 = sld [smem:[#allocation32_spill]] }
  0x79   :  { %s46_s12 = sshll.u32 %s6745_s5, 4  ;;  %s47_s12 = int_to_ptr.vmem [resolvable:$true] %s46_s12 }
  0x7e   :  { %s6565_s7 = scalar_lea.hbm %s7346_s10, 32768 }
  0x7f   :  { %p6566_p6 = scmp.ne.s32.totalorder %s7346_s10, %s6565_s7  ;;  %p6569_p7 = scmp.lt.u32.totalorder %s6565_s7, %s7346_s10 }
  0x81   :  { %p6571_p8 = pnand %p6569_p7, %p6566_p6 }
  0x83   :  { %6574 = shalt.err (!%p6571_p8)
}
  0x84   :  { %s6575_s3 = scalar_lea.vmem %s47_s12, 32768  ;;  %p6580_p10 = scmp.lt.s32.totalorder %s47_s12, %s47_s12 }
  0x85   :  { %p6576_p9 = scmp.ne.s32.totalorder %s47_s12, %s6575_s3  ;;  %p6581_p11 = scmp.lt.s32.totalorder %s6575_s3, %s6575_s3 }
  0x87   :  { %p6582_p12 = por %p6581_p11, %p6580_p10 }
  0x89   :  { %p6583_p13 = pnand %p6582_p12, %p6576_p9 }
  0x8b   :  { %6586 = shalt.err (!%p6583_p13)
}
  0x8c   :  { %s6746_s18 = smov 256   ;;  %s6747_s24 = smov 16  }
  0x8d   :  { %52 = dma.hbm_to_vmem [thread:$0]  %s7346_s10, 32768, %s47_s12, [#allocation3], %s6746_s18, %s6746_s18, %s6747_s24  }
  0x8e   :  { %s6748_s2 = smov [#allocation6]   ;;  %s6749_s0 = smov [#allocation9]  }
  0x8f   :  { %s68_s4 = sshll.u32 %s6748_s2, 4  ;;  %s97_s5 = sshll.u32 %s6749_s0, 4  ;;  %s69_s4 = int_to_ptr.vmem [resolvable:$true] %s68_s4  ;;  %s98_s5 = int_to_ptr.vmem [resolvable:$true] %s97_s5 }
  0x90   :  { %s7347_s7 = sld [smem:[#allocation34_spill]] }
  0x96   :  { %s6587_s30 = scalar_lea.hbm %s7347_s7, 8192 }
  0x97   :  { %p6588_p0 = scmp.ne.s32.totalorder %s7347_s7, %s6587_s30  ;;  %p6591_p1 = scmp.lt.u32.totalorder %s6587_s30, %s7347_s7 }
  0x99   :  { %p6593_p2 = pnand %p6591_p1, %p6588_p0 }
  0x9b   :  { %6596 = shalt.err (!%p6593_p2)
}
  0x9c   :  { %s6597_s12 = scalar_lea.vmem %s69_s4, 8192  ;;  %p6602_p4 = scmp.lt.s32.totalorder %s69_s4, %s69_s4 }
  0x9d   :  { %p6598_p3 = scmp.ne.s32.totalorder %s69_s4, %s6597_s12  ;;  %p6603_p5 = scmp.lt.s32.totalorder %s6597_s12, %s6597_s12 }
  0x9f   :  { %p6604_p6 = por %p6603_p5, %p6602_p4 }
  0xa1   :  { %p6605_p7 = pnand %p6604_p6, %p6598_p3 }
  0xa3   :  { %6608 = shalt.err (!%p6605_p7)
}
  0xa4   :  { %74 = dma.hbm_to_vmem [thread:$0]  %s7347_s7, 8192, %s69_s4, [#allocation5], %s6740_s27, %s6740_s27, %s6741_s6  }
  0xa5   :  { %s6609_s15 = scalar_lea.hbm %s7320_s9, 64 }
  0xa6   :  { %p6610_p8 = scmp.ne.s32.totalorder %s7320_s9, %s6609_s15  ;;  %p6613_p9 = scmp.lt.u32.totalorder %s6609_s15, %s7320_s9 }
  0xa8   :  { %p6615_p10 = pnand %p6613_p9, %p6610_p8 }
  0xaa   :  { %6618 = shalt.err (!%p6615_p10)
}
  0xab   :  { %s6619_s30 = scalar_lea.vmem %s98_s5, 64  ;;  %p6624_p12 = scmp.lt.s32.totalorder %s98_s5, %s98_s5 }
  0xac   :  { %p6620_p11 = scmp.ne.s32.totalorder %s98_s5, %s6619_s30  ;;  %p6625_p13 = scmp.lt.s32.totalorder %s6619_s30, %s6619_s30 }
  0xae   :  { %p6626_p0 = por %p6625_p13, %p6624_p12 }
  0xb0   :  { %p6627_p1 = pnand %p6626_p0, %p6620_p11 }
  0xb2   :  { %6630 = shalt.err (!%p6627_p1)
}
  0xb3   :  { %100 = dma.hbm_to_vmem [thread:$0]  %s7320_s9, 64, %s98_s5, [#allocation8]  }
  0xb4   :  { %s6750_s28 = smov [#allocation12]   ;;  %s6751_s26 = smov [#allocation15]  }
  0xb5   :  { %s116_s23 = sshll.u32 %s6750_s28, 4  ;;  %s141_s3 = sshll.u32 %s6751_s26, 4  ;;  %s117_s23 = int_to_ptr.vmem [resolvable:$true] %s116_s23  ;;  %s142_s3 = int_to_ptr.vmem [resolvable:$true] %s141_s3 }
  0xb6   :  { %s6631_s18 = scalar_lea.hbm %s7322_s11, 2048 }
  0xb7   :  { %p6632_p2 = scmp.ne.s32.totalorder %s7322_s11, %s6631_s18  ;;  %p6635_p3 = scmp.lt.u32.totalorder %s6631_s18, %s7322_s11 }
  0xb9   :  { %p6637_p4 = pnand %p6635_p3, %p6632_p2 }
  0xbb   :  { %6640 = shalt.err (!%p6637_p4)
}
  0xbc   :  { %s6641_s9 = scalar_lea.vmem %s117_s23, 2048  ;;  %p6646_p6 = scmp.lt.s32.totalorder %s117_s23, %s117_s23 }
  0xbd   :  { %p6642_p5 = scmp.ne.s32.totalorder %s117_s23, %s6641_s9  ;;  %p6647_p7 = scmp.lt.s32.totalorder %s6641_s9, %s6641_s9 }
  0xbf   :  { %p6648_p8 = por %p6647_p7, %p6646_p6 }
  0xc1   :  { %p6649_p9 = pnand %p6648_p8, %p6642_p5 }
  0xc3   :  { %6652 = shalt.err (!%p6649_p9)
}
  0xc4   :  { %122 = dma.hbm_to_vmem [thread:$0]  %s7322_s11, 2048, %s117_s23, [#allocation11], %s6740_s27, %s6740_s27, %s6741_s6  }
  0xc5   :  { %s6653_s30 = scalar_lea.hbm %s7324_s13, 32 }
  0xc6   :  { %p6654_p10 = scmp.ne.s32.totalorder %s7324_s13, %s6653_s30  ;;  %p6657_p11 = scmp.lt.u32.totalorder %s6653_s30, %s7324_s13 }
  0xc8   :  { %p6659_p12 = pnand %p6657_p11, %p6654_p10 }
  0xca   :  { %6662 = shalt.err (!%p6659_p12)
}
  0xcb   :  { %s6663_s12 = scalar_lea.vmem %s142_s3, 32  ;;  %p6668_p0 = scmp.lt.s32.totalorder %s142_s3, %s142_s3 }
  0xcc   :  { %p6664_p13 = scmp.ne.s32.totalorder %s142_s3, %s6663_s12  ;;  %p6669_p1 = scmp.lt.s32.totalorder %s6663_s12, %s6663_s12 }
  0xce   :  { %p6670_p2 = por %p6669_p1, %p6668_p0 }
  0xd0   :  { %p6671_p3 = pnand %p6670_p2, %p6664_p13 }
  0xd2   :  { %6674 = shalt.err (!%p6671_p3)
}
  0xd3   :  { %144 = dma.hbm_to_vmem [thread:$0]  %s7324_s13, 32, %s142_s3, [#allocation14]  }
  0xd4   :  { %s6752_s6 = smov [#allocation18]   ;;  %s6753_s10 = smov [#allocation21]  }
  0xd5   :  { %s165_s23 = sshll.u32 %s6752_s6, 4  ;;  %s187_s18 = sshll.u32 %s6753_s10, 4  ;;  %s166_s23 = int_to_ptr.vmem [resolvable:$true] %s165_s23  ;;  %s188_s18 = int_to_ptr.vmem [resolvable:$true] %s187_s18 }
  0xd6   :  { %s6675_s15 = scalar_lea.hbm %s7328_s17, 32 }
  0xd7   :  { %p6676_p4 = scmp.ne.s32.totalorder %s7328_s17, %s6675_s15  ;;  %p6679_p5 = scmp.lt.u32.totalorder %s6675_s15, %s7328_s17 }
  0xd9   :  { %p6681_p6 = pnand %p6679_p5, %p6676_p4 }
  0xdb   :  { %6684 = shalt.err (!%p6681_p6)
}
  0xdc   :  { %s6685_s13 = scalar_lea.vmem %s166_s23, 32  ;;  %p6690_p8 = scmp.lt.s32.totalorder %s166_s23, %s166_s23 }
  0xdd   :  { %p6686_p7 = scmp.ne.s32.totalorder %s166_s23, %s6685_s13  ;;  %p6691_p9 = scmp.lt.s32.totalorder %s6685_s13, %s6685_s13 }
  0xdf   :  { %p6692_p10 = por %p6691_p9, %p6690_p8 }
  0xe1   :  { %p6693_p11 = pnand %p6692_p10, %p6686_p7 }
  0xe3   :  { %6696 = shalt.err (!%p6693_p11)
}
  0xe4   :  { %168 = dma.hbm_to_vmem [thread:$0]  %s7328_s17, 32, %s166_s23, [#allocation17]  }
  0xe5   :  { %s6697_s4 = scalar_lea.hbm %s7330_s19, 144 }
  0xe6   :  { %p6698_p12 = scmp.ne.s32.totalorder %s7330_s19, %s6697_s4  ;;  %p6701_p13 = scmp.lt.u32.totalorder %s6697_s4, %s7330_s19 }
  0xe8   :  { %p6703_p0 = pnand %p6701_p13, %p6698_p12 }
  0xea   :  { %6706 = shalt.err (!%p6703_p0)
}
  0xeb   :  { %s6707_s11 = scalar_lea.vmem %s188_s18, 144  ;;  %s6711_s27 = scalar_lea.vmem %s188_s18, 160 }
  0xec   :  { %p6708_p1 = scmp.ne.s32.totalorder %s188_s18, %s6707_s11  ;;  %p6712_p2 = scmp.lt.s32.totalorder %s188_s18, %s188_s18 }
  0xed   :  { %p6713_p3 = scmp.lt.s32.totalorder %s6711_s27, %s6707_s11 }
  0xef   :  { %p6714_p4 = por %p6713_p3, %p6712_p2 }
  0xf1   :  { %p6715_p5 = pnand %p6714_p4, %p6708_p1 }
  0xf3   :  { %6718 = shalt.err (!%p6715_p5)
}
  0xf4   :  { %190 = dma.hbm_to_vmem [thread:$0]  %s7330_s19, 144, %s188_s18, [#allocation20]  }
  0xf5   :  { %6719 = dma.done.wait [#allocation3], 32768  }
  0xf6   :  { %6720 = vsyncadd [#allocation3], 4294934528 }
  0xf7   :  { %6721 = dma.done.wait [#allocation5], 8256  }
  0xf8   :  { %6722 = vsyncadd [#allocation5], 4294959040 }
  0xf9   :  { %6723 = dma.done.wait [#allocation8], 2112  }
  0xfa   :  { %6724 = vsyncadd [#allocation8], 4294965184 }
  0xfb   :  { %6725 = dma.done.wait [#allocation11], 2064  }
  0xfc   :  { %6726 = vsyncadd [#allocation11], 4294965232 }
  0xfd   :  { %6727 = dma.done.wait [#allocation14], 2080  }
  0xfe   :  { %6728 = vsyncadd [#allocation14], 4294965216 }
  0xff   :  { %6729 = dma.done.wait [#allocation17], 64  }
 0x100   :  { %6730 = vsyncadd [#allocation17], 4294967232 }
 0x101   :  { %6731 = dma.done.wait [#allocation20], 18576  }
 0x102   :  { %6732 = vsyncadd [#allocation20], 4294948720  ;;  %v5567_v0 = vld [vmem:[#allocation2 + $0x4] ss:$16 sps:$4 sm:$0xff]   ;;  %v5569_v1 = vld [vmem:[#allocation2 + $0xc] ss:$16 sps:$4 sm:$0xff]  }
 0x103   :  { %1821 = vmatprep.subr.bf16.mxu0 %v5567_v0  ;;  %v5571_v2 = vld [vmem:[#allocation2] ss:$16 sps:$4 sm:$0xff]   ;;  %v5572_v3 = vld [vmem:[#allocation2 + $0x8] ss:$16 sps:$4 sm:$0xff]   ;;  %1985 = vmatprep.subr.bf16.mxu1 %v5569_v1  ;;  %v5573_v4 = vld [vmem:[#allocation2 + $0x24] ss:$16 sps:$4 sm:$0xff]  }
 0x104   :  { %1822 = vmatpush1.bf16.msra.mxu0 %v5571_v2  ;;  %1986 = vmatpush1.bf16.msra.mxu1 %v5572_v3  ;;  %v5575_v5 = vld [vmem:[#allocation2 + $0x2c] ss:$16 sps:$4 sm:$0xff]   ;;  %v5577_v6 = vld [vmem:[#allocation2 + $0x20] ss:$16 sps:$4 sm:$0xff]   ;;  %v5578_v7 = vld [vmem:[#allocation2 + $0x28] ss:$16 sps:$4 sm:$0xff]  }
 0x105   :  { %1823 = vmatprep.subr.bf16.mxu0 %v5573_v4  ;;  %1987 = vmatprep.subr.bf16.mxu1 %v5575_v5  ;;  %v5579_v8 = vld [vmem:[#allocation2 + $0x44] ss:$16 sps:$4 sm:$0xff]   ;;  %v5581_v9 = vld [vmem:[#allocation2 + $0x4c] ss:$16 sps:$4 sm:$0xff]   ;;  %v5583_v10 = vld [vmem:[#allocation2 + $0x40] ss:$16 sps:$4 sm:$0xff]  }
 0x106   :  { %v5584_v11 = vld [vmem:[#allocation2 + $0x48] ss:$16 sps:$4 sm:$0xff]   ;;  %v5585_v12 = vld [vmem:[#allocation2 + $0x64] ss:$16 sps:$4 sm:$0xff]   ;;  %v5587_v13 = vld [vmem:[#allocation2 + $0x6c] ss:$16 sps:$4 sm:$0xff]  }
 0x107   :  { %v5589_v14 = vld [vmem:[#allocation2 + $0x60] ss:$16 sps:$4 sm:$0xff]   ;;  %v5590_v15 = vld [vmem:[#allocation2 + $0x68] ss:$16 sps:$4 sm:$0xff]   ;;  %v5591_v16 = vld [vmem:[#allocation2 + $0x84] ss:$16 sps:$4 sm:$0xff]  }
 0x108   :  { %1824 = vmatpush1.bf16.msra.mxu0 %v5577_v6  ;;  %1988 = vmatpush1.bf16.msra.mxu1 %v5578_v7  ;;  %v5593_v17 = vld [vmem:[#allocation2 + $0x8c] ss:$16 sps:$4 sm:$0xff]   ;;  %v5595_v18 = vld [vmem:[#allocation2 + $0x80] ss:$16 sps:$4 sm:$0xff]   ;;  %v5596_v19 = vld [vmem:[#allocation2 + $0x88] ss:$16 sps:$4 sm:$0xff]  }
 0x109   :  { %1825 = vmatprep.subr.bf16.mxu0 %v5579_v8  ;;  %1989 = vmatprep.subr.bf16.mxu1 %v5581_v9  ;;  %v5597_v20 = vld [vmem:[#allocation2 + $0xa4] ss:$16 sps:$4 sm:$0xff]   ;;  %v5599_v21 = vld [vmem:[#allocation2 + $0xac] ss:$16 sps:$4 sm:$0xff]   ;;  %v5601_v22 = vld [vmem:[#allocation2 + $0xa0] ss:$16 sps:$4 sm:$0xff]  }
 0x10a   :  { %v5602_v23 = vld [vmem:[#allocation2 + $0xa8] ss:$16 sps:$4 sm:$0xff]   ;;  %v5603_v24 = vld [vmem:[#allocation2 + $0xc4] ss:$16 sps:$4 sm:$0xff]   ;;  %v5605_v25 = vld [vmem:[#allocation2 + $0xcc] ss:$16 sps:$4 sm:$0xff]  }
 0x10b   :  { %v5607_v26 = vld [vmem:[#allocation2 + $0xc0] ss:$16 sps:$4 sm:$0xff]   ;;  %v5608_v27 = vld [vmem:[#allocation2 + $0xc8] ss:$16 sps:$4 sm:$0xff]   ;;  %v5609_v28 = vld [vmem:[#allocation2 + $0xe4] ss:$16 sps:$4 sm:$0xff]  }
 0x10c   :  { %1826 = vmatpush1.bf16.msra.mxu0 %v5583_v10  ;;  %1990 = vmatpush1.bf16.msra.mxu1 %v5584_v11  ;;  %v5611_v29 = vld [vmem:[#allocation2 + $0xec] ss:$16 sps:$4 sm:$0xff]   ;;  %v5613_v30 = vld [vmem:[#allocation2 + $0xe0] ss:$16 sps:$4 sm:$0xff]   ;;  %v5614_v31 = vld [vmem:[#allocation2 + $0xe8] ss:$16 sps:$4 sm:$0xff]  }
 0x10d   :  { %1827 = vmatprep.subr.bf16.mxu0 %v5585_v12  ;;  %1991 = vmatprep.subr.bf16.mxu1 %v5587_v13  ;;  %v5615_v32 = vld [vmem:[#allocation2 + $0x104] ss:$16 sps:$4 sm:$0xff]   ;;  %v5617_v33 = vld [vmem:[#allocation2 + $0x10c] ss:$16 sps:$4 sm:$0xff]   ;;  %v5619_v34 = vld [vmem:[#allocation2 + $0x100] ss:$16 sps:$4 sm:$0xff]  }
 0x10e   :  { %v5620_v35 = vld [vmem:[#allocation2 + $0x108] ss:$16 sps:$4 sm:$0xff]   ;;  %v5621_v36 = vld [vmem:[#allocation2 + $0x124] ss:$16 sps:$4 sm:$0xff]   ;;  %v5623_v37 = vld [vmem:[#allocation2 + $0x12c] ss:$16 sps:$4 sm:$0xff]  }
 0x10f   :  { %v5625_v38 = vld [vmem:[#allocation2 + $0x120] ss:$16 sps:$4 sm:$0xff]   ;;  %v5626_v39 = vld [vmem:[#allocation2 + $0x128] ss:$16 sps:$4 sm:$0xff]   ;;  %v5627_v40 = vld [vmem:[#allocation2 + $0x144] ss:$16 sps:$4 sm:$0xff]  }
 0x110   :  { %1828 = vmatpush1.bf16.msra.mxu0 %v5589_v14  ;;  %1992 = vmatpush1.bf16.msra.mxu1 %v5590_v15  ;;  %v5629_v41 = vld [vmem:[#allocation2 + $0x14c] ss:$16 sps:$4 sm:$0xff]   ;;  %v5631_v42 = vld [vmem:[#allocation2 + $0x140] ss:$16 sps:$4 sm:$0xff]   ;;  %v5632_v43 = vld [vmem:[#allocation2 + $0x148] ss:$16 sps:$4 sm:$0xff]  }
 0x111   :  { %1829 = vmatprep.subr.bf16.mxu0 %v5591_v16  ;;  %1993 = vmatprep.subr.bf16.mxu1 %v5593_v17  ;;  %v5633_v44 = vld [vmem:[#allocation2 + $0x164] ss:$16 sps:$4 sm:$0xff]   ;;  %v5635_v45 = vld [vmem:[#allocation2 + $0x16c] ss:$16 sps:$4 sm:$0xff]   ;;  %s7348_s10 = sld [smem:[#allocation29_spill]]  ;;  %s7349_s13 = sld [smem:[#allocation35_spill]] }
 0x112   :  { %v5637_v47 = vld [vmem:[#allocation2 + $0x160] ss:$16 sps:$4 sm:$0xff]   ;;  %v5638_v49 = vld [vmem:[#allocation2 + $0x168] ss:$16 sps:$4 sm:$0xff]   ;;  %v5639_v50 = vld [vmem:[#allocation2 + $0x184] ss:$16 sps:$4 sm:$0xff]  }
 0x113   :  { %v5641_v51 = vld [vmem:[#allocation2 + $0x18c] ss:$16 sps:$4 sm:$0xff]   ;;  %v5643_v52 = vld [vmem:[#allocation2 + $0x180] ss:$16 sps:$4 sm:$0xff]   ;;  %v5644_v53 = vld [vmem:[#allocation2 + $0x188] ss:$16 sps:$4 sm:$0xff]  }
 0x114   :  { %1830 = vmatpush1.bf16.msra.mxu0 %v5595_v18  ;;  %1994 = vmatpush1.bf16.msra.mxu1 %v5596_v19  ;;  %v5645_v54 = vld [vmem:[#allocation2 + $0x1a4] ss:$16 sps:$4 sm:$0xff]   ;;  %v5647_v55 = vld [vmem:[#allocation2 + $0x1ac] ss:$16 sps:$4 sm:$0xff]   ;;  %v5649_v56 = vld [vmem:[#allocation2 + $0x1a0] ss:$16 sps:$4 sm:$0xff]  }
 0x115   :  { %1831 = vmatprep.subr.bf16.mxu0 %v5597_v20  ;;  %1995 = vmatprep.subr.bf16.mxu1 %v5599_v21  ;;  %v5650_v57 = vld [vmem:[#allocation2 + $0x1a8] ss:$16 sps:$4 sm:$0xff]   ;;  %v5651_v58 = vld [vmem:[#allocation2 + $0x1c4] ss:$16 sps:$4 sm:$0xff]   ;;  %v5653_v59 = vld [vmem:[#allocation2 + $0x1cc] ss:$16 sps:$4 sm:$0xff]  }
 0x116   :  { %v5655_v60 = vld [vmem:[#allocation2 + $0x1c0] ss:$16 sps:$4 sm:$0xff]   ;;  %v5656_v61 = vld [vmem:[#allocation2 + $0x1c8] ss:$16 sps:$4 sm:$0xff]   ;;  %v5657_v62 = vld [vmem:[#allocation2 + $0x1e4] ss:$16 sps:$4 sm:$0xff]  }
 0x117   :  { %v231_v46 = vld [vmem:[%s7348_s10] sm:$0xff]  ;;  %v5659_v63 = vld [vmem:[#allocation2 + $0x1ec] ss:$16 sps:$4 sm:$0xff]   ;;  %v5662_v1 = vld [vmem:[#allocation2 + $0x1e8] ss:$16 sps:$4 sm:$0xff]   ;;  %vm2829_vm0 = vcmask 1043456  }
 0x118   :  { %1832 = vmatpush1.bf16.msra.mxu0 %v5601_v22  ;;  %1996 = vmatpush1.bf16.msra.mxu1 %v5602_v23  ;;  %v4867_v48 = vcombine.high %v231_v46, %v231_v46  ;;  %v5661_v0 = vld [vmem:[#allocation2 + $0x1e0] ss:$16 sps:$4 sm:$0xff]   ;;  %v5667_v2 = vld [vmem:[#allocation2 + $0x204] ss:$16 sps:$4 sm:$0xff]   ;;  %v5670_v3 = vld [vmem:[#allocation2 + $0x20c] ss:$16 sps:$4 sm:$0xff]   ;;  %v4866_v4 = vcombine.low %v231_v46, %v231_v46 }
 0x119   :  { %1833 = vmatprep.subr.bf16.mxu0 %v5603_v24  ;;  %1997 = vmatprep.subr.bf16.mxu1 %v5605_v25  ;;  %v5665_v5 = vld [vmem:[#allocation2 + $0x200] ss:$16 sps:$4 sm:$0xff]   ;;  %v5668_v6 = vld [vmem:[#allocation2 + $0x208] ss:$16 sps:$4 sm:$0xff]   ;;  %v5673_v7 = vld [vmem:[#allocation2 + $0x224] ss:$16 sps:$4 sm:$0xff]  }
 0x11a   :  { %1853 = vmatprep.mubr.bf16.mxu0 %v4867_v48  ;;  %2017 = vmatprep.mubr.bf16.mxu1 %v4867_v48  ;;  %v5676_v8 = vld [vmem:[#allocation2 + $0x22c] ss:$16 sps:$4 sm:$0xff]   ;;  %v5671_v9 = vld [vmem:[#allocation2 + $0x220] ss:$16 sps:$4 sm:$0xff]   ;;  %v5674_v10 = vld [vmem:[#allocation2 + $0x228] ss:$16 sps:$4 sm:$0xff]  }
 0x11b   :  { %v5679_v11 = vld [vmem:[#allocation2 + $0x244] ss:$16 sps:$4 sm:$0xff]   ;;  %v5682_v12 = vld [vmem:[#allocation2 + $0x24c] ss:$16 sps:$4 sm:$0xff]   ;;  %v5677_v13 = vld [vmem:[#allocation2 + $0x240] ss:$16 sps:$4 sm:$0xff]  }
 0x11c   :  { %1834 = vmatpush1.bf16.msra.mxu0 %v5607_v26  ;;  %1998 = vmatpush1.bf16.msra.mxu1 %v5608_v27  ;;  %v5680_v14 = vld [vmem:[#allocation2 + $0x248] ss:$16 sps:$4 sm:$0xff]   ;;  %v5685_v15 = vld [vmem:[#allocation2 + $0x264] ss:$16 sps:$4 sm:$0xff]   ;;  %v5688_v16 = vld [vmem:[#allocation2 + $0x26c] ss:$16 sps:$4 sm:$0xff]  }
 0x11d   :  { %1835 = vmatprep.subr.bf16.mxu0 %v5609_v28  ;;  %1999 = vmatprep.subr.bf16.mxu1 %v5611_v29  ;;  %v5683_v17 = vld [vmem:[#allocation2 + $0x260] ss:$16 sps:$4 sm:$0xff]   ;;  %v5686_v18 = vld [vmem:[#allocation2 + $0x268] ss:$16 sps:$4 sm:$0xff]   ;;  %v5691_v19 = vld [vmem:[#allocation2 + $0x284] ss:$16 sps:$4 sm:$0xff]  }
 0x11e   :  { %v5694_v20 = vld [vmem:[#allocation2 + $0x28c] ss:$16 sps:$4 sm:$0xff]   ;;  %v5689_v21 = vld [vmem:[#allocation2 + $0x280] ss:$16 sps:$4 sm:$0xff]   ;;  %v5692_v22 = vld [vmem:[#allocation2 + $0x288] ss:$16 sps:$4 sm:$0xff]  }
 0x11f   :  { %v5697_v23 = vld [vmem:[#allocation2 + $0x2a4] ss:$16 sps:$4 sm:$0xff]   ;;  %v5700_v24 = vld [vmem:[#allocation2 + $0x2ac] ss:$16 sps:$4 sm:$0xff]   ;;  %v5695_v25 = vld [vmem:[#allocation2 + $0x2a0] ss:$16 sps:$4 sm:$0xff]  }
 0x120   :  { %1836 = vmatpush1.bf16.msra.mxu0 %v5613_v30  ;;  %2000 = vmatpush1.bf16.msra.mxu1 %v5614_v31  ;;  %v5698_v26 = vld [vmem:[#allocation2 + $0x2a8] ss:$16 sps:$4 sm:$0xff]   ;;  %v5703_v27 = vld [vmem:[#allocation2 + $0x2c4] ss:$16 sps:$4 sm:$0xff]   ;;  %v5706_v28 = vld [vmem:[#allocation2 + $0x2cc] ss:$16 sps:$4 sm:$0xff]  }
 0x121   :  { %1837 = vmatprep.subr.bf16.mxu0 %v5615_v32  ;;  %2001 = vmatprep.subr.bf16.mxu1 %v5617_v33  ;;  %v7050_v29 = vld [vmem:[%s7348_s10 + $0x8] sm:$0xff]  ;;  %v5701_v31 = vld [vmem:[#allocation2 + $0x2c0] ss:$16 sps:$4 sm:$0xff]   ;;  %v5709_v33 = vld [vmem:[#allocation2 + $0x2e4] ss:$16 sps:$4 sm:$0xff]   ;;  %vm6755_vm1 = vmmov 0  }
 0x122   :  { %v4869_v30 = vcombine.high %v7050_v29, %v7050_v29  ;;  %v5704_v32 = vld [vmem:[#allocation2 + $0x2c8] ss:$16 sps:$4 sm:$0xff]   ;;  %v5730_v46 = vld [vmem:[#allocation2 + $0x34c] ss:$16 sps:$4 sm:$0xff]   ;;  %s7350_s1 = sld [smem:[#allocation30_spill]]  ;;  %vm2825_vm2 = vcmask 64512  }
 0x123   :  { %v5728_v48 = vld [vmem:[#allocation2 + $0x348] ss:$16 sps:$4 sm:$0xff]   ;;  %s7351_s3 = sld [smem:[#allocation31_spill]] }
 0x124   :  { %1838 = vmatpush1.bf16.msra.mxu0 %v5619_v34  ;;  %2002 = vmatpush1.bf16.msra.mxu1 %v5620_v35  ;;  %v5712_v34 = vld [vmem:[#allocation2 + $0x2ec] ss:$16 sps:$4 sm:$0xff]   ;;  %v5707_v35 = vld [vmem:[#allocation2 + $0x2e0] ss:$16 sps:$4 sm:$0xff]  }
 0x125   :  { %1839 = vmatprep.subr.bf16.mxu0 %v5621_v36  ;;  %2003 = vmatprep.subr.bf16.mxu1 %v5623_v37  ;;  %v5710_v36 = vld [vmem:[#allocation2 + $0x2e8] ss:$16 sps:$4 sm:$0xff]   ;;  %v5715_v37 = vld [vmem:[#allocation2 + $0x304] ss:$16 sps:$4 sm:$0xff]  }
 0x128   :  { %1840 = vmatpush1.bf16.msra.mxu0 %v5625_v38  ;;  %2004 = vmatpush1.bf16.msra.mxu1 %v5626_v39  ;;  %v5718_v38 = vld [vmem:[#allocation2 + $0x30c] ss:$16 sps:$4 sm:$0xff]   ;;  %v5713_v39 = vld [vmem:[#allocation2 + $0x300] ss:$16 sps:$4 sm:$0xff]  }
 0x129   :  { %1841 = vmatprep.subr.bf16.mxu0 %v5627_v40  ;;  %2005 = vmatprep.subr.bf16.mxu1 %v5629_v41  ;;  %v5716_v40 = vld [vmem:[#allocation2 + $0x308] ss:$16 sps:$4 sm:$0xff]   ;;  %v5721_v41 = vld [vmem:[#allocation2 + $0x324] ss:$16 sps:$4 sm:$0xff]  }
 0x12c   :  { %1842 = vmatpush1.bf16.msra.mxu0 %v5631_v42  ;;  %2006 = vmatpush1.bf16.msra.mxu1 %v5632_v43  ;;  %v5724_v42 = vld [vmem:[#allocation2 + $0x32c] ss:$16 sps:$4 sm:$0xff]   ;;  %v5719_v43 = vld [vmem:[#allocation2 + $0x320] ss:$16 sps:$4 sm:$0xff]  }
 0x12d   :  { %1843 = vmatprep.subr.bf16.mxu0 %v5633_v44  ;;  %2007 = vmatprep.subr.bf16.mxu1 %v5635_v45  ;;  %v5722_v44 = vld [vmem:[#allocation2 + $0x328] ss:$16 sps:$4 sm:$0xff]   ;;  %v5727_v45 = vld [vmem:[#allocation2 + $0x344] ss:$16 sps:$4 sm:$0xff]  }
 0x130   :  { %1844 = vmatpush1.bf16.msra.mxu0 %v5637_v47  ;;  %2008 = vmatpush1.bf16.msra.mxu1 %v5638_v49  ;;  %v5725_v47 = vld [vmem:[#allocation2 + $0x340] ss:$16 sps:$4 sm:$0xff]   ;;  %v5733_v49 = vld [vmem:[#allocation2 + $0x364] ss:$16 sps:$4 sm:$0xff]  }
 0x131   :  { %1845 = vmatprep.subr.bf16.mxu0 %v5639_v50  ;;  %2009 = vmatprep.subr.bf16.mxu1 %v5641_v51  ;;  %v5736_v50 = vld [vmem:[#allocation2 + $0x36c] ss:$16 sps:$4 sm:$0xff]   ;;  %v5731_v51 = vld [vmem:[#allocation2 + $0x360] ss:$16 sps:$4 sm:$0xff]  }
 0x134   :  { %1846 = vmatpush1.bf16.msra.mxu0 %v5643_v52  ;;  %2010 = vmatpush1.bf16.msra.mxu1 %v5644_v53  ;;  %v5734_v52 = vld [vmem:[#allocation2 + $0x368] ss:$16 sps:$4 sm:$0xff]   ;;  %v5739_v53 = vld [vmem:[#allocation2 + $0x384] ss:$16 sps:$4 sm:$0xff]  }
 0x135   :  { %1847 = vmatprep.subr.bf16.mxu0 %v5645_v54  ;;  %2011 = vmatprep.subr.bf16.mxu1 %v5647_v55  ;;  %v5742_v54 = vld [vmem:[#allocation2 + $0x38c] ss:$16 sps:$4 sm:$0xff]   ;;  %v5737_v55 = vld [vmem:[#allocation2 + $0x380] ss:$16 sps:$4 sm:$0xff]  }
 0x138   :  { %1848 = vmatpush1.bf16.msra.mxu0 %v5649_v56  ;;  %2012 = vmatpush1.bf16.msra.mxu1 %v5650_v57  ;;  %v5740_v56 = vld [vmem:[#allocation2 + $0x388] ss:$16 sps:$4 sm:$0xff]   ;;  %v5745_v57 = vld [vmem:[#allocation2 + $0x3a4] ss:$16 sps:$4 sm:$0xff]  }
 0x139   :  { %1849 = vmatprep.subr.bf16.mxu0 %v5651_v58  ;;  %2013 = vmatprep.subr.bf16.mxu1 %v5653_v59  ;;  %v5748_v58 = vld [vmem:[#allocation2 + $0x3ac] ss:$16 sps:$4 sm:$0xff]   ;;  %v5743_v59 = vld [vmem:[#allocation2 + $0x3a0] ss:$16 sps:$4 sm:$0xff]  }
 0x13c   :  { %1850 = vmatpush1.bf16.msra.mxu0 %v5655_v60  ;;  %2014 = vmatpush1.bf16.msra.mxu1 %v5656_v61  ;;  %v5746_v60 = vld [vmem:[#allocation2 + $0x3a8] ss:$16 sps:$4 sm:$0xff]   ;;  %v5751_v61 = vld [vmem:[#allocation2 + $0x3c4] ss:$16 sps:$4 sm:$0xff]  }
 0x13d   :  { %1851 = vmatprep.subr.bf16.mxu0 %v5657_v62  ;;  %2015 = vmatprep.subr.bf16.mxu1 %v5659_v63  ;;  %v5754_v62 = vld [vmem:[#allocation2 + $0x3cc] ss:$16 sps:$4 sm:$0xff]   ;;  %v5749_v63 = vld [vmem:[#allocation2 + $0x3c0] ss:$16 sps:$4 sm:$0xff]  }
 0x140   :  { %1852 = vmatpush1.bf16.msra.mxu0 %v5661_v0  ;;  %2016 = vmatpush1.bf16.msra.mxu1 %v5662_v1  ;;  %v5752_v0 = vld [vmem:[#allocation2 + $0x3c8] ss:$16 sps:$4 sm:$0xff]   ;;  %v5757_v1 = vld [vmem:[#allocation2 + $0x3e4] ss:$16 sps:$4 sm:$0xff]  }
 0x141   :  { %1862 = vmatprep.subr.bf16.mxu0 %v5667_v2  ;;  %2026 = vmatprep.subr.bf16.mxu1 %v5670_v3  ;;  %v5760_v2 = vld [vmem:[#allocation2 + $0x3ec] ss:$16 sps:$4 sm:$0xff]   ;;  %v5755_v3 = vld [vmem:[#allocation2 + $0x3e0] ss:$16 sps:$4 sm:$0xff]  }
 0x143   :  { %1854 = vmatmul.mubr.bf16.vlgmr.msra.gmra.mrb[0].mxu0 %v4866_v4  ;;  %2018 = vmatmul.mubr.bf16.vlgmr.msra.gmra.mrb[0].mxu1 %v4866_v4  ;;  %v5758_v4 = vld [vmem:[#allocation2 + $0x3e8] ss:$16 sps:$4 sm:$0xff]  }
 0x144   :  { %1863 = vmatpush1.bf16.msra.mxu0 %v5665_v5  ;;  %2027 = vmatpush1.bf16.msra.mxu1 %v5668_v6  ;;  %v5765_v5 = vld [vmem:[#allocation2 + $0x404] ss:$16 sps:$4 sm:$0xff]   ;;  %v5768_v6 = vld [vmem:[#allocation2 + $0x40c] ss:$16 sps:$4 sm:$0xff]  }
 0x145   :  { %1864 = vmatprep.subr.bf16.mxu0 %v5673_v7  ;;  %2028 = vmatprep.subr.bf16.mxu1 %v5676_v8  ;;  %v4868_v7 = vcombine.low %v7050_v29, %v7050_v29  ;;  %v5763_v8 = vld [vmem:[#allocation2 + $0x400] ss:$16 sps:$4 sm:$0xff]   ;;  %v5798_v29 = vld [vmem:[#allocation2 + $0x4ac] ss:$16 sps:$4 sm:$0xff]  }
 0x146   :  { %1894 = vmatprep.mubr.bf16.mxu0 %v4869_v30  ;;  %2058 = vmatprep.mubr.bf16.mxu1 %v4869_v30  ;;  %v5793_v30 = vld [vmem:[#allocation2 + $0x4a0] ss:$16 sps:$4 sm:$0xff]  }
 0x148   :  { %1865 = vmatpush1.bf16.msra.mxu0 %v5671_v9  ;;  %2029 = vmatpush1.bf16.msra.mxu1 %v5674_v10  ;;  %v5766_v9 = vld [vmem:[#allocation2 + $0x408] ss:$16 sps:$4 sm:$0xff]   ;;  %v5771_v10 = vld [vmem:[#allocation2 + $0x424] ss:$16 sps:$4 sm:$0xff]  }
 0x149   :  { %1866 = vmatprep.subr.bf16.mxu0 %v5679_v11  ;;  %2030 = vmatprep.subr.bf16.mxu1 %v5682_v12  ;;  %v7059_v11 = vld [vmem:[%s7348_s10 + $0x10] sm:$0xff]  ;;  %v5774_v12 = vld [vmem:[#allocation2 + $0x42c] ss:$16 sps:$4 sm:$0xff]  }
 0x14c   :  { %1867 = vmatpush1.bf16.msra.mxu0 %v5677_v13  ;;  %2031 = vmatpush1.bf16.msra.mxu1 %v5680_v14  ;;  %v4871_v13 = vcombine.high %v7059_v11, %v7059_v11  ;;  %v5769_v14 = vld [vmem:[#allocation2 + $0x420] ss:$16 sps:$4 sm:$0xff]  }
 0x14d   :  { %1868 = vmatprep.subr.bf16.mxu0 %v5685_v15  ;;  %2032 = vmatprep.subr.bf16.mxu1 %v5688_v16  ;;  %v5772_v15 = vld [vmem:[#allocation2 + $0x428] ss:$16 sps:$4 sm:$0xff]   ;;  %v5777_v16 = vld [vmem:[#allocation2 + $0x444] ss:$16 sps:$4 sm:$0xff]  }
 0x150   :  { %1869 = vmatpush1.bf16.msra.mxu0 %v5683_v17  ;;  %2033 = vmatpush1.bf16.msra.mxu1 %v5686_v18  ;;  %v5780_v17 = vld [vmem:[#allocation2 + $0x44c] ss:$16 sps:$4 sm:$0xff]   ;;  %v5775_v18 = vld [vmem:[#allocation2 + $0x440] ss:$16 sps:$4 sm:$0xff]  }
 0x151   :  { %1870 = vmatprep.subr.bf16.mxu0 %v5691_v19  ;;  %2034 = vmatprep.subr.bf16.mxu1 %v5694_v20  ;;  %v5778_v19 = vld [vmem:[#allocation2 + $0x448] ss:$16 sps:$4 sm:$0xff]   ;;  %v5783_v20 = vld [vmem:[#allocation2 + $0x464] ss:$16 sps:$4 sm:$0xff]  }
 0x154   :  { %1871 = vmatpush1.bf16.msra.mxu0 %v5689_v21  ;;  %2035 = vmatpush1.bf16.msra.mxu1 %v5692_v22  ;;  %v5786_v21 = vld [vmem:[#allocation2 + $0x46c] ss:$16 sps:$4 sm:$0xff]   ;;  %v5781_v22 = vld [vmem:[#allocation2 + $0x460] ss:$16 sps:$4 sm:$0xff]  }
 0x155   :  { %1872 = vmatprep.subr.bf16.mxu0 %v5697_v23  ;;  %2036 = vmatprep.subr.bf16.mxu1 %v5700_v24  ;;  %v5784_v23 = vld [vmem:[#allocation2 + $0x468] ss:$16 sps:$4 sm:$0xff]   ;;  %v5789_v24 = vld [vmem:[#allocation2 + $0x484] ss:$16 sps:$4 sm:$0xff]  }
 0x158   :  { %1873 = vmatpush1.bf16.msra.mxu0 %v5695_v25  ;;  %2037 = vmatpush1.bf16.msra.mxu1 %v5698_v26  ;;  %v5792_v25 = vld [vmem:[#allocation2 + $0x48c] ss:$16 sps:$4 sm:$0xff]   ;;  %v5787_v26 = vld [vmem:[#allocation2 + $0x480] ss:$16 sps:$4 sm:$0xff]  }
 0x159   :  { %1874 = vmatprep.subr.bf16.mxu0 %v5703_v27  ;;  %2038 = vmatprep.subr.bf16.mxu1 %v5706_v28  ;;  %v5790_v27 = vld [vmem:[#allocation2 + $0x488] ss:$16 sps:$4 sm:$0xff]   ;;  %v5795_v28 = vld [vmem:[#allocation2 + $0x4a4] ss:$16 sps:$4 sm:$0xff]  }
 0x15c   :  { %1875 = vmatpush1.bf16.msra.mxu0 %v5701_v31  ;;  %2039 = vmatpush1.bf16.msra.mxu1 %v5704_v32  ;;  %v5796_v31 = vld [vmem:[#allocation2 + $0x4a8] ss:$16 sps:$4 sm:$0xff]   ;;  %v5801_v32 = vld [vmem:[#allocation2 + $0x4c4] ss:$16 sps:$4 sm:$0xff]  }
 0x15d   :  { %1876 = vmatprep.subr.bf16.mxu0 %v5709_v33  ;;  %2040 = vmatprep.subr.bf16.mxu1 %v5712_v34  ;;  %v5804_v33 = vld [vmem:[#allocation2 + $0x4cc] ss:$16 sps:$4 sm:$0xff]   ;;  %v5799_v34 = vld [vmem:[#allocation2 + $0x4c0] ss:$16 sps:$4 sm:$0xff]  }
 0x160   :  { %1877 = vmatpush1.bf16.msra.mxu0 %v5707_v35  ;;  %2041 = vmatpush1.bf16.msra.mxu1 %v5710_v36  ;;  %v5802_v35 = vld [vmem:[#allocation2 + $0x4c8] ss:$16 sps:$4 sm:$0xff]   ;;  %v5807_v36 = vld [vmem:[#allocation2 + $0x4e4] ss:$16 sps:$4 sm:$0xff]  }
 0x161   :  { %1878 = vmatprep.subr.bf16.mxu0 %v5715_v37  ;;  %2042 = vmatprep.subr.bf16.mxu1 %v5718_v38  ;;  %v5810_v37 = vld [vmem:[#allocation2 + $0x4ec] ss:$16 sps:$4 sm:$0xff]   ;;  %v5805_v38 = vld [vmem:[#allocation2 + $0x4e0] ss:$16 sps:$4 sm:$0xff]  }
 0x164   :  { %1879 = vmatpush1.bf16.msra.mxu0 %v5713_v39  ;;  %2043 = vmatpush1.bf16.msra.mxu1 %v5716_v40  ;;  %v5808_v39 = vld [vmem:[#allocation2 + $0x4e8] ss:$16 sps:$4 sm:$0xff]   ;;  %v5813_v40 = vld [vmem:[#allocation2 + $0x504] ss:$16 sps:$4 sm:$0xff]  }
 0x165   :  { %1880 = vmatprep.subr.bf16.mxu0 %v5721_v41  ;;  %2044 = vmatprep.subr.bf16.mxu1 %v5724_v42  ;;  %v5816_v41 = vld [vmem:[#allocation2 + $0x50c] ss:$16 sps:$4 sm:$0xff]   ;;  %v5811_v42 = vld [vmem:[#allocation2 + $0x500] ss:$16 sps:$4 sm:$0xff]  }
 0x168   :  { %1881 = vmatpush1.bf16.msra.mxu0 %v5719_v43  ;;  %2045 = vmatpush1.bf16.msra.mxu1 %v5722_v44  ;;  %v5814_v43 = vld [vmem:[#allocation2 + $0x508] ss:$16 sps:$4 sm:$0xff]   ;;  %v5819_v44 = vld [vmem:[#allocation2 + $0x524] ss:$16 sps:$4 sm:$0xff]  }
 0x169   :  { %1882 = vmatprep.subr.bf16.mxu0 %v5727_v45  ;;  %2046 = vmatprep.subr.bf16.mxu1 %v5730_v46  ;;  %v5822_v45 = vld [vmem:[#allocation2 + $0x52c] ss:$16 sps:$4 sm:$0xff]   ;;  %v5817_v46 = vld [vmem:[#allocation2 + $0x520] ss:$16 sps:$4 sm:$0xff]  }
 0x16c   :  { %1883 = vmatpush1.bf16.msra.mxu0 %v5725_v47  ;;  %2047 = vmatpush1.bf16.msra.mxu1 %v5728_v48  ;;  %v5820_v47 = vld [vmem:[#allocation2 + $0x528] ss:$16 sps:$4 sm:$0xff]   ;;  %v5825_v48 = vld [vmem:[#allocation2 + $0x544] ss:$16 sps:$4 sm:$0xff]  }
 0x16d   :  { %1884 = vmatprep.subr.bf16.mxu0 %v5733_v49  ;;  %2048 = vmatprep.subr.bf16.mxu1 %v5736_v50  ;;  %v5828_v49 = vld [vmem:[#allocation2 + $0x54c] ss:$16 sps:$4 sm:$0xff]   ;;  %v5823_v50 = vld [vmem:[#allocation2 + $0x540] ss:$16 sps:$4 sm:$0xff]  }
 0x170   :  { %1885 = vmatpush1.bf16.msra.mxu0 %v5731_v51  ;;  %2049 = vmatpush1.bf16.msra.mxu1 %v5734_v52  ;;  %v5826_v51 = vld [vmem:[#allocation2 + $0x548] ss:$16 sps:$4 sm:$0xff]   ;;  %v5831_v52 = vld [vmem:[#allocation2 + $0x564] ss:$16 sps:$4 sm:$0xff]  }
 0x171   :  { %1886 = vmatprep.subr.bf16.mxu0 %v5739_v53  ;;  %2050 = vmatprep.subr.bf16.mxu1 %v5742_v54  ;;  %v5834_v53 = vld [vmem:[#allocation2 + $0x56c] ss:$16 sps:$4 sm:$0xff]   ;;  %v5829_v54 = vld [vmem:[#allocation2 + $0x560] ss:$16 sps:$4 sm:$0xff]  }
 0x174   :  { %1887 = vmatpush1.bf16.msra.mxu0 %v5737_v55  ;;  %2051 = vmatpush1.bf16.msra.mxu1 %v5740_v56  ;;  %v5832_v55 = vld [vmem:[#allocation2 + $0x568] ss:$16 sps:$4 sm:$0xff]   ;;  %v5837_v56 = vld [vmem:[#allocation2 + $0x584] ss:$16 sps:$4 sm:$0xff]  }
 0x175   :  { %1888 = vmatprep.subr.bf16.mxu0 %v5745_v57  ;;  %2052 = vmatprep.subr.bf16.mxu1 %v5748_v58  ;;  %v5840_v57 = vld [vmem:[#allocation2 + $0x58c] ss:$16 sps:$4 sm:$0xff]   ;;  %v5835_v58 = vld [vmem:[#allocation2 + $0x580] ss:$16 sps:$4 sm:$0xff]  }
 0x178   :  { %1889 = vmatpush1.bf16.msra.mxu0 %v5743_v59  ;;  %2053 = vmatpush1.bf16.msra.mxu1 %v5746_v60  ;;  %v5838_v59 = vld [vmem:[#allocation2 + $0x588] ss:$16 sps:$4 sm:$0xff]   ;;  %v5843_v60 = vld [vmem:[#allocation2 + $0x5a4] ss:$16 sps:$4 sm:$0xff]  }
 0x179   :  { %1890 = vmatprep.subr.bf16.mxu0 %v5751_v61  ;;  %2054 = vmatprep.subr.bf16.mxu1 %v5754_v62  ;;  %v5846_v61 = vld [vmem:[#allocation2 + $0x5ac] ss:$16 sps:$4 sm:$0xff]   ;;  %v5841_v62 = vld [vmem:[#allocation2 + $0x5a0] ss:$16 sps:$4 sm:$0xff]  }
 0x17c   :  { %1891 = vmatpush1.bf16.msra.mxu0 %v5749_v63  ;;  %2055 = vmatpush1.bf16.msra.mxu1 %v5752_v0  ;;  %v5844_v63 = vld [vmem:[#allocation2 + $0x5a8] ss:$16 sps:$4 sm:$0xff]   ;;  %v5849_v0 = vld [vmem:[#allocation2 + $0x5c4] ss:$16 sps:$4 sm:$0xff]  }
 0x17d   :  { %1892 = vmatprep.subr.bf16.mxu0 %v5757_v1  ;;  %2056 = vmatprep.subr.bf16.mxu1 %v5760_v2  ;;  %v5852_v1 = vld [vmem:[#allocation2 + $0x5cc] ss:$16 sps:$4 sm:$0xff]   ;;  %v5847_v2 = vld [vmem:[#allocation2 + $0x5c0] ss:$16 sps:$4 sm:$0xff]  }
 0x180   :  { %1893 = vmatpush1.bf16.msra.mxu0 %v5755_v3  ;;  %2057 = vmatpush1.bf16.msra.mxu1 %v5758_v4  ;;  %v5850_v3 = vld [vmem:[#allocation2 + $0x5c8] ss:$16 sps:$4 sm:$0xff]   ;;  %v5855_v4 = vld [vmem:[#allocation2 + $0x5e4] ss:$16 sps:$4 sm:$0xff]  }
 0x181   :  { %1903 = vmatprep.subr.bf16.mxu0 %v5765_v5  ;;  %2067 = vmatprep.subr.bf16.mxu1 %v5768_v6  ;;  %v5858_v5 = vld [vmem:[#allocation2 + $0x5ec] ss:$16 sps:$4 sm:$0xff]   ;;  %v5853_v6 = vld [vmem:[#allocation2 + $0x5e0] ss:$16 sps:$4 sm:$0xff]  }
 0x183   :  { %1895 = vmatmul.mubr.bf16.vlgmr.msra.gmra.mrb[0].mxu0 %v4868_v7  ;;  %2059 = vmatmul.mubr.bf16.vlgmr.msra.gmra.mrb[0].mxu1 %v4868_v7  ;;  %v5856_v7 = vld [vmem:[#allocation2 + $0x5e8] ss:$16 sps:$4 sm:$0xff]  }
 0x184   :  { %1904 = vmatpush1.bf16.msra.mxu0 %v5763_v8  ;;  %2068 = vmatpush1.bf16.msra.mxu1 %v5766_v9  ;;  %v5863_v8 = vld [vmem:[#allocation2 + $0x604] ss:$16 sps:$4 sm:$0xff]   ;;  %v5866_v9 = vld [vmem:[#allocation2 + $0x60c] ss:$16 sps:$4 sm:$0xff]  }
 0x185   :  { %1905 = vmatprep.subr.bf16.mxu0 %v5771_v10  ;;  %2069 = vmatprep.subr.bf16.mxu1 %v5774_v12  ;;  %v5861_v10 = vld [vmem:[#allocation2 + $0x600] ss:$16 sps:$4 sm:$0xff]   ;;  %v5864_v12 = vld [vmem:[#allocation2 + $0x608] ss:$16 sps:$4 sm:$0xff]  }
 0x186   :  { %1935 = vmatprep.mubr.bf16.mxu0 %v4871_v13  ;;  %2099 = vmatprep.mubr.bf16.mxu1 %v4871_v13  ;;  %v7066_v13 = vld [vmem:[%s7348_s10 + $0x18] sm:$0xff] }
 0x188   :  { %1906 = vmatpush1.bf16.msra.mxu0 %v5769_v14  ;;  %2070 = vmatpush1.bf16.msra.mxu1 %v5772_v15  ;;  %v4870_v14 = vcombine.low %v7059_v11, %v7059_v11  ;;  %v5869_v15 = vld [vmem:[#allocation2 + $0x624] ss:$16 sps:$4 sm:$0xff]   ;;  %v5873_v11 = vld [vmem:[#allocation2 + $0x640] ss:$16 sps:$4 sm:$0xff]  }
 0x189   :  { %1907 = vmatprep.subr.bf16.mxu0 %v5777_v16  ;;  %2071 = vmatprep.subr.bf16.mxu1 %v5780_v17  ;;  %v5872_v16 = vld [vmem:[#allocation2 + $0x62c] ss:$16 sps:$4 sm:$0xff]   ;;  %v5867_v17 = vld [vmem:[#allocation2 + $0x620] ss:$16 sps:$4 sm:$0xff]  }
 0x18c   :  { %1908 = vmatpush1.bf16.msra.mxu0 %v5775_v18  ;;  %2072 = vmatpush1.bf16.msra.mxu1 %v5778_v19  ;;  %v5870_v18 = vld [vmem:[#allocation2 + $0x628] ss:$16 sps:$4 sm:$0xff]   ;;  %v4873_v19 = vcombine.high %v7066_v13, %v7066_v13 }
 0x18d   :  { %1909 = vmatprep.subr.bf16.mxu0 %v5783_v20  ;;  %2073 = vmatprep.subr.bf16.mxu1 %v5786_v21  ;;  %v5875_v20 = vld [vmem:[#allocation2 + $0x644] ss:$16 sps:$4 sm:$0xff]   ;;  %v5878_v21 = vld [vmem:[#allocation2 + $0x64c] ss:$16 sps:$4 sm:$0xff]  }
 0x190   :  { %1910 = vmatpush1.bf16.msra.mxu0 %v5781_v22  ;;  %2074 = vmatpush1.bf16.msra.mxu1 %v5784_v23  ;;  %v5876_v22 = vld [vmem:[#allocation2 + $0x648] ss:$16 sps:$4 sm:$0xff]   ;;  %v5881_v23 = vld [vmem:[#allocation2 + $0x664] ss:$16 sps:$4 sm:$0xff]  }
 0x191   :  { %1911 = vmatprep.subr.bf16.mxu0 %v5789_v24  ;;  %2075 = vmatprep.subr.bf16.mxu1 %v5792_v25  ;;  %v5884_v24 = vld [vmem:[#allocation2 + $0x66c] ss:$16 sps:$4 sm:$0xff]   ;;  %v5879_v25 = vld [vmem:[#allocation2 + $0x660] ss:$16 sps:$4 sm:$0xff]  }
 0x194   :  { %1912 = vmatpush1.bf16.msra.mxu0 %v5787_v26  ;;  %2076 = vmatpush1.bf16.msra.mxu1 %v5790_v27  ;;  %v5882_v26 = vld [vmem:[#allocation2 + $0x668] ss:$16 sps:$4 sm:$0xff]   ;;  %v5887_v27 = vld [vmem:[#allocation2 + $0x684] ss:$16 sps:$4 sm:$0xff]  }
 0x195   :  { %1913 = vmatprep.subr.bf16.mxu0 %v5795_v28  ;;  %2077 = vmatprep.subr.bf16.mxu1 %v5798_v29  ;;  %v5890_v28 = vld [vmem:[#allocation2 + $0x68c] ss:$16 sps:$4 sm:$0xff]   ;;  %v5885_v29 = vld [vmem:[#allocation2 + $0x680] ss:$16 sps:$4 sm:$0xff]  }
 0x198   :  { %1914 = vmatpush1.bf16.msra.mxu0 %v5793_v30  ;;  %2078 = vmatpush1.bf16.msra.mxu1 %v5796_v31  ;;  %v5888_v30 = vld [vmem:[#allocation2 + $0x688] ss:$16 sps:$4 sm:$0xff]   ;;  %v5893_v31 = vld [vmem:[#allocation2 + $0x6a4] ss:$16 sps:$4 sm:$0xff]  }
 0x199   :  { %1915 = vmatprep.subr.bf16.mxu0 %v5801_v32  ;;  %2079 = vmatprep.subr.bf16.mxu1 %v5804_v33  ;;  %v5896_v32 = vld [vmem:[#allocation2 + $0x6ac] ss:$16 sps:$4 sm:$0xff]   ;;  %v5891_v33 = vld [vmem:[#allocation2 + $0x6a0] ss:$16 sps:$4 sm:$0xff]  }
 0x19c   :  { %1916 = vmatpush1.bf16.msra.mxu0 %v5799_v34  ;;  %2080 = vmatpush1.bf16.msra.mxu1 %v5802_v35  ;;  %v5894_v34 = vld [vmem:[#allocation2 + $0x6a8] ss:$16 sps:$4 sm:$0xff]   ;;  %v5899_v35 = vld [vmem:[#allocation2 + $0x6c4] ss:$16 sps:$4 sm:$0xff]  }
 0x19d   :  { %1917 = vmatprep.subr.bf16.mxu0 %v5807_v36  ;;  %2081 = vmatprep.subr.bf16.mxu1 %v5810_v37  ;;  %v5902_v36 = vld [vmem:[#allocation2 + $0x6cc] ss:$16 sps:$4 sm:$0xff]   ;;  %v5897_v37 = vld [vmem:[#allocation2 + $0x6c0] ss:$16 sps:$4 sm:$0xff]  }
 0x1a0   :  { %1918 = vmatpush1.bf16.msra.mxu0 %v5805_v38  ;;  %2082 = vmatpush1.bf16.msra.mxu1 %v5808_v39  ;;  %v5900_v38 = vld [vmem:[#allocation2 + $0x6c8] ss:$16 sps:$4 sm:$0xff]   ;;  %v5905_v39 = vld [vmem:[#allocation2 + $0x6e4] ss:$16 sps:$4 sm:$0xff]  }
 0x1a1   :  { %1919 = vmatprep.subr.bf16.mxu0 %v5813_v40  ;;  %2083 = vmatprep.subr.bf16.mxu1 %v5816_v41  ;;  %v5908_v40 = vld [vmem:[#allocation2 + $0x6ec] ss:$16 sps:$4 sm:$0xff]   ;;  %v5903_v41 = vld [vmem:[#allocation2 + $0x6e0] ss:$16 sps:$4 sm:$0xff]  }
 0x1a4   :  { %1920 = vmatpush1.bf16.msra.mxu0 %v5811_v42  ;;  %2084 = vmatpush1.bf16.msra.mxu1 %v5814_v43  ;;  %v5906_v42 = vld [vmem:[#allocation2 + $0x6e8] ss:$16 sps:$4 sm:$0xff]   ;;  %v5911_v43 = vld [vmem:[#allocation2 + $0x704] ss:$16 sps:$4 sm:$0xff]  }
 0x1a5   :  { %1921 = vmatprep.subr.bf16.mxu0 %v5819_v44  ;;  %2085 = vmatprep.subr.bf16.mxu1 %v5822_v45  ;;  %v5914_v44 = vld [vmem:[#allocation2 + $0x70c] ss:$16 sps:$4 sm:$0xff]   ;;  %v5909_v45 = vld [vmem:[#allocation2 + $0x700] ss:$16 sps:$4 sm:$0xff]  }
 0x1a8   :  { %1922 = vmatpush1.bf16.msra.mxu0 %v5817_v46  ;;  %2086 = vmatpush1.bf16.msra.mxu1 %v5820_v47  ;;  %v5912_v46 = vld [vmem:[#allocation2 + $0x708] ss:$16 sps:$4 sm:$0xff]   ;;  %v5917_v47 = vld [vmem:[#allocation2 + $0x724] ss:$16 sps:$4 sm:$0xff]  }
 0x1a9   :  { %1923 = vmatprep.subr.bf16.mxu0 %v5825_v48  ;;  %2087 = vmatprep.subr.bf16.mxu1 %v5828_v49  ;;  %v5920_v48 = vld [vmem:[#allocation2 + $0x72c] ss:$16 sps:$4 sm:$0xff]   ;;  %v5915_v49 = vld [vmem:[#allocation2 + $0x720] ss:$16 sps:$4 sm:$0xff]  }
 0x1ac   :  { %1924 = vmatpush1.bf16.msra.mxu0 %v5823_v50  ;;  %2088 = vmatpush1.bf16.msra.mxu1 %v5826_v51  ;;  %v5918_v50 = vld [vmem:[#allocation2 + $0x728] ss:$16 sps:$4 sm:$0xff]   ;;  %v5923_v51 = vld [vmem:[#allocation2 + $0x744] ss:$16 sps:$4 sm:$0xff]  }
 0x1ad   :  { %1925 = vmatprep.subr.bf16.mxu0 %v5831_v52  ;;  %2089 = vmatprep.subr.bf16.mxu1 %v5834_v53  ;;  %v5926_v52 = vld [vmem:[#allocation2 + $0x74c] ss:$16 sps:$4 sm:$0xff]   ;;  %v5921_v53 = vld [vmem:[#allocation2 + $0x740] ss:$16 sps:$4 sm:$0xff]  }
 0x1b0   :  { %1926 = vmatpush1.bf16.msra.mxu0 %v5829_v54  ;;  %2090 = vmatpush1.bf16.msra.mxu1 %v5832_v55  ;;  %v5924_v54 = vld [vmem:[#allocation2 + $0x748] ss:$16 sps:$4 sm:$0xff]   ;;  %v5929_v55 = vld [vmem:[#allocation2 + $0x764] ss:$16 sps:$4 sm:$0xff]  }
 0x1b1   :  { %1927 = vmatprep.subr.bf16.mxu0 %v5837_v56  ;;  %2091 = vmatprep.subr.bf16.mxu1 %v5840_v57  ;;  %v5932_v56 = vld [vmem:[#allocation2 + $0x76c] ss:$16 sps:$4 sm:$0xff]   ;;  %v5927_v57 = vld [vmem:[#allocation2 + $0x760] ss:$16 sps:$4 sm:$0xff]  }
 0x1b4   :  { %1928 = vmatpush1.bf16.msra.mxu0 %v5835_v58  ;;  %2092 = vmatpush1.bf16.msra.mxu1 %v5838_v59  ;;  %v5930_v58 = vld [vmem:[#allocation2 + $0x768] ss:$16 sps:$4 sm:$0xff]   ;;  %v5935_v59 = vld [vmem:[#allocation2 + $0x784] ss:$16 sps:$4 sm:$0xff]  }
 0x1b5   :  { %1929 = vmatprep.subr.bf16.mxu0 %v5843_v60  ;;  %2093 = vmatprep.subr.bf16.mxu1 %v5846_v61  ;;  %v5938_v60 = vld [vmem:[#allocation2 + $0x78c] ss:$16 sps:$4 sm:$0xff]   ;;  %v5933_v61 = vld [vmem:[#allocation2 + $0x780] ss:$16 sps:$4 sm:$0xff]  }
 0x1b8   :  { %1930 = vmatpush1.bf16.msra.mxu0 %v5841_v62  ;;  %2094 = vmatpush1.bf16.msra.mxu1 %v5844_v63  ;;  %v5936_v62 = vld [vmem:[#allocation2 + $0x788] ss:$16 sps:$4 sm:$0xff]   ;;  %v5941_v63 = vld [vmem:[#allocation2 + $0x7a4] ss:$16 sps:$4 sm:$0xff]  }
 0x1b9   :  { %1931 = vmatprep.subr.bf16.mxu0 %v5849_v0  ;;  %2095 = vmatprep.subr.bf16.mxu1 %v5852_v1  ;;  %v5944_v0 = vld [vmem:[#allocation2 + $0x7ac] ss:$16 sps:$4 sm:$0xff]   ;;  %v5939_v1 = vld [vmem:[#allocation2 + $0x7a0] ss:$16 sps:$4 sm:$0xff]  }
 0x1bc   :  { %1932 = vmatpush1.bf16.msra.mxu0 %v5847_v2  ;;  %2096 = vmatpush1.bf16.msra.mxu1 %v5850_v3  ;;  %v5942_v2 = vld [vmem:[#allocation2 + $0x7a8] ss:$16 sps:$4 sm:$0xff]   ;;  %v5947_v3 = vld [vmem:[#allocation2 + $0x7c4] ss:$16 sps:$4 sm:$0xff]  }
 0x1bd   :  { %1933 = vmatprep.subr.bf16.mxu0 %v5855_v4  ;;  %2097 = vmatprep.subr.bf16.mxu1 %v5858_v5  ;;  %v5950_v4 = vld [vmem:[#allocation2 + $0x7cc] ss:$16 sps:$4 sm:$0xff]   ;;  %v5945_v5 = vld [vmem:[#allocation2 + $0x7c0] ss:$16 sps:$4 sm:$0xff]  }
 0x1c0   :  { %1934 = vmatpush1.bf16.msra.mxu0 %v5853_v6  ;;  %2098 = vmatpush1.bf16.msra.mxu1 %v5856_v7  ;;  %v5948_v6 = vld [vmem:[#allocation2 + $0x7c8] ss:$16 sps:$4 sm:$0xff]   ;;  %v5953_v7 = vld [vmem:[#allocation2 + $0x7e4] ss:$16 sps:$4 sm:$0xff]  }
 0x1c1   :  { %1944 = vmatprep.subr.bf16.mxu0 %v5863_v8  ;;  %2108 = vmatprep.subr.bf16.mxu1 %v5866_v9  ;;  %v5956_v8 = vld [vmem:[#allocation2 + $0x7ec] ss:$16 sps:$4 sm:$0xff]   ;;  %v5951_v9 = vld [vmem:[#allocation2 + $0x7e0] ss:$16 sps:$4 sm:$0xff]  }
 0x1c3   :  { %1936 = vmatmul.mubr.bf16.vlgmr.msra.gmra.mrb[0].mxu0 %v4870_v14  ;;  %2100 = vmatmul.mubr.bf16.vlgmr.msra.gmra.mrb[0].mxu1 %v4870_v14  ;;  %v5959_v14 = vld [vmem:[#allocation6] ss:$8 sps:$4 sm:$0xff]  }
 0x1c4   :  { %1945 = vmatpush1.bf16.msra.mxu0 %v5861_v10  ;;  %2109 = vmatpush1.bf16.msra.mxu1 %v5864_v12  ;;  %v5954_v10 = vld [vmem:[#allocation2 + $0x7e8] ss:$16 sps:$4 sm:$0xff]  }
 0x1c5   :  { %1946 = vmatprep.subr.bf16.mxu0 %v5869_v15  ;;  %2110 = vmatprep.subr.bf16.mxu1 %v5872_v16  ;;  %v5961_v12 = vld [vmem:[#allocation6 + $0x4] ss:$8 sps:$4 sm:$0xff]   ;;  %v4872_v15 = vcombine.low %v7066_v13, %v7066_v13  ;;  %v5964_v16 = vld [vmem:[#allocation6 + $0x14] ss:$8 sps:$4 sm:$0xff]  }
 0x1c6   :  { %1976 = vmatprep.mubr.bf16.mxu0 %v4873_v19  ;;  %2140 = vmatprep.mubr.bf16.mxu1 %v4873_v19  ;;  %v5965_v19 = vld [vmem:[#allocation6 + $0x20] ss:$8 sps:$4 sm:$0xff]   ;;  %v5976_v13 = vld [vmem:[#allocation6 + $0x54] ss:$8 sps:$4 sm:$0xff]  }
 0x1c8   :  { %1947 = vmatpush1.bf16.msra.mxu0 %v5867_v17  ;;  %2111 = vmatpush1.bf16.msra.mxu1 %v5870_v18  ;;  %v5962_v17 = vld [vmem:[#allocation6 + $0x10] ss:$8 sps:$4 sm:$0xff]   ;;  %v5967_v18 = vld [vmem:[#allocation6 + $0x24] ss:$8 sps:$4 sm:$0xff]  }
 0x1c9   :  { %1948 = vmatprep.subr.bf16.mxu0 %v5875_v20  ;;  %2112 = vmatprep.subr.bf16.mxu1 %v5878_v21  ;;  %v5970_v20 = vld [vmem:[#allocation6 + $0x34] ss:$8 sps:$4 sm:$0xff]   ;;  %v5968_v21 = vld [vmem:[#allocation6 + $0x30] ss:$8 sps:$4 sm:$0xff]  }
 0x1cc   :  { %1949 = vmatpush1.bf16.msra.mxu0 %v5873_v11  ;;  %2113 = vmatpush1.bf16.msra.mxu1 %v5876_v22  ;;  %v5973_v11 = vld [vmem:[#allocation6 + $0x44] ss:$8 sps:$4 sm:$0xff]   ;;  %v5971_v22 = vld [vmem:[#allocation6 + $0x40] ss:$8 sps:$4 sm:$0xff]  }
 0x1cd   :  { %1950 = vmatprep.subr.bf16.mxu0 %v5881_v23  ;;  %2114 = vmatprep.subr.bf16.mxu1 %v5884_v24  ;;  %v5974_v23 = vld [vmem:[#allocation6 + $0x50] ss:$8 sps:$4 sm:$0xff]   ;;  %v5979_v24 = vld [vmem:[#allocation6 + $0x64] ss:$8 sps:$4 sm:$0xff]  }
 0x1d0   :  { %1951 = vmatpush1.bf16.msra.mxu0 %v5879_v25  ;;  %2115 = vmatpush1.bf16.msra.mxu1 %v5882_v26  ;;  %v5977_v25 = vld [vmem:[#allocation6 + $0x60] ss:$8 sps:$4 sm:$0xff]   ;;  %v5982_v26 = vld [vmem:[#allocation6 + $0x74] ss:$8 sps:$4 sm:$0xff]  }
 0x1d1   :  { %1952 = vmatprep.subr.bf16.mxu0 %v5887_v27  ;;  %2116 = vmatprep.subr.bf16.mxu1 %v5890_v28  ;;  %v5980_v27 = vld [vmem:[#allocation6 + $0x70] ss:$8 sps:$4 sm:$0xff]   ;;  %v5985_v28 = vld [vmem:[#allocation6 + $0x84] ss:$8 sps:$4 sm:$0xff]  }
 0x1d4   :  { %1953 = vmatpush1.bf16.msra.mxu0 %v5885_v29  ;;  %2117 = vmatpush1.bf16.msra.mxu1 %v5888_v30  ;;  %v5983_v29 = vld [vmem:[#allocation6 + $0x80] ss:$8 sps:$4 sm:$0xff]   ;;  %v5988_v30 = vld [vmem:[#allocation6 + $0x94] ss:$8 sps:$4 sm:$0xff]  }
 0x1d5   :  { %1954 = vmatprep.subr.bf16.mxu0 %v5893_v31  ;;  %2118 = vmatprep.subr.bf16.mxu1 %v5896_v32  ;;  %v5986_v31 = vld [vmem:[#allocation6 + $0x90] ss:$8 sps:$4 sm:$0xff]   ;;  %v5991_v32 = vld [vmem:[#allocation6 + $0xa4] ss:$8 sps:$4 sm:$0xff]  }
 0x1d8   :  { %1955 = vmatpush1.bf16.msra.mxu0 %v5891_v33  ;;  %2119 = vmatpush1.bf16.msra.mxu1 %v5894_v34  ;;  %v5989_v33 = vld [vmem:[#allocation6 + $0xa0] ss:$8 sps:$4 sm:$0xff]   ;;  %v5994_v34 = vld [vmem:[#allocation6 + $0xb4] ss:$8 sps:$4 sm:$0xff]  }
 0x1d9   :  { %1956 = vmatprep.subr.bf16.mxu0 %v5899_v35  ;;  %2120 = vmatprep.subr.bf16.mxu1 %v5902_v36  ;;  %v5992_v35 = vld [vmem:[#allocation6 + $0xb0] ss:$8 sps:$4 sm:$0xff]   ;;  %v5997_v36 = vld [vmem:[#allocation6 + $0xc4] ss:$8 sps:$4 sm:$0xff]  }
 0x1dc   :  { %1957 = vmatpush1.bf16.msra.mxu0 %v5897_v37  ;;  %2121 = vmatpush1.bf16.msra.mxu1 %v5900_v38  ;;  %v5995_v37 = vld [vmem:[#allocation6 + $0xc0] ss:$8 sps:$4 sm:$0xff]   ;;  %v6000_v38 = vld [vmem:[#allocation6 + $0xd4] ss:$8 sps:$4 sm:$0xff]  }
 0x1dd   :  { %1958 = vmatprep.subr.bf16.mxu0 %v5905_v39  ;;  %2122 = vmatprep.subr.bf16.mxu1 %v5908_v40  ;;  %v5998_v39 = vld [vmem:[#allocation6 + $0xd0] ss:$8 sps:$4 sm:$0xff]   ;;  %v6003_v40 = vld [vmem:[#allocation6 + $0xe4] ss:$8 sps:$4 sm:$0xff]  }
 0x1e0   :  { %1959 = vmatpush1.bf16.msra.mxu0 %v5903_v41  ;;  %2123 = vmatpush1.bf16.msra.mxu1 %v5906_v42  ;;  %v6001_v41 = vld [vmem:[#allocation6 + $0xe0] ss:$8 sps:$4 sm:$0xff]   ;;  %v6006_v42 = vld [vmem:[#allocation6 + $0xf4] ss:$8 sps:$4 sm:$0xff]  }
 0x1e1   :  { %1960 = vmatprep.subr.bf16.mxu0 %v5911_v43  ;;  %2124 = vmatprep.subr.bf16.mxu1 %v5914_v44  ;;  %v6004_v43 = vld [vmem:[#allocation6 + $0xf0] ss:$8 sps:$4 sm:$0xff]   ;;  %v6009_v44 = vld [vmem:[#allocation6 + $0x104] ss:$8 sps:$4 sm:$0xff]  }
 0x1e4   :  { %1961 = vmatpush1.bf16.msra.mxu0 %v5909_v45  ;;  %2125 = vmatpush1.bf16.msra.mxu1 %v5912_v46  ;;  %v6055_v45 = vld [vmem:[#allocation7 + $0x40] sm:$0xff]  }
 0x1e5   :  { %1962 = vmatprep.subr.bf16.mxu0 %v5917_v47  ;;  %2126 = vmatprep.subr.bf16.mxu1 %v5920_v48  ;;  %v6056_v46 = vld [vmem:[#allocation7] sm:$0xff]   ;;  %v6057_v47 = vld [vmem:[#allocation7 + $0x48] sm:$0xff]  }
 0x1e6   :  { %v6058_v48 = vld [vmem:[#allocation7 + $0x8] sm:$0xff]  }
 0x1e8   :  { %1963 = vmatpush1.bf16.msra.mxu0 %v5915_v49  ;;  %2127 = vmatpush1.bf16.msra.mxu1 %v5918_v50  ;;  %v6059_v49 = vld [vmem:[#allocation7 + $0x50] sm:$0xff]  }
 0x1e9   :  { %1964 = vmatprep.subr.bf16.mxu0 %v5923_v51  ;;  %2128 = vmatprep.subr.bf16.mxu1 %v5926_v52  ;;  %v6060_v50 = vld [vmem:[#allocation7 + $0x10] sm:$0xff]   ;;  %v6061_v51 = vld [vmem:[#allocation7 + $0x58] sm:$0xff]  }
 0x1ea   :  { %v6062_v52 = vld [vmem:[#allocation7 + $0x18] sm:$0xff]  }
 0x1ec   :  { %1965 = vmatpush1.bf16.msra.mxu0 %v5921_v53  ;;  %2129 = vmatpush1.bf16.msra.mxu1 %v5924_v54  ;;  %v6063_v53 = vld [vmem:[#allocation7 + $0x60] sm:$0xff]  }
 0x1ed   :  { %1966 = vmatprep.subr.bf16.mxu0 %v5929_v55  ;;  %2130 = vmatprep.subr.bf16.mxu1 %v5932_v56  ;;  %v6064_v54 = vld [vmem:[#allocation7 + $0x20] sm:$0xff]   ;;  %v6065_v55 = vld [vmem:[#allocation7 + $0x68] sm:$0xff]  }
 0x1ee   :  { %v6066_v56 = vld [vmem:[#allocation7 + $0x28] sm:$0xff]  }
 0x1f0   :  { %1967 = vmatpush1.bf16.msra.mxu0 %v5927_v57  ;;  %2131 = vmatpush1.bf16.msra.mxu1 %v5930_v58  ;;  %v493_v57 = vlaneseq }
 0x1f1   :  { %1968 = vmatprep.subr.bf16.mxu0 %v5935_v59  ;;  %2132 = vmatprep.subr.bf16.mxu1 %v5938_v60  ;;  %v7079_v60 = vld [vmem:[#allocation4] sm:$0xf] }
 0x1f2   :  { %v7074_v58 = vshrl.u32 %v493_v57, 7  ;;  %v6069_v57 = vld [vmem:[#allocation7 + $0x78] sm:$0xff]  }
 0x1f4   :  { %1969 = vmatpush1.bf16.msra.mxu0 %v5933_v61  ;;  %2133 = vmatpush1.bf16.msra.mxu1 %v5936_v62  ;;  %v7077_v59 = vsub.s32 0, %v7074_v58  ;;  %v7082_v61 = vsub.s32 1, %v7074_v58  ;;  %v507_v62 = vsub.s32 3, %v7074_v58 }
 0x1f5   :  { %1970 = vmatprep.subr.bf16.mxu0 %v5941_v63  ;;  %2134 = vmatprep.subr.bf16.mxu1 %v5944_v0 }
 0x1f6   :  { %v496_v63 = vrot.slane %v7079_v60, %v7077_v59  ;;  %v500_v0 = vrot.slane %v7079_v60, %v7082_v61 }
 0x1f8   :  { %1971 = vmatpush1.bf16.msra.mxu0 %v5939_v1  ;;  %2135 = vmatpush1.bf16.msra.mxu1 %v5942_v2  ;;  %v508_v1 = vrot.slane %v7079_v60, %v507_v62 }
 0x1f9   :  { %1972 = vmatprep.subr.bf16.mxu0 %v5947_v3  ;;  %2136 = vmatprep.subr.bf16.mxu1 %v5950_v4 }
 0x1fc   :  { %1973 = vmatpush1.bf16.msra.mxu0 %v5945_v5  ;;  %2137 = vmatpush1.bf16.msra.mxu1 %v5948_v6 }
 0x1fd   :  { %1974 = vmatprep.subr.bf16.mxu0 %v5953_v7  ;;  %2138 = vmatprep.subr.bf16.mxu1 %v5956_v8 }
 0x200   :  { %1975 = vmatpush1.bf16.msra.mxu0 %v5951_v9  ;;  %2139 = vmatpush1.bf16.msra.mxu1 %v5954_v10 }
 0x201   :  { %2553 = vmatprep.subr.bf16.mxu0 %v5961_v12  ;;  %5457 = vmatprep.subr.bf16.mxu1 %v6055_v45  ;;  %v6048_v45 = vld [vmem:[#allocation6 + $0x1d4] ss:$8 sps:$4 sm:$0xff]  }
 0x203   :  { %1977 = vmatmul.mubr.bf16.vlgmr.msra.gmra.mrb[0].mxu0 %v4872_v15  ;;  %2141 = vmatmul.mubr.bf16.vlgmr.msra.gmra.mrb[0].mxu1 %v4872_v15 }
 0x204   :  { %2554 = vmatpush1.bf16.msra.mxu0 %v5959_v14  ;;  %5458 = vmatpush3.bf16.msra.mxu1 %v6056_v46  ;;  %v6046_v46 = vld [vmem:[#allocation6 + $0x1d0] ss:$8 sps:$4 sm:$0xff]  }
 0x205   :  { %2555 = vmatprep.subr.bf16.mxu0 %v5964_v16  ;;  %5459 = vmatprep.subr.bf16.mxu1 %v6057_v47 }
 0x208   :  { %2556 = vmatpush1.bf16.msra.mxu0 %v5962_v17  ;;  %5460 = vmatpush3.bf16.msra.mxu1 %v6058_v48  ;;  %v6051_v48 = vld [vmem:[#allocation6 + $0x1e4] ss:$8 sps:$4 sm:$0xff]  }
 0x209   :  { %2557 = vmatprep.subr.bf16.mxu0 %v5967_v18  ;;  %5461 = vmatprep.subr.bf16.mxu1 %v6059_v49  ;;  %v6049_v49 = vld [vmem:[#allocation6 + $0x1e0] ss:$8 sps:$4 sm:$0xff]  }
 0x20c   :  { %2558 = vmatpush1.bf16.msra.mxu0 %v5965_v19  ;;  %5462 = vmatpush3.bf16.msra.mxu1 %v6060_v50  ;;  %v6007_v19 = vld [vmem:[#allocation6 + $0x100] ss:$8 sps:$4 sm:$0xff]  }
 0x20d   :  { %2559 = vmatprep.subr.bf16.mxu0 %v5970_v20  ;;  %5463 = vmatprep.subr.bf16.mxu1 %v6061_v51  ;;  %v6054_v51 = vld [vmem:[#allocation6 + $0x1f4] ss:$8 sps:$4 sm:$0xff]  }
 0x210   :  { %2560 = vmatpush1.bf16.msra.mxu0 %v5968_v21  ;;  %5464 = vmatpush3.bf16.msra.mxu1 %v6062_v52  ;;  %v6012_v21 = vld [vmem:[#allocation6 + $0x114] ss:$8 sps:$4 sm:$0xff]   ;;  %v6052_v52 = vld [vmem:[#allocation6 + $0x1f0] ss:$8 sps:$4 sm:$0xff]  }
 0x211   :  { %2561 = vmatprep.subr.bf16.mxu0 %v5973_v11  ;;  %5465 = vmatprep.subr.bf16.mxu1 %v6063_v53 }
 0x214   :  { %2562 = vmatpush1.bf16.msra.mxu0 %v5971_v22  ;;  %5466 = vmatpush3.bf16.msra.mxu1 %v6064_v54  ;;  %v6010_v22 = vld [vmem:[#allocation6 + $0x110] ss:$8 sps:$4 sm:$0xff]  }
 0x215   :  { %2563 = vmatprep.subr.bf16.mxu0 %v5976_v13  ;;  %5467 = vmatprep.subr.bf16.mxu1 %v6065_v55  ;;  %v6015_v13 = vld [vmem:[#allocation6 + $0x124] ss:$8 sps:$4 sm:$0xff]   ;;  %v6067_v55 = vld [vmem:[#allocation7 + $0x70] sm:$0xff]  }
 0x218   :  { %2564 = vmatpush1.bf16.msra.mxu0 %v5974_v23  ;;  %5468 = vmatpush3.bf16.msra.mxu1 %v6066_v56  ;;  %v6013_v23 = vld [vmem:[#allocation6 + $0x120] ss:$8 sps:$4 sm:$0xff]   ;;  %v6068_v56 = vld [vmem:[#allocation7 + $0x30] sm:$0xff]  }
 0x219   :  { %2565 = vmatprep.subr.bf16.mxu0 %v5979_v24  ;;  %v6018_v24 = vld [vmem:[#allocation6 + $0x134] ss:$8 sps:$4 sm:$0xff]   ;;  %5469 = vmatprep.subr.bf16.mxu1 %v6067_v55 }
 0x21a   :  { %v6104_v55 = vld [vmem:[#allocation12 + $0x30] ss:$8 sps:$4 sm:$0xff]  }
 0x21c   :  { %2566 = vmatpush1.bf16.msra.mxu0 %v5977_v25  ;;  %v6016_v25 = vld [vmem:[#allocation6 + $0x130] ss:$8 sps:$4 sm:$0xff]   ;;  %5470 = vmatpush3.bf16.msra.mxu1 %v6068_v56 }
 0x21d   :  { %2567 = vmatprep.subr.bf16.mxu0 %v5982_v26  ;;  %v6021_v26 = vld [vmem:[#allocation6 + $0x144] ss:$8 sps:$4 sm:$0xff]   ;;  %5471 = vmatprep.subr.bf16.mxu1 %v6069_v57 }
 0x21e   :  { %v6109_v56 = vld [vmem:[#allocation12 + $0x44] ss:$8 sps:$4 sm:$0xff]   ;;  %v6107_v57 = vld [vmem:[#allocation12 + $0x40] ss:$8 sps:$4 sm:$0xff]  }
 0x220   :  { %2568 = vmatpush1.bf16.msra.mxu0 %v5980_v27  ;;  %v6019_v27 = vld [vmem:[#allocation6 + $0x140] ss:$8 sps:$4 sm:$0xff]  }
 0x221   :  { %2569 = vmatprep.subr.bf16.mxu0 %v5985_v28  ;;  %v6024_v28 = vld [vmem:[#allocation6 + $0x154] ss:$8 sps:$4 sm:$0xff]  }
 0x224   :  { %2570 = vmatpush1.bf16.msra.mxu0 %v5983_v29  ;;  %v6022_v29 = vld [vmem:[#allocation6 + $0x150] ss:$8 sps:$4 sm:$0xff]  }
 0x225   :  { %2571 = vmatprep.subr.bf16.mxu0 %v5988_v30  ;;  %v6027_v30 = vld [vmem:[#allocation6 + $0x164] ss:$8 sps:$4 sm:$0xff]  }
 0x228   :  { %2572 = vmatpush1.bf16.msra.mxu0 %v5986_v31  ;;  %v6025_v31 = vld [vmem:[#allocation6 + $0x160] ss:$8 sps:$4 sm:$0xff]  }
 0x229   :  { %2573 = vmatprep.subr.bf16.mxu0 %v5991_v32  ;;  %v6030_v32 = vld [vmem:[#allocation6 + $0x174] ss:$8 sps:$4 sm:$0xff]  }
 0x22c   :  { %2574 = vmatpush1.bf16.msra.mxu0 %v5989_v33  ;;  %v6028_v33 = vld [vmem:[#allocation6 + $0x170] ss:$8 sps:$4 sm:$0xff]  }
 0x22d   :  { %2575 = vmatprep.subr.bf16.mxu0 %v5994_v34  ;;  %v6033_v34 = vld [vmem:[#allocation6 + $0x184] ss:$8 sps:$4 sm:$0xff]  }
 0x230   :  { %2576 = vmatpush1.bf16.msra.mxu0 %v5992_v35  ;;  %v6031_v35 = vld [vmem:[#allocation6 + $0x180] ss:$8 sps:$4 sm:$0xff]  }
 0x231   :  { %2577 = vmatprep.subr.bf16.mxu0 %v5997_v36  ;;  %v6036_v36 = vld [vmem:[#allocation6 + $0x194] ss:$8 sps:$4 sm:$0xff]  }
 0x234   :  { %2578 = vmatpush1.bf16.msra.mxu0 %v5995_v37  ;;  %v6034_v37 = vld [vmem:[#allocation6 + $0x190] ss:$8 sps:$4 sm:$0xff]  }
 0x235   :  { %2579 = vmatprep.subr.bf16.mxu0 %v6000_v38  ;;  %v6039_v38 = vld [vmem:[#allocation6 + $0x1a4] ss:$8 sps:$4 sm:$0xff]  }
 0x238   :  { %2580 = vmatpush1.bf16.msra.mxu0 %v5998_v39  ;;  %v6037_v39 = vld [vmem:[#allocation6 + $0x1a0] ss:$8 sps:$4 sm:$0xff]  }
 0x239   :  { %2581 = vmatprep.subr.bf16.mxu0 %v6003_v40  ;;  %v6042_v40 = vld [vmem:[#allocation6 + $0x1b4] ss:$8 sps:$4 sm:$0xff]  }
 0x23c   :  { %2582 = vmatpush1.bf16.msra.mxu0 %v6001_v41  ;;  %v6040_v41 = vld [vmem:[#allocation6 + $0x1b0] ss:$8 sps:$4 sm:$0xff]  }
 0x23d   :  { %2583 = vmatprep.subr.bf16.mxu0 %v6006_v42  ;;  %v6045_v42 = vld [vmem:[#allocation6 + $0x1c4] ss:$8 sps:$4 sm:$0xff]  }
 0x240   :  { %2584 = vmatpush1.bf16.msra.mxu0 %v6004_v43  ;;  %v6043_v43 = vld [vmem:[#allocation6 + $0x1c0] ss:$8 sps:$4 sm:$0xff]  }
 0x241   :  { %2594 = vmatprep.subr.bf16.mxu0 %v6009_v44  ;;  %v503_v44 = vsub.s32 2, %v7074_v58 }
 0x243   :  { %v504_v47 = vrot.slane %v7079_v60, %v503_v44  ;;  %v6070_v60 = vld [vmem:[#allocation7 + $0x38] sm:$0xff]  }
 0x244   :  { %5472 = vmatpush3.bf16.msra.mxu1 %v6070_v60  ;;  %v6112_v60 = vld [vmem:[#allocation12 + $0x54] ss:$8 sps:$4 sm:$0xff]  }
 0x2d6   :  { %v1978_v2 = vpop.f32.mrb[0].mxu0  ;;  %v7092_v3 = vpop.f32.mrb[0].mxu1 }
 0x2d7   :  { %v5509_v4 = vadd.f32 %v1978_v2, %v496_v63  ;;  %v1980_v5 = vpop.f32.mrb[1].mxu0  ;;  %v2144_v6 = vpop.f32.mrb[1].mxu1  ;;  %v5511_v50 = vadd.f32 %v7092_v3, %v504_v47  ;;  %v6754_v63 = vmov 0.0  }
 0x2d8   :  { %v5510_v7 = vadd.f32 %v1980_v5, %v500_v0  ;;  %v5512_v8 = vadd.f32 %v2144_v6, %v508_v1  ;;  %v1982_v9 = vpop.f32.mrb[2].mxu0  ;;  %v2146_v10 = vpop.f32.mrb[2].mxu1  ;;  %5503 = vmatprep.subr.bf16.mxu1 %v6754_v63  ;;  %v2221_v0 = vld [vmem:[%s7349_s13] sm:$0x3] }
 0x2d9   :  { %v2149_v12 = vmax.f32 %v5509_v4, 0.0  ;;  %v1983_v14 = vpop.f32.mrb[3].mxu0  ;;  %v2147_v15 = vpop.f32.mrb[3].mxu1  ;;  %v2151_v53 = vmax.f32 %v5511_v50, 0.0  ;;  %v2226_v1 = vrot.slane %v2221_v0, %v7077_v59  ;;  %v2230_v2 = vrot.slane %v2221_v0, %v7082_v61  ;;  %v6100_v50 = vld [vmem:[#allocation12 + $0x14] ss:$8 sps:$4 sm:$0xff]  }
 0x2da   :  { %v2150_v16 = vmax.f32 %v5510_v7, 0.0  ;;  %v2152_v17 = vmax.f32 %v5512_v8, 0.0  ;;  %v6115_v0 = vld [vmem:[#allocation12 + $0x64] ss:$8 sps:$4 sm:$0xff]  }
 0x2db   :  { %v2153_v20 = vpack.c.bf16 %v2149_v12, %v2149_v12  ;;  %v2155_v54 = vpack.c.bf16 %v2151_v53, %v2151_v53  ;;  %v2817_v12 = vld [vmem:[#allocation9] sm:$0xf]  ;;  %v6101_v53 = vld [vmem:[#allocation12 + $0x20] ss:$8 sps:$4 sm:$0xff]  }
 0x2dc   :  { %v2154_v18 = vpack.c.bf16 %v2150_v16, %v2150_v16  ;;  %v2156_v11 = vpack.c.bf16 %v2152_v17, %v2152_v17  ;;  %v2831_v16 = vsel %vm2829_vm0, %v2817_v12, 0  ;;  %v6073_v17 = vld [vmem:[#allocation13 + $0x4] ss:$8 sps:$4 sm:$0xff]  }
 0x2dd   :  { %v6122_v12 = vld [vmem:[%s7325_s14 + $0x10] ss:$8 sps:$4 sm:$0xff]  }
 0x2de   :  { %2585 = vmatprep.mubr.bf16.mxu0 %v2154_v18  ;;  %v2815_v18 = vld [vmem:[%s7350_s1] sm:$0xff] }
 0x2df   :  { %2586 = vmatmul.mubr.bf16.vlgmr.msra.gmra.mrb[4].mxu0 %v2153_v20  ;;  %v6071_v20 = vld [vmem:[#allocation13] ss:$8 sps:$4 sm:$0xff]  }
 0x2e0   :  { %2595 = vmatpush1.bf16.msra.mxu0 %v6007_v19  ;;  %2626 = vmatprep.mubr.bf16.mxu0 %v2156_v11  ;;  %v2816_v19 = vpack.c.bf16 %v2815_v18, %v2815_v18  ;;  %v6074_v11 = vld [vmem:[#allocation13 + $0x10] ss:$8 sps:$4 sm:$0xff]  }
 0x2e1   :  { %2596 = vmatprep.subr.bf16.mxu0 %v6012_v21  ;;  %v6076_v21 = vld [vmem:[#allocation13 + $0x14] ss:$8 sps:$4 sm:$0xff]  }
 0x2e2   :  { %v6133_v18 = vld [vmem:[%s7325_s14 + $0x44] ss:$8 sps:$4 sm:$0xff]  }
 0x2e4   :  { %2597 = vmatpush1.bf16.msra.mxu0 %v6010_v22  ;;  %v6079_v22 = vld [vmem:[#allocation13 + $0x24] ss:$8 sps:$4 sm:$0xff]  }
 0x2e5   :  { %2598 = vmatprep.subr.bf16.mxu0 %v6015_v13  ;;  %v6077_v13 = vld [vmem:[#allocation13 + $0x20] ss:$8 sps:$4 sm:$0xff]  }
 0x2e8   :  { %2599 = vmatpush1.bf16.msra.mxu0 %v6013_v23  ;;  %v6082_v23 = vld [vmem:[#allocation13 + $0x34] ss:$8 sps:$4 sm:$0xff]  }
 0x2e9   :  { %2600 = vmatprep.subr.bf16.mxu0 %v6018_v24  ;;  %v6080_v24 = vld [vmem:[#allocation13 + $0x30] ss:$8 sps:$4 sm:$0xff]  }
 0x2ec   :  { %2601 = vmatpush1.bf16.msra.mxu0 %v6016_v25  ;;  %v6085_v25 = vld [vmem:[#allocation13 + $0x44] ss:$8 sps:$4 sm:$0xff]  }
 0x2ed   :  { %2602 = vmatprep.subr.bf16.mxu0 %v6021_v26  ;;  %v6083_v26 = vld [vmem:[#allocation13 + $0x40] ss:$8 sps:$4 sm:$0xff]  }
 0x2f0   :  { %2603 = vmatpush1.bf16.msra.mxu0 %v6019_v27  ;;  %v6088_v27 = vld [vmem:[#allocation13 + $0x54] ss:$8 sps:$4 sm:$0xff]  }
 0x2f1   :  { %2604 = vmatprep.subr.bf16.mxu0 %v6024_v28  ;;  %v6086_v28 = vld [vmem:[#allocation13 + $0x50] ss:$8 sps:$4 sm:$0xff]  }
 0x2f4   :  { %2605 = vmatpush1.bf16.msra.mxu0 %v6022_v29  ;;  %v6091_v29 = vld [vmem:[#allocation13 + $0x64] ss:$8 sps:$4 sm:$0xff]  }
 0x2f5   :  { %2606 = vmatprep.subr.bf16.mxu0 %v6027_v30  ;;  %v6089_v30 = vld [vmem:[#allocation13 + $0x60] ss:$8 sps:$4 sm:$0xff]  }
 0x2f8   :  { %2607 = vmatpush1.bf16.msra.mxu0 %v6025_v31  ;;  %v6094_v31 = vld [vmem:[#allocation13 + $0x74] ss:$8 sps:$4 sm:$0xff]  }
 0x2f9   :  { %2608 = vmatprep.subr.bf16.mxu0 %v6030_v32  ;;  %v6092_v32 = vld [vmem:[#allocation13 + $0x70] ss:$8 sps:$4 sm:$0xff]  }
 0x2fc   :  { %2609 = vmatpush1.bf16.msra.mxu0 %v6028_v33  ;;  %v6097_v33 = vld [vmem:[#allocation12 + $0x4] ss:$8 sps:$4 sm:$0xff]  }
 0x2fd   :  { %2610 = vmatprep.subr.bf16.mxu0 %v6033_v34  ;;  %v6756_v34 = vmov 0  }
 0x300   :  { %2611 = vmatpush1.bf16.msra.mxu0 %v6031_v35 }
 0x301   :  { %2612 = vmatprep.subr.bf16.mxu0 %v6036_v36 }
 0x304   :  { %2613 = vmatpush1.bf16.msra.mxu0 %v6034_v37 }
 0x305   :  { %2614 = vmatprep.subr.bf16.mxu0 %v6039_v38 }
 0x308   :  { %2615 = vmatpush1.bf16.msra.mxu0 %v6037_v39 }
 0x309   :  { %2616 = vmatprep.subr.bf16.mxu0 %v6042_v40  ;;  %v5211_v40 = vld [vmem:[#allocation10] ss:$0 sm:$0xff] }
 0x30c   :  { %2617 = vmatpush1.bf16.msra.mxu0 %v6040_v41 }
 0x30d   :  { %2618 = vmatprep.subr.bf16.mxu0 %v6045_v42 }
 0x310   :  { %2619 = vmatpush1.bf16.msra.mxu0 %v6043_v43 }
 0x311   :  { %2620 = vmatprep.subr.bf16.mxu0 %v6048_v45 }
 0x314   :  { %2621 = vmatpush1.bf16.msra.mxu0 %v6046_v46 }
 0x315   :  { %2622 = vmatprep.subr.bf16.mxu0 %v6051_v48  ;;  %v6095_v48 = vld [vmem:[#allocation12] ss:$8 sps:$4 sm:$0xff]  }
 0x318   :  { %2623 = vmatpush1.bf16.msra.mxu0 %v6049_v49 }
 0x319   :  { %2624 = vmatprep.subr.bf16.mxu0 %v6054_v51  ;;  %v6098_v51 = vld [vmem:[#allocation12 + $0x10] ss:$8 sps:$4 sm:$0xff]  }
 0x31c   :  { %2625 = vmatpush1.bf16.msra.mxu0 %v6052_v52  ;;  %v6103_v52 = vld [vmem:[#allocation12 + $0x24] ss:$8 sps:$4 sm:$0xff]  }
 0x31f   :  { %2627 = vmatmul.mubr.bf16.vlgmr.msra.gmra.mrb[4].mxu0 %v2155_v54  ;;  %v6106_v54 = vld [vmem:[#allocation12 + $0x34] ss:$8 sps:$4 sm:$0xff]  }
 0x320   :  { %3560 = vmatprep.mubr.bf16.mxu0 %v6756_v34 }
 0x3f2   :  { %v2628_v3 = vpop.f32.mrb[4].mxu0 }
 0x3f3   :  { %v5513_v4 = vadd.f32 %v2628_v3, %v2226_v1  ;;  %v2630_v5 = vpop.f32.mrb[5].mxu0  ;;  %v5194_v1 = vld [vmem:[%s7319_s8] ss:$0 sm:$0xff] }
 0x3f4   :  { %v5514_v6 = vadd.f32 %v2630_v5, %v2230_v2  ;;  %v2632_v7 = vpop.f32.mrb[6].mxu0  ;;  %v6113_v2 = vld [vmem:[#allocation12 + $0x60] ss:$8 sps:$4 sm:$0xff]   ;;  %v6116_v5 = vld [vmem:[#allocation12 + $0x70] ss:$8 sps:$4 sm:$0xff]  }
 0x3f5   :  { %v2635_v8 = vmax.f32 %v5513_v4, 0.0  ;;  %v2633_v9 = vpop.f32.mrb[7].mxu0  ;;  %v6118_v4 = vld [vmem:[#allocation12 + $0x74] ss:$8 sps:$4 sm:$0xff]  }
 0x3f6   :  { %v2636_v10 = vmax.f32 %v5514_v6, 0.0  ;;  %v6121_v7 = vld [vmem:[%s7325_s14 + $0x4] ss:$8 sps:$4 sm:$0xff]  }
 0x3f7   :  { %v2637_v15 = vpack.c.bf16 %v2635_v8, %v2635_v8  ;;  %v6119_v8 = vld [vmem:[%s7325_s14] ss:$8 sps:$4 sm:$0xff]  }
 0x3f8   :  { %v2638_v14 = vpack.c.bf16 %v2636_v10, %v2636_v10  ;;  %v6124_v10 = vld [vmem:[%s7325_s14 + $0x14] ss:$8 sps:$4 sm:$0xff]  }
 0x3fa   :  { %2806 = vmatprep.mubr.bf16.mxu1 %v2638_v14  ;;  %v6127_v14 = vld [vmem:[%s7325_s14 + $0x24] ss:$8 sps:$4 sm:$0xff]  }
 0x3fb   :  { %2807 = vmatmul.mubr.bf16.vlgmr.msra.gmra.mrb[4].mxu1 %v2637_v15  ;;  %v6125_v15 = vld [vmem:[%s7325_s14 + $0x20] ss:$8 sps:$4 sm:$0xff]  }
 0x3fc   :  { %5504 = vmatpush3.bf16.msra.mxu1 %v2831_v16  ;;  %5505 = vmatprep.mubr.msk.bf16.mxu1 %vm6755_vm1, %v6754_v63  ;;  %v6110_v63 = vld [vmem:[#allocation12 + $0x50] ss:$8 sps:$4 sm:$0xff]  }
 0x3fd   :  { %2988 = vmatprep.subr.bf16.mxu1 %v6073_v17  ;;  %v6130_v16 = vld [vmem:[%s7325_s14 + $0x34] ss:$8 sps:$4 sm:$0xff]   ;;  %v6128_v17 = vld [vmem:[%s7325_s14 + $0x30] ss:$8 sps:$4 sm:$0xff]  }
 0x403   :  { %5506 = vmatmul.mubr.msk.bf16.vlgmr.msra.gmra.mrb[8].mxu1 %vm2825_vm2, %v2816_v19  ;;  %v6131_v19 = vld [vmem:[%s7325_s14 + $0x40] ss:$8 sps:$4 sm:$0xff]  }
 0x404   :  { %2989 = vmatpush1.bf16.msra.mxu1 %v6071_v20  ;;  %3020 = vmatprep.mubr.bf16.mxu1 %v6756_v34  ;;  %v6136_v20 = vld [vmem:[%s7325_s14 + $0x54] ss:$8 sps:$4 sm:$0xff]  }
 0x405   :  { %2990 = vmatprep.subr.bf16.mxu1 %v6076_v21  ;;  %v6134_v21 = vld [vmem:[%s7325_s14 + $0x50] ss:$8 sps:$4 sm:$0xff]  }
 0x408   :  { %2991 = vmatpush1.bf16.msra.mxu1 %v6074_v11  ;;  %v6139_v11 = vld [vmem:[%s7325_s14 + $0x64] ss:$8 sps:$4 sm:$0xff]  }
 0x409   :  { %2992 = vmatprep.subr.bf16.mxu1 %v6079_v22  ;;  %v6137_v22 = vld [vmem:[%s7325_s14 + $0x60] ss:$8 sps:$4 sm:$0xff]  }
 0x40c   :  { %2993 = vmatpush1.bf16.msra.mxu1 %v6077_v13  ;;  %v6142_v13 = vld [vmem:[%s7325_s14 + $0x74] ss:$8 sps:$4 sm:$0xff]  }
 0x40d   :  { %2994 = vmatprep.subr.bf16.mxu1 %v6082_v23  ;;  %v6140_v23 = vld [vmem:[%s7325_s14 + $0x70] ss:$8 sps:$4 sm:$0xff]  }
 0x410   :  { %2995 = vmatpush1.bf16.msra.mxu1 %v6080_v24  ;;  %v6145_v24 = vld [vmem:[%s7325_s14 + $0x84] ss:$8 sps:$4 sm:$0xff]  }
 0x411   :  { %2996 = vmatprep.subr.bf16.mxu1 %v6085_v25  ;;  %v6143_v25 = vld [vmem:[%s7325_s14 + $0x80] ss:$8 sps:$4 sm:$0xff]  }
 0x414   :  { %2997 = vmatpush1.bf16.msra.mxu1 %v6083_v26  ;;  %v6148_v26 = vld [vmem:[%s7325_s14 + $0x94] ss:$8 sps:$4 sm:$0xff]  }
 0x415   :  { %2998 = vmatprep.subr.bf16.mxu1 %v6088_v27  ;;  %v6146_v27 = vld [vmem:[%s7325_s14 + $0x90] ss:$8 sps:$4 sm:$0xff]  }
 0x418   :  { %2999 = vmatpush1.bf16.msra.mxu1 %v6086_v28  ;;  %v6151_v28 = vld [vmem:[%s7325_s14 + $0xa4] ss:$8 sps:$4 sm:$0xff]  }
 0x419   :  { %3000 = vmatprep.subr.bf16.mxu1 %v6091_v29  ;;  %v6149_v29 = vld [vmem:[%s7325_s14 + $0xa0] ss:$8 sps:$4 sm:$0xff]  }
 0x41c   :  { %3001 = vmatpush1.bf16.msra.mxu1 %v6089_v30  ;;  %v6154_v30 = vld [vmem:[%s7325_s14 + $0xb4] ss:$8 sps:$4 sm:$0xff]  }
 0x41d   :  { %3002 = vmatprep.subr.bf16.mxu1 %v6094_v31  ;;  %v6152_v31 = vld [vmem:[%s7325_s14 + $0xb0] ss:$8 sps:$4 sm:$0xff]  }
 0x420   :  { %3003 = vmatpush1.bf16.msra.mxu1 %v6092_v32  ;;  %v6157_v32 = vld [vmem:[%s7325_s14 + $0xc4] ss:$8 sps:$4 sm:$0xff]  }
 0x421   :  { %3109 = vmatprep.subr.bf16.mxu1 %v6097_v33  ;;  %v6155_v33 = vld [vmem:[%s7325_s14 + $0xc0] ss:$8 sps:$4 sm:$0xff]  }
 0x4ce   :  { %v5473_v35 = vpop.f32.mrb[4].mxu1 }
 0x4cf   :  { %v5474_v36 = vpop.f32.mrb[5].mxu1 }
 0x4d0   :  { %v5475_v37 = vadd.f32 %v5474_v36, %v5473_v35  ;;  %v5476_v38 = vpop.f32.mrb[6].mxu1  ;;  %v6158_v35 = vld [vmem:[%s7325_s14 + $0xd0] ss:$8 sps:$4 sm:$0xff]   ;;  %v6163_v36 = vld [vmem:[%s7325_s14 + $0xe4] ss:$8 sps:$4 sm:$0xff]  }
 0x4d1   :  { %v5477_v39 = vpop.f32.mrb[7].mxu1  ;;  %v6166_v38 = vld [vmem:[%s7325_s14 + $0xf4] ss:$8 sps:$4 sm:$0xff]  }
 0x4d2   :  { %v2809_v3 = vadd.f32 %v5475_v37, %v5194_v1  ;;  %v6161_v37 = vld [vmem:[%s7325_s14 + $0xe0] ss:$8 sps:$4 sm:$0xff]   ;;  %v6164_v39 = vld [vmem:[%s7325_s14 + $0xf0] ss:$8 sps:$4 sm:$0xff]  }
 0x4d4   :  { %v2814_v6 = vmax.f32 %v2809_v3, 0.0 }
 0x4d6   :  { %v2867_v41 = vpop.f32.mrb[8].mxu1  ;;  %v2874_v9 = vpack.c.bf16 %v2814_v6, %v2814_v6  ;;  %v6178_v6 = vld [vmem:[%s7327_s16 + $0x34] ss:$8 sps:$4 sm:$0xff]  }
 0x4d7   :  { %v2868_v42 = vadd.f32 %v5211_v40, %v2867_v41  ;;  %v5507_v43 = vpop.f32.mrb[9].mxu1  ;;  %v6167_v40 = vld [vmem:[%s7327_s16] ss:$8 sps:$4 sm:$0xff]   ;;  %v6169_v41 = vld [vmem:[%s7327_s16 + $0x4] ss:$8 sps:$4 sm:$0xff]  }
 0x4d8   :  { %v2870_v45 = vpop.f32.mrb[10].mxu1  ;;  %3528 = vmatprep.subr.bf16.mxu0 %v6169_v41  ;;  %v6170_v43 = vld [vmem:[%s7327_s16 + $0x10] ss:$8 sps:$4 sm:$0xff]   ;;  %v6268_v41 = vld [vmem:[#allocation19 + $0x36c] ss:$36 sps:$4 sm:$0xff]  }
 0x4d9   :  { %v2873_v46 = vmax.f32 %v2868_v42, 0.0  ;;  %v5508_v47 = vpop.f32.mrb[11].mxu1  ;;  %v6172_v42 = vld [vmem:[%s7327_s16 + $0x14] ss:$8 sps:$4 sm:$0xff]   ;;  %3529 = vmatpush1.bf16.msra.mxu0 %v6167_v40 }
 0x4da   :  { %3530 = vmatprep.subr.bf16.mxu0 %v6172_v42  ;;  %v6260_v40 = vld [vmem:[#allocation19 + $0x320] ss:$36 sps:$4 sm:$0xff]   ;;  %v6266_v42 = vld [vmem:[#allocation19 + $0x368] ss:$36 sps:$4 sm:$0xff]  }
 0x4db   :  { %v2891_v49 = vpack.c.bf16 %v2873_v46, %v2873_v46 }
 0x4dd   :  { %3021 = vmatmul.mubr.bf16.vlgmr.msra.gmra.mrb[12].mxu1 %v2891_v49  ;;  %3531 = vmatpush1.bf16.msra.mxu0 %v6170_v43  ;;  %v3150_v49 = vld [vmem:[#allocation15] sm:$0x3] }
 0x4de   :  { %3110 = vmatpush1.bf16.msra.mxu1 %v6095_v48  ;;  %3141 = vmatprep.mubr.bf16.mxu1 %v6756_v34  ;;  %v6160_v34 = vld [vmem:[%s7325_s14 + $0xd4] ss:$8 sps:$4 sm:$0xff]   ;;  %v6274_v43 = vld [vmem:[#allocation19 + $0x3b4] ss:$36 sps:$4 sm:$0xff]  }
 0x4df   :  { %3111 = vmatprep.subr.bf16.mxu1 %v6100_v50  ;;  %v3155_v50 = vrot.slane %v3150_v49, %v7077_v59 }
 0x4e2   :  { %3112 = vmatpush1.bf16.msra.mxu1 %v6098_v51 }
 0x4e3   :  { %3113 = vmatprep.subr.bf16.mxu1 %v6103_v52  ;;  %v3159_v52 = vrot.slane %v3150_v49, %v7082_v61 }
 0x4e6   :  { %3114 = vmatpush1.bf16.msra.mxu1 %v6101_v53 }
 0x4e7   :  { %3115 = vmatprep.subr.bf16.mxu1 %v6106_v54 }
 0x4ea   :  { %3116 = vmatpush1.bf16.msra.mxu1 %v6104_v55 }
 0x4eb   :  { %3117 = vmatprep.subr.bf16.mxu1 %v6109_v56 }
 0x4ee   :  { %3118 = vmatpush1.bf16.msra.mxu1 %v6107_v57 }
 0x4ef   :  { %3119 = vmatprep.subr.bf16.mxu1 %v6112_v60 }
 0x4f2   :  { %3120 = vmatpush1.bf16.msra.mxu1 %v6110_v63 }
 0x4f3   :  { %3121 = vmatprep.subr.bf16.mxu1 %v6115_v0 }
 0x4f6   :  { %3122 = vmatpush1.bf16.msra.mxu1 %v6113_v2 }
 0x4f7   :  { %3123 = vmatprep.subr.bf16.mxu1 %v6118_v4  ;;  %v6175_v4 = vld [vmem:[%s7327_s16 + $0x24] ss:$8 sps:$4 sm:$0xff]  }
 0x4f8   :  { %3532 = vmatprep.subr.bf16.mxu0 %v6175_v4 }
 0x4fa   :  { %3124 = vmatpush1.bf16.msra.mxu1 %v6116_v5  ;;  %v6173_v5 = vld [vmem:[%s7327_s16 + $0x20] ss:$8 sps:$4 sm:$0xff]  }
 0x4fb   :  { %3372 = vmatprep.subr.bf16.mxu1 %v6121_v7  ;;  %3533 = vmatpush1.bf16.msra.mxu0 %v6173_v5  ;;  %v6176_v7 = vld [vmem:[%s7327_s16 + $0x30] ss:$8 sps:$4 sm:$0xff]   ;;  %v6199_v5 = vld [vmem:[#allocation19 + $0x4c] ss:$36 sps:$4 sm:$0xff]  }
 0x4fc   :  { %3534 = vmatprep.subr.bf16.mxu0 %v6178_v6  ;;  %v6197_v6 = vld [vmem:[#allocation19 + $0x48] ss:$36 sps:$4 sm:$0xff]  }
 0x4fd   :  { %3142 = vmatmul.mubr.bf16.vlgmr.msra.gmra.mrb[16].mxu1 %v2874_v9  ;;  %v6179_v9 = vld [vmem:[%s7327_s16 + $0x40] ss:$8 sps:$4 sm:$0xff]  }
 0x4fe   :  { %3373 = vmatpush1.bf16.msra.mxu1 %v6119_v8  ;;  %v6181_v8 = vld [vmem:[%s7327_s16 + $0x44] ss:$8 sps:$4 sm:$0xff]  }
 0x4ff   :  { %3374 = vmatprep.subr.bf16.mxu1 %v6124_v10  ;;  %3535 = vmatpush1.bf16.msra.mxu0 %v6176_v7  ;;  %v6184_v10 = vld [vmem:[%s7327_s16 + $0x54] ss:$8 sps:$4 sm:$0xff]   ;;  %v6205_v7 = vld [vmem:[#allocation19 + $0x94] ss:$36 sps:$4 sm:$0xff]  }
 0x500   :  { %3536 = vmatprep.subr.bf16.mxu0 %v6181_v8  ;;  %v6203_v8 = vld [vmem:[#allocation19 + $0x90] ss:$36 sps:$4 sm:$0xff]  }
 0x502   :  { %3375 = vmatpush1.bf16.msra.mxu1 %v6122_v12  ;;  %v6182_v12 = vld [vmem:[%s7327_s16 + $0x50] ss:$8 sps:$4 sm:$0xff]  }
 0x503   :  { %3376 = vmatprep.subr.bf16.mxu1 %v6127_v14  ;;  %3537 = vmatpush1.bf16.msra.mxu0 %v6179_v9  ;;  %v6187_v14 = vld [vmem:[%s7327_s16 + $0x64] ss:$8 sps:$4 sm:$0xff]  }
 0x504   :  { %3538 = vmatprep.subr.bf16.mxu0 %v6184_v10  ;;  %v6211_v9 = vld [vmem:[#allocation19 + $0xdc] ss:$36 sps:$4 sm:$0xff]  }
 0x505   :  { %v6209_v10 = vld [vmem:[#allocation19 + $0xd8] ss:$36 sps:$4 sm:$0xff]  }
 0x506   :  { %3377 = vmatpush1.bf16.msra.mxu1 %v6125_v15  ;;  %v6185_v15 = vld [vmem:[%s7327_s16 + $0x60] ss:$8 sps:$4 sm:$0xff]  }
 0x507   :  { %3378 = vmatprep.subr.bf16.mxu1 %v6130_v16  ;;  %3539 = vmatpush1.bf16.msra.mxu0 %v6182_v12  ;;  %v6190_v16 = vld [vmem:[%s7327_s16 + $0x74] ss:$8 sps:$4 sm:$0xff]  }
 0x508   :  { %3540 = vmatprep.subr.bf16.mxu0 %v6187_v14  ;;  %v6217_v12 = vld [vmem:[#allocation19 + $0x124] ss:$36 sps:$4 sm:$0xff]  }
 0x509   :  { %v6215_v14 = vld [vmem:[#allocation19 + $0x120] ss:$36 sps:$4 sm:$0xff]  }
 0x50a   :  { %3379 = vmatpush1.bf16.msra.mxu1 %v6128_v17  ;;  %v6188_v17 = vld [vmem:[%s7327_s16 + $0x70] ss:$8 sps:$4 sm:$0xff]  }
 0x50b   :  { %3380 = vmatprep.subr.bf16.mxu1 %v6133_v18  ;;  %3541 = vmatpush1.bf16.msra.mxu0 %v6185_v15  ;;  %v6193_v18 = vld [vmem:[#allocation19 + $0x4] ss:$36 sps:$4 sm:$0xff]   ;;  %v6223_v15 = vld [vmem:[#allocation19 + $0x16c] ss:$36 sps:$4 sm:$0xff]  }
 0x50c   :  { %3542 = vmatprep.subr.bf16.mxu0 %v6190_v16  ;;  %v6221_v16 = vld [vmem:[#allocation19 + $0x168] ss:$36 sps:$4 sm:$0xff]  }
 0x50e   :  { %3381 = vmatpush1.bf16.msra.mxu1 %v6131_v19  ;;  %v6194_v19 = vld [vmem:[#allocation19 + $0x8] ss:$36 sps:$4 sm:$0xff]  }
 0x50f   :  { %3382 = vmatprep.subr.bf16.mxu1 %v6136_v20  ;;  %3543 = vmatpush1.bf16.msra.mxu0 %v6188_v17  ;;  %v6196_v20 = vld [vmem:[#allocation19 + $0xc] ss:$36 sps:$4 sm:$0xff]   ;;  %v6229_v17 = vld [vmem:[#allocation19 + $0x1b4] ss:$36 sps:$4 sm:$0xff]  }
 0x510   :  { %4516 = vmatprep.subr.bf16.mxu0 %v6193_v18  ;;  %v6227_v18 = vld [vmem:[#allocation19 + $0x1b0] ss:$36 sps:$4 sm:$0xff]  }
 0x512   :  { %3383 = vmatpush1.bf16.msra.mxu1 %v6134_v21  ;;  %v6202_v21 = vld [vmem:[#allocation19 + $0x54] ss:$36 sps:$4 sm:$0xff]  }
 0x513   :  { %3384 = vmatprep.subr.bf16.mxu1 %v6139_v11  ;;  %v6200_v11 = vld [vmem:[#allocation19 + $0x50] ss:$36 sps:$4 sm:$0xff]  }
 0x516   :  { %3385 = vmatpush1.bf16.msra.mxu1 %v6137_v22  ;;  %v6208_v22 = vld [vmem:[#allocation19 + $0x9c] ss:$36 sps:$4 sm:$0xff]  }
 0x517   :  { %3386 = vmatprep.subr.bf16.mxu1 %v6142_v13  ;;  %v6206_v13 = vld [vmem:[#allocation19 + $0x98] ss:$36 sps:$4 sm:$0xff]  }
 0x51a   :  { %3387 = vmatpush1.bf16.msra.mxu1 %v6140_v23  ;;  %v6214_v23 = vld [vmem:[#allocation19 + $0xe4] ss:$36 sps:$4 sm:$0xff]  }
 0x51b   :  { %3388 = vmatprep.subr.bf16.mxu1 %v6145_v24  ;;  %v6212_v24 = vld [vmem:[#allocation19 + $0xe0] ss:$36 sps:$4 sm:$0xff]  }
 0x51e   :  { %3389 = vmatpush1.bf16.msra.mxu1 %v6143_v25  ;;  %v6220_v25 = vld [vmem:[#allocation19 + $0x12c] ss:$36 sps:$4 sm:$0xff]  }
 0x51f   :  { %3390 = vmatprep.subr.bf16.mxu1 %v6148_v26  ;;  %v6218_v26 = vld [vmem:[#allocation19 + $0x128] ss:$36 sps:$4 sm:$0xff]  }
 0x522   :  { %3391 = vmatpush1.bf16.msra.mxu1 %v6146_v27  ;;  %v6226_v27 = vld [vmem:[#allocation19 + $0x174] ss:$36 sps:$4 sm:$0xff]  }
 0x523   :  { %3392 = vmatprep.subr.bf16.mxu1 %v6151_v28  ;;  %v6224_v28 = vld [vmem:[#allocation19 + $0x170] ss:$36 sps:$4 sm:$0xff]  }
 0x526   :  { %3393 = vmatpush1.bf16.msra.mxu1 %v6149_v29  ;;  %v6232_v29 = vld [vmem:[#allocation19 + $0x1bc] ss:$36 sps:$4 sm:$0xff]  }
 0x527   :  { %3394 = vmatprep.subr.bf16.mxu1 %v6154_v30  ;;  %v6230_v30 = vld [vmem:[#allocation19 + $0x1b8] ss:$36 sps:$4 sm:$0xff]  }
 0x52a   :  { %3395 = vmatpush1.bf16.msra.mxu1 %v6152_v31  ;;  %v6238_v31 = vld [vmem:[#allocation19 + $0x204] ss:$36 sps:$4 sm:$0xff]  }
 0x52b   :  { %3396 = vmatprep.subr.bf16.mxu1 %v6157_v32  ;;  %v6236_v32 = vld [vmem:[#allocation19 + $0x200] ss:$36 sps:$4 sm:$0xff]  }
 0x52e   :  { %3397 = vmatpush1.bf16.msra.mxu1 %v6155_v33  ;;  %v6244_v33 = vld [vmem:[#allocation19 + $0x24c] ss:$36 sps:$4 sm:$0xff]  }
 0x52f   :  { %3398 = vmatprep.subr.bf16.mxu1 %v6160_v34  ;;  %v6242_v34 = vld [vmem:[#allocation19 + $0x248] ss:$36 sps:$4 sm:$0xff]  }
 0x532   :  { %3399 = vmatpush1.bf16.msra.mxu1 %v6158_v35  ;;  %v6250_v35 = vld [vmem:[#allocation19 + $0x294] ss:$36 sps:$4 sm:$0xff]  }
 0x533   :  { %3400 = vmatprep.subr.bf16.mxu1 %v6163_v36  ;;  %v6248_v36 = vld [vmem:[#allocation19 + $0x290] ss:$36 sps:$4 sm:$0xff]  }
 0x536   :  { %3401 = vmatpush1.bf16.msra.mxu1 %v6161_v37  ;;  %v6256_v37 = vld [vmem:[#allocation19 + $0x2dc] ss:$36 sps:$4 sm:$0xff]  }
 0x537   :  { %3402 = vmatprep.subr.bf16.mxu1 %v6166_v38  ;;  %v6254_v38 = vld [vmem:[#allocation19 + $0x2d8] ss:$36 sps:$4 sm:$0xff]  }
 0x53a   :  { %3403 = vmatpush1.bf16.msra.mxu1 %v6164_v39  ;;  %v6262_v39 = vld [vmem:[#allocation19 + $0x324] ss:$36 sps:$4 sm:$0xff]  }
 0x53b   :  { %4557 = vmatprep.subr.bf16.mxu1 %v6196_v20  ;;  %v6233_v20 = vld [vmem:[#allocation19 + $0x1f8] ss:$36 sps:$4 sm:$0xff]  }
 0x5b0   :  { %v3022_v45 = vpop.f32.mrb[12].mxu1 }
 0x5b1   :  { %v3024_v46 = vpop.f32.mrb[13].mxu1 }
 0x5b2   :  { %v3026_v47 = vpop.f32.mrb[14].mxu1 }
 0x5b3   :  { %v3027_v48 = vpop.f32.mrb[15].mxu1  ;;  %v6278_v47 = vld [vmem:[#allocation19 + $0x3f8] ss:$36 sps:$4 sm:$0xff]  }
 0x5b4   :  { %v3200_v48 = vld [vmem:[#allocation16] sm:$0x3] }
 0x5b5   :  { %v3205_v49 = vrot.slane %v3200_v48, %v7077_v59 }
 0x5d0   :  { %v3143_v51 = vpop.f32.mrb[16].mxu1 }
 0x5d1   :  { %v3144_v53 = vadd.f32 %v3143_v51, %v3022_v45  ;;  %v3145_v54 = vpop.f32.mrb[17].mxu1  ;;  %v6272_v45 = vld [vmem:[#allocation19 + $0x3b0] ss:$36 sps:$4 sm:$0xff]  }
 0x5d2   :  { %v3146_v55 = vadd.f32 %v3145_v54, %v3024_v46  ;;  %v3147_v56 = vpop.f32.mrb[18].mxu1  ;;  %v6280_v46 = vld [vmem:[#allocation19 + $0x3fc] ss:$36 sps:$4 sm:$0xff]  }
 0x5d3   :  { %v3162_v57 = vadd.f32 %v3155_v50, %v3144_v53  ;;  %v3148_v60 = vpop.f32.mrb[19].mxu1  ;;  %v3209_v50 = vrot.slane %v3200_v48, %v7082_v61 }
 0x5d4   :  { %v3163_v63 = vadd.f32 %v3159_v52, %v3146_v55 }
 0x5d5   :  { %v3164_v0 = vmax.f32 %v3162_v57, 0.0 }
 0x5d6   :  { %v3165_v1 = vmax.f32 %v3163_v63, 0.0  ;;  %v3416_v63 = vld [vmem:[%s7351_s3] sm:$0xff] }
 0x5d7   :  { %v3166_v3 = vpack.c.bf16 %v3164_v0, %v3164_v0 }
 0x5d8   :  { %v3167_v2 = vpack.c.bf16 %v3165_v1, %v3165_v1 }
 0x5da   :  { %3404 = vmatprep.mubr.bf16.mxu1 %v3167_v2 }
 0x5db   :  { %3405 = vmatmul.mubr.bf16.vlgmr.msra.gmra.mrb[20].mxu1 %v3166_v3  ;;  %v6191_v3 = vld [vmem:[#allocation19] ss:$36 sps:$4 sm:$0xff]  }
 0x5dc   :  { %4558 = vmatpush1.bf16.msra.mxu1 %v6194_v19  ;;  %v6235_v19 = vld [vmem:[#allocation19 + $0x1fc] ss:$36 sps:$4 sm:$0xff]  }
 0x5dd   :  { %4559 = vmatprep.subr.bf16.mxu1 %v6202_v21  ;;  %v6241_v21 = vld [vmem:[#allocation19 + $0x244] ss:$36 sps:$4 sm:$0xff]  }
 0x5e0   :  { %4560 = vmatpush1.bf16.msra.mxu1 %v6200_v11  ;;  %v6239_v11 = vld [vmem:[#allocation19 + $0x240] ss:$36 sps:$4 sm:$0xff]  }
 0x5e1   :  { %4561 = vmatprep.subr.bf16.mxu1 %v6208_v22  ;;  %v6247_v22 = vld [vmem:[#allocation19 + $0x28c] ss:$36 sps:$4 sm:$0xff]  }
 0x5e4   :  { %4562 = vmatpush1.bf16.msra.mxu1 %v6206_v13  ;;  %v6245_v13 = vld [vmem:[#allocation19 + $0x288] ss:$36 sps:$4 sm:$0xff]  }
 0x5e5   :  { %4563 = vmatprep.subr.bf16.mxu1 %v6214_v23  ;;  %v6253_v23 = vld [vmem:[#allocation19 + $0x2d4] ss:$36 sps:$4 sm:$0xff]  }
 0x5e8   :  { %4564 = vmatpush1.bf16.msra.mxu1 %v6212_v24  ;;  %v6251_v24 = vld [vmem:[#allocation19 + $0x2d0] ss:$36 sps:$4 sm:$0xff]  }
 0x5e9   :  { %4565 = vmatprep.subr.bf16.mxu1 %v6220_v25  ;;  %v6259_v25 = vld [vmem:[#allocation19 + $0x31c] ss:$36 sps:$4 sm:$0xff]  }
 0x5ec   :  { %4566 = vmatpush1.bf16.msra.mxu1 %v6218_v26  ;;  %v6257_v26 = vld [vmem:[#allocation19 + $0x318] ss:$36 sps:$4 sm:$0xff]  }
 0x5ed   :  { %4567 = vmatprep.subr.bf16.mxu1 %v6226_v27  ;;  %v6265_v27 = vld [vmem:[#allocation19 + $0x364] ss:$36 sps:$4 sm:$0xff]  }
 0x5f0   :  { %4568 = vmatpush1.bf16.msra.mxu1 %v6224_v28  ;;  %v6263_v28 = vld [vmem:[#allocation19 + $0x360] ss:$36 sps:$4 sm:$0xff]  }
 0x5f1   :  { %4569 = vmatprep.subr.bf16.mxu1 %v6232_v29  ;;  %v6271_v29 = vld [vmem:[#allocation19 + $0x3ac] ss:$36 sps:$4 sm:$0xff]  }
 0x5f4   :  { %4570 = vmatpush1.bf16.msra.mxu1 %v6230_v30  ;;  %v6269_v30 = vld [vmem:[#allocation19 + $0x3a8] ss:$36 sps:$4 sm:$0xff]  }
 0x5f5   :  { %4571 = vmatprep.subr.bf16.mxu1 %v6238_v31  ;;  %v6277_v31 = vld [vmem:[#allocation19 + $0x3f4] ss:$36 sps:$4 sm:$0xff]  }
 0x5f8   :  { %4572 = vmatpush1.bf16.msra.mxu1 %v6236_v32  ;;  %v6275_v32 = vld [vmem:[#allocation19 + $0x3f0] ss:$36 sps:$4 sm:$0xff]  }
 0x5f9   :  { %4573 = vmatprep.subr.bf16.mxu1 %v6244_v33  ;;  %v6283_v33 = vld [vmem:[#allocation19 + $0x43c] ss:$36 sps:$4 sm:$0xff]  }
 0x5fc   :  { %4574 = vmatpush1.bf16.msra.mxu1 %v6242_v34  ;;  %v6286_v34 = vld [vmem:[#allocation19 + $0x444] ss:$36 sps:$4 sm:$0xff]  }
 0x5fd   :  { %4575 = vmatprep.subr.bf16.mxu1 %v6250_v35  ;;  %v6281_v35 = vld [vmem:[#allocation19 + $0x438] ss:$36 sps:$4 sm:$0xff]  }
 0x600   :  { %4576 = vmatpush1.bf16.msra.mxu1 %v6248_v36  ;;  %v6284_v36 = vld [vmem:[#allocation19 + $0x440] ss:$36 sps:$4 sm:$0xff]  }
 0x601   :  { %4577 = vmatprep.subr.bf16.mxu1 %v6256_v37  ;;  %v6289_v37 = vld [vmem:[#allocation19 + $0x14] ss:$36 sps:$4 sm:$0xff]  }
 0x604   :  { %4578 = vmatpush1.bf16.msra.mxu1 %v6254_v38  ;;  %v6292_v38 = vld [vmem:[#allocation19 + $0x1c] ss:$36 sps:$4 sm:$0xff]  }
 0x605   :  { %4579 = vmatprep.subr.bf16.mxu1 %v6262_v39  ;;  %v3436_v39 = vld [vmem:[#allocation18] sm:$0x3] }
 0x608   :  { %4580 = vmatpush1.bf16.msra.mxu1 %v6260_v40  ;;  %v3441_v40 = vrot.slane %v3436_v39, %v7077_v59 }
 0x609   :  { %4581 = vmatprep.subr.bf16.mxu1 %v6268_v41  ;;  %v3445_v41 = vrot.slane %v3436_v39, %v7082_v61  ;;  %v6359_v39 = vld [vmem:[#allocation19 + $0x370] ss:$36 sps:$4 sm:$0xff]  }
 0x60c   :  { %4582 = vmatpush1.bf16.msra.mxu1 %v6266_v42 }
 0x60d   :  { %4583 = vmatprep.subr.bf16.mxu1 %v6274_v43 }
 0x610   :  { %4584 = vmatpush1.bf16.msra.mxu1 %v6272_v45 }
 0x611   :  { %4585 = vmatprep.subr.bf16.mxu1 %v6280_v46 }
 0x614   :  { %4586 = vmatpush1.bf16.msra.mxu1 %v6278_v47 }
 0x615   :  { %4587 = vmatprep.subr.bf16.mxu1 %v6286_v34  ;;  %v6358_v34 = vld [vmem:[#allocation19 + $0x334] ss:$36 sps:$4 sm:$0xff]  }
 0x618   :  { %4588 = vmatpush1.bf16.msra.mxu1 %v6284_v36  ;;  %v6356_v36 = vld [vmem:[#allocation19 + $0x330] ss:$36 sps:$4 sm:$0xff]  }
 0x619   :  { %4639 = vmatprep.subr.bf16.mxu1 %v6292_v38  ;;  %v6364_v38 = vld [vmem:[#allocation19 + $0x37c] ss:$36 sps:$4 sm:$0xff]  }
 0x6ae   :  { %v3406_v51 = vpop.f32.mrb[20].mxu1 }
 0x6af   :  { %v3407_v52 = vadd.f32 %v3406_v51, %v3205_v49  ;;  %v3408_v53 = vpop.f32.mrb[21].mxu1  ;;  %v6290_v51 = vld [vmem:[#allocation19 + $0x18] ss:$36 sps:$4 sm:$0xff]  }
 0x6b0   :  { %v3409_v54 = vadd.f32 %v3408_v53, %v3209_v50  ;;  %v3410_v55 = vpop.f32.mrb[22].mxu1  ;;  %v6287_v50 = vld [vmem:[#allocation19 + $0x10] ss:$36 sps:$4 sm:$0xff]   ;;  %v6295_v53 = vld [vmem:[#allocation19 + $0x5c] ss:$36 sps:$4 sm:$0xff]  }
 0x6b1   :  { %4802 = vst [vmem:[%s7331_s20] sm:$0xff] %v3407_v52  ;;  %v3411_v56 = vpop.f32.mrb[23].mxu1  ;;  %v6293_v55 = vld [vmem:[#allocation19 + $0x58] ss:$36 sps:$4 sm:$0xff]  }
 0x6b2   :  { %v3413_v57 = vmul.f32 0.5, %v3409_v54  ;;  %4803 = vst [vmem:[%s7331_s20 + $0x8] sm:$0xff] %v3409_v54  ;;  %v6298_v54 = vld [vmem:[#allocation19 + $0x64] ss:$36 sps:$4 sm:$0xff]  }
 0x6b3   :  { %v6296_v56 = vld [vmem:[#allocation19 + $0x60] ss:$36 sps:$4 sm:$0xff]  }
 0x6b4   :  { %v3414_v60 = vmul.f32 1.442695, %v3413_v57  ;;  %v6301_v57 = vld [vmem:[#allocation19 + $0xa4] ss:$36 sps:$4 sm:$0xff]  }
 0x6b6   :  { %6399 = vpow2.f32 %v3414_v60  ;;  %v6304_v60 = vld [vmem:[#allocation19 + $0xac] ss:$36 sps:$4 sm:$0xff]  }
 0x6c0   :  { %v6400_v0 = vpop.eup %6399 }
 0x6c1   :  { %v3417_v1 = vmul.f32 %v6400_v0, %v3416_v63  ;;  %v6299_v63 = vld [vmem:[#allocation19 + $0xa0] ss:$36 sps:$4 sm:$0xff]   ;;  %v6302_v0 = vld [vmem:[#allocation19 + $0xa8] ss:$36 sps:$4 sm:$0xff]  }
 0x6c3   :  { %v3418_v2 = vadd.f32 %v3417_v1, %v3407_v52  ;;  %v6307_v1 = vld [vmem:[#allocation19 + $0xec] ss:$36 sps:$4 sm:$0xff]  }
 0x6c5   :  { %v3419_v4 = vpack.c.bf16 %v3418_v2, %v3418_v2  ;;  %4804 = vst [vmem:[%s7332_s21] sm:$0xff] %v3418_v2  ;;  %v6310_v2 = vld [vmem:[#allocation19 + $0xf4] ss:$36 sps:$4 sm:$0xff]  }
 0x6c7   :  { %3561 = vmatmul.mubr.bf16.vlgmr.msra.gmra.mrb[8].mxu0 %v3419_v4  ;;  %v6308_v4 = vld [vmem:[#allocation19 + $0xf0] ss:$36 sps:$4 sm:$0xff]  }
 0x6c8   :  { %4517 = vmatpush1.bf16.msra.mxu0 %v6191_v3  ;;  %v6305_v3 = vld [vmem:[#allocation19 + $0xe8] ss:$36 sps:$4 sm:$0xff]  }
 0x6c9   :  { %4518 = vmatprep.subr.bf16.mxu0 %v6199_v5  ;;  %v6313_v5 = vld [vmem:[#allocation19 + $0x134] ss:$36 sps:$4 sm:$0xff]  }
 0x6cc   :  { %4519 = vmatpush1.bf16.msra.mxu0 %v6197_v6  ;;  %v6316_v6 = vld [vmem:[#allocation19 + $0x13c] ss:$36 sps:$4 sm:$0xff]  }
 0x6cd   :  { %4520 = vmatprep.subr.bf16.mxu0 %v6205_v7  ;;  %v6311_v7 = vld [vmem:[#allocation19 + $0x130] ss:$36 sps:$4 sm:$0xff]  }
 0x6d0   :  { %4521 = vmatpush1.bf16.msra.mxu0 %v6203_v8  ;;  %v6314_v8 = vld [vmem:[#allocation19 + $0x138] ss:$36 sps:$4 sm:$0xff]  }
 0x6d1   :  { %4522 = vmatprep.subr.bf16.mxu0 %v6211_v9  ;;  %v6319_v9 = vld [vmem:[#allocation19 + $0x17c] ss:$36 sps:$4 sm:$0xff]  }
 0x6d4   :  { %4523 = vmatpush1.bf16.msra.mxu0 %v6209_v10  ;;  %v6322_v10 = vld [vmem:[#allocation19 + $0x184] ss:$36 sps:$4 sm:$0xff]  }
 0x6d5   :  { %4524 = vmatprep.subr.bf16.mxu0 %v6217_v12  ;;  %v6317_v12 = vld [vmem:[#allocation19 + $0x178] ss:$36 sps:$4 sm:$0xff]  }
 0x6d8   :  { %4525 = vmatpush1.bf16.msra.mxu0 %v6215_v14  ;;  %v6320_v14 = vld [vmem:[#allocation19 + $0x180] ss:$36 sps:$4 sm:$0xff]  }
 0x6d9   :  { %4526 = vmatprep.subr.bf16.mxu0 %v6223_v15  ;;  %v6325_v15 = vld [vmem:[#allocation19 + $0x1c4] ss:$36 sps:$4 sm:$0xff]  }
 0x6dc   :  { %4527 = vmatpush1.bf16.msra.mxu0 %v6221_v16  ;;  %v6328_v16 = vld [vmem:[#allocation19 + $0x1cc] ss:$36 sps:$4 sm:$0xff]  }
 0x6dd   :  { %4528 = vmatprep.subr.bf16.mxu0 %v6229_v17  ;;  %v6323_v17 = vld [vmem:[#allocation19 + $0x1c0] ss:$36 sps:$4 sm:$0xff]  }
 0x6e0   :  { %4529 = vmatpush1.bf16.msra.mxu0 %v6227_v18  ;;  %v6326_v18 = vld [vmem:[#allocation19 + $0x1c8] ss:$36 sps:$4 sm:$0xff]  }
 0x6e1   :  { %4530 = vmatprep.subr.bf16.mxu0 %v6235_v19  ;;  %v6331_v19 = vld [vmem:[#allocation19 + $0x20c] ss:$36 sps:$4 sm:$0xff]  }
 0x6e4   :  { %4531 = vmatpush1.bf16.msra.mxu0 %v6233_v20  ;;  %v6334_v20 = vld [vmem:[#allocation19 + $0x214] ss:$36 sps:$4 sm:$0xff]  }
 0x6e5   :  { %4532 = vmatprep.subr.bf16.mxu0 %v6241_v21  ;;  %v6329_v21 = vld [vmem:[#allocation19 + $0x208] ss:$36 sps:$4 sm:$0xff]  }
 0x6e8   :  { %4533 = vmatpush1.bf16.msra.mxu0 %v6239_v11  ;;  %v6332_v11 = vld [vmem:[#allocation19 + $0x210] ss:$36 sps:$4 sm:$0xff]  }
 0x6e9   :  { %4534 = vmatprep.subr.bf16.mxu0 %v6247_v22  ;;  %v6337_v22 = vld [vmem:[#allocation19 + $0x254] ss:$36 sps:$4 sm:$0xff]  }
 0x6ec   :  { %4535 = vmatpush1.bf16.msra.mxu0 %v6245_v13  ;;  %v6340_v13 = vld [vmem:[#allocation19 + $0x25c] ss:$36 sps:$4 sm:$0xff]  }
 0x6ed   :  { %4536 = vmatprep.subr.bf16.mxu0 %v6253_v23  ;;  %v6335_v23 = vld [vmem:[#allocation19 + $0x250] ss:$36 sps:$4 sm:$0xff]  }
 0x6f0   :  { %4537 = vmatpush1.bf16.msra.mxu0 %v6251_v24  ;;  %v6338_v24 = vld [vmem:[#allocation19 + $0x258] ss:$36 sps:$4 sm:$0xff]  }
 0x6f1   :  { %4538 = vmatprep.subr.bf16.mxu0 %v6259_v25  ;;  %v6343_v25 = vld [vmem:[#allocation19 + $0x29c] ss:$36 sps:$4 sm:$0xff]  }
 0x6f4   :  { %4539 = vmatpush1.bf16.msra.mxu0 %v6257_v26  ;;  %v6346_v26 = vld [vmem:[#allocation19 + $0x2a4] ss:$36 sps:$4 sm:$0xff]  }
 0x6f5   :  { %4540 = vmatprep.subr.bf16.mxu0 %v6265_v27  ;;  %v6341_v27 = vld [vmem:[#allocation19 + $0x298] ss:$36 sps:$4 sm:$0xff]  }
 0x6f8   :  { %4541 = vmatpush1.bf16.msra.mxu0 %v6263_v28  ;;  %v6344_v28 = vld [vmem:[#allocation19 + $0x2a0] ss:$36 sps:$4 sm:$0xff]  }
 0x6f9   :  { %4542 = vmatprep.subr.bf16.mxu0 %v6271_v29  ;;  %v6349_v29 = vld [vmem:[#allocation19 + $0x2e4] ss:$36 sps:$4 sm:$0xff]  }
 0x6fc   :  { %4543 = vmatpush1.bf16.msra.mxu0 %v6269_v30  ;;  %v6352_v30 = vld [vmem:[#allocation19 + $0x2ec] ss:$36 sps:$4 sm:$0xff]  }
 0x6fd   :  { %4544 = vmatprep.subr.bf16.mxu0 %v6277_v31  ;;  %v6347_v31 = vld [vmem:[#allocation19 + $0x2e0] ss:$36 sps:$4 sm:$0xff]  }
 0x700   :  { %4545 = vmatpush1.bf16.msra.mxu0 %v6275_v32  ;;  %v6350_v32 = vld [vmem:[#allocation19 + $0x2e8] ss:$36 sps:$4 sm:$0xff]  }
 0x701   :  { %4546 = vmatprep.subr.bf16.mxu0 %v6283_v33  ;;  %v6355_v33 = vld [vmem:[#allocation19 + $0x32c] ss:$36 sps:$4 sm:$0xff]  }
 0x704   :  { %4547 = vmatpush1.bf16.msra.mxu0 %v6281_v35  ;;  %v6353_v35 = vld [vmem:[#allocation19 + $0x328] ss:$36 sps:$4 sm:$0xff]  }
 0x705   :  { %4598 = vmatprep.subr.bf16.mxu0 %v6289_v37  ;;  %v6361_v37 = vld [vmem:[#allocation19 + $0x374] ss:$36 sps:$4 sm:$0xff]  }
 0x79a   :  { %v3562_v42 = vpop.f32.mrb[8].mxu0 }
 0x79b   :  { %v3563_v43 = vadd.f32 %v3562_v42, %v3441_v40  ;;  %v3564_v45 = vpop.f32.mrb[9].mxu0  ;;  %v6362_v40 = vld [vmem:[#allocation19 + $0x378] ss:$36 sps:$4 sm:$0xff]   ;;  %v6370_v42 = vld [vmem:[#allocation19 + $0x3c4] ss:$36 sps:$4 sm:$0xff]  }
 0x79c   :  { %v3565_v46 = vadd.f32 %v3564_v45, %v3445_v41  ;;  %v3566_v47 = vpop.f32.mrb[10].mxu0  ;;  %v6367_v41 = vld [vmem:[#allocation19 + $0x3bc] ss:$36 sps:$4 sm:$0xff]  }
 0x79d   :  { %v3567_v48 = vpop.f32.mrb[11].mxu0  ;;  %v7274_v52 = vpack.c.bf16 %v3563_v43, %v3563_v43  ;;  %v6365_v43 = vld [vmem:[#allocation19 + $0x3b8] ss:$36 sps:$4 sm:$0xff]   ;;  %v6368_v45 = vld [vmem:[#allocation19 + $0x3c0] ss:$36 sps:$4 sm:$0xff]  }
 0x79e   :  { %v7272_v49 = vpack.c.bf16 %v3565_v46, %v3565_v46  ;;  %v6373_v46 = vld [vmem:[#allocation19 + $0x404] ss:$36 sps:$4 sm:$0xff]   ;;  %v6376_v47 = vld [vmem:[#allocation19 + $0x40c] ss:$36 sps:$4 sm:$0xff]  }
 0x79f   :  { %v6371_v48 = vld [vmem:[#allocation19 + $0x400] ss:$36 sps:$4 sm:$0xff]  }
 0x7a0   :  { %4548 = vmatprep.mubr.bf16.mxu0 %v7272_v49  ;;  %4589 = vmatprep.mubr.bf16.mxu1 %v7272_v49 }
 0x7a1   :  { %4549 = vmatmul.mubr.bf16.vlgmr.msra.gmra.mrb[12].mxu0 %v7274_v52  ;;  %4590 = vmatmul.mubr.bf16.vlgmr.msra.gmra.mrb[24].mxu1 %v7274_v52 }
 0x7a2   :  { %4599 = vmatpush1.bf16.msra.mxu0 %v6287_v50  ;;  %4640 = vmatpush1.bf16.msra.mxu1 %v6290_v51  ;;  %v6374_v50 = vld [vmem:[#allocation19 + $0x408] ss:$36 sps:$4 sm:$0xff]  }
 0x7a3   :  { %4630 = vmatprep.mubr.bf16.mxu0 %v7272_v49  ;;  %4671 = vmatprep.mubr.bf16.mxu1 %v7272_v49  ;;  %v6379_v51 = vld [vmem:[#allocation19 + $0x44c] ss:$36 sps:$4 sm:$0xff]  }
 0x7a4   :  { %4600 = vmatprep.subr.bf16.mxu0 %v6295_v53  ;;  %4641 = vmatprep.subr.bf16.mxu1 %v6298_v54  ;;  %v6382_v53 = vld [vmem:[#allocation19 + $0x454] ss:$36 sps:$4 sm:$0xff]   ;;  %v6377_v54 = vld [vmem:[#allocation19 + $0x448] ss:$36 sps:$4 sm:$0xff]  }
 0x7a6   :  { %4601 = vmatpush1.bf16.msra.mxu0 %v6293_v55  ;;  %4642 = vmatpush1.bf16.msra.mxu1 %v6296_v56  ;;  %v6380_v55 = vld [vmem:[#allocation19 + $0x450] ss:$36 sps:$4 sm:$0xff]   ;;  %v6383_v56 = vld [vmem:[#allocation19 + $0x260] ss:$36 sps:$4 sm:$0xff]  }
 0x7a7   :  { %4602 = vmatprep.subr.bf16.mxu0 %v6301_v57  ;;  %4643 = vmatprep.subr.bf16.mxu1 %v6304_v60  ;;  %v6384_v57 = vld [vmem:[#allocation19 + $0x20] ss:$36 sps:$4 sm:$0xff]   ;;  %v6385_v60 = vld [vmem:[#allocation19 + $0x2a8] ss:$36 sps:$4 sm:$0xff]  }
 0x7aa   :  { %4603 = vmatpush1.bf16.msra.mxu0 %v6299_v63  ;;  %4644 = vmatpush1.bf16.msra.mxu1 %v6302_v0  ;;  %v6386_v63 = vld [vmem:[#allocation19 + $0x68] ss:$36 sps:$4 sm:$0xff]   ;;  %v6387_v0 = vld [vmem:[#allocation19 + $0x2f0] ss:$36 sps:$4 sm:$0xff]  }
 0x7ab   :  { %4604 = vmatprep.subr.bf16.mxu0 %v6307_v1  ;;  %4645 = vmatprep.subr.bf16.mxu1 %v6310_v2  ;;  %v6388_v1 = vld [vmem:[#allocation19 + $0xb0] ss:$36 sps:$4 sm:$0xff]   ;;  %v6389_v2 = vld [vmem:[#allocation19 + $0x338] ss:$36 sps:$4 sm:$0xff]  }
 0x7ae   :  { %4605 = vmatpush1.bf16.msra.mxu0 %v6305_v3  ;;  %4646 = vmatpush1.bf16.msra.mxu1 %v6308_v4  ;;  %v6390_v3 = vld [vmem:[#allocation19 + $0xf8] ss:$36 sps:$4 sm:$0xff]   ;;  %v6391_v4 = vld [vmem:[#allocation19 + $0x380] ss:$36 sps:$4 sm:$0xff]  }
 0x7af   :  { %4606 = vmatprep.subr.bf16.mxu0 %v6313_v5  ;;  %4647 = vmatprep.subr.bf16.mxu1 %v6316_v6  ;;  %v6392_v5 = vld [vmem:[#allocation19 + $0x140] ss:$36 sps:$4 sm:$0xff]   ;;  %v6393_v6 = vld [vmem:[#allocation19 + $0x3c8] ss:$36 sps:$4 sm:$0xff]  }
 0x7b2   :  { %4607 = vmatpush1.bf16.msra.mxu0 %v6311_v7  ;;  %4648 = vmatpush1.bf16.msra.mxu1 %v6314_v8  ;;  %v6394_v7 = vld [vmem:[#allocation19 + $0x188] ss:$36 sps:$4 sm:$0xff]   ;;  %v6395_v8 = vld [vmem:[#allocation19 + $0x410] ss:$36 sps:$4 sm:$0xff]  }
 0x7b3   :  { %4608 = vmatprep.subr.bf16.mxu0 %v6319_v9  ;;  %4649 = vmatprep.subr.bf16.mxu1 %v6322_v10  ;;  %v6397_v9 = vld [vmem:[#allocation19 + $0x458] ss:$36 sps:$4 sm:$0xff]  }
 0x7b4   :  { %v6398_v10 = vld [vmem:[#allocation19 + $0x218] ss:$36 sps:$4 sm:$0xff]  }
 0x7b6   :  { %4609 = vmatpush1.bf16.msra.mxu0 %v6317_v12  ;;  %4650 = vmatpush1.bf16.msra.mxu1 %v6320_v14  ;;  %v3731_v12 = vld [vmem:[#allocation21] sm:$0xff] }
 0x7b7   :  { %4610 = vmatprep.subr.bf16.mxu0 %v6325_v15  ;;  %4651 = vmatprep.subr.bf16.mxu1 %v6328_v16  ;;  %v3738_v14 = vrot.slane %v3731_v12, %v7077_v59  ;;  %v3746_v15 = vrot.slane %v3731_v12, %v503_v44  ;;  %v3742_v16 = vrot.slane %v3731_v12, %v7082_v61 }
 0x7ba   :  { %4611 = vmatpush1.bf16.msra.mxu0 %v6323_v17  ;;  %4652 = vmatpush1.bf16.msra.mxu1 %v6326_v18  ;;  %v3750_v17 = vrot.slane %v3731_v12, %v507_v62 }
 0x7bb   :  { %4612 = vmatprep.subr.bf16.mxu0 %v6331_v19  ;;  %4653 = vmatprep.subr.bf16.mxu1 %v6334_v20 }
 0x7be   :  { %4613 = vmatpush1.bf16.msra.mxu0 %v6329_v21  ;;  %4654 = vmatpush1.bf16.msra.mxu1 %v6332_v11 }
 0x7bf   :  { %4614 = vmatprep.subr.bf16.mxu0 %v6337_v22  ;;  %4655 = vmatprep.subr.bf16.mxu1 %v6340_v13 }
 0x7c2   :  { %4615 = vmatpush1.bf16.msra.mxu0 %v6335_v23  ;;  %4656 = vmatpush1.bf16.msra.mxu1 %v6338_v24 }
 0x7c3   :  { %4616 = vmatprep.subr.bf16.mxu0 %v6343_v25  ;;  %4657 = vmatprep.subr.bf16.mxu1 %v6346_v26 }
 0x7c6   :  { %4617 = vmatpush1.bf16.msra.mxu0 %v6341_v27  ;;  %4658 = vmatpush1.bf16.msra.mxu1 %v6344_v28 }
 0x7c7   :  { %4618 = vmatprep.subr.bf16.mxu0 %v6349_v29  ;;  %4659 = vmatprep.subr.bf16.mxu1 %v6352_v30 }
 0x7ca   :  { %4619 = vmatpush1.bf16.msra.mxu0 %v6347_v31  ;;  %4660 = vmatpush1.bf16.msra.mxu1 %v6350_v32 }
 0x7cb   :  { %4620 = vmatprep.subr.bf16.mxu0 %v6355_v33  ;;  %4661 = vmatprep.subr.bf16.mxu1 %v6358_v34 }
 0x7ce   :  { %4621 = vmatpush1.bf16.msra.mxu0 %v6353_v35  ;;  %4662 = vmatpush1.bf16.msra.mxu1 %v6356_v36 }
 0x7cf   :  { %4622 = vmatprep.subr.bf16.mxu0 %v6361_v37  ;;  %4663 = vmatprep.subr.bf16.mxu1 %v6364_v38 }
 0x7d2   :  { %4623 = vmatpush1.bf16.msra.mxu0 %v6359_v39  ;;  %4664 = vmatpush1.bf16.msra.mxu1 %v6362_v40 }
 0x7d3   :  { %4624 = vmatprep.subr.bf16.mxu0 %v6367_v41  ;;  %4665 = vmatprep.subr.bf16.mxu1 %v6370_v42  ;;  %v3753_v41 = vsub.s32 4, %v7074_v58  ;;  %v3761_v42 = vsub.s32 6, %v7074_v58 }
 0x7d6   :  { %4625 = vmatpush1.bf16.msra.mxu0 %v6365_v43  ;;  %4666 = vmatpush1.bf16.msra.mxu1 %v6368_v45  ;;  %v3757_v43 = vsub.s32 5, %v7074_v58  ;;  %v3765_v45 = vsub.s32 7, %v7074_v58 }
 0x7d7   :  { %4626 = vmatprep.subr.bf16.mxu0 %v6373_v46  ;;  %4667 = vmatprep.subr.bf16.mxu1 %v6376_v47  ;;  %v3754_v46 = vrot.slane %v3731_v12, %v3753_v41  ;;  %v3762_v47 = vrot.slane %v3731_v12, %v3761_v42 }
 0x7da   :  { %4627 = vmatpush1.bf16.msra.mxu0 %v6371_v48  ;;  %4668 = vmatpush1.bf16.msra.mxu1 %v6374_v50  ;;  %v3758_v48 = vrot.slane %v3731_v12, %v3757_v43  ;;  %v3766_v50 = vrot.slane %v3731_v12, %v3765_v45 }
 0x7db   :  { %4628 = vmatprep.subr.bf16.mxu0 %v6379_v51  ;;  %4669 = vmatprep.subr.bf16.mxu1 %v6382_v53 }
 0x7de   :  { %4629 = vmatpush1.bf16.msra.mxu0 %v6377_v54  ;;  %4670 = vmatpush1.bf16.msra.mxu1 %v6380_v55 }
 0x7df   :  { %5481 = vmatprep.subr.bf16.mxu0 %v6383_v56 }
 0x7e1   :  { %4631 = vmatmul.mubr.bf16.vlgmr.msra.gmra.mrb[16].mxu0 %v7274_v52  ;;  %4672 = vmatmul.mubr.bf16.vlgmr.msra.gmra.mrb[28].mxu1 %v7274_v52 }
 0x7e2   :  { %5482 = vmatpush3.bf16.msra.mxu0 %v6384_v57  ;;  %4712 = vmatprep.mubr.bf16.mxu0 %v7272_v49  ;;  %v6396_v49 = vld [vmem:[#allocation19 + $0x1d0] ss:$36 sps:$4 sm:$0xff]  }
 0x7e3   :  { %5483 = vmatprep.subr.bf16.mxu0 %v6385_v60 }
 0x7e6   :  { %5484 = vmatpush3.bf16.msra.mxu0 %v6386_v63 }
 0x7e7   :  { %5485 = vmatprep.subr.bf16.mxu0 %v6387_v0 }
 0x7ea   :  { %5486 = vmatpush3.bf16.msra.mxu0 %v6388_v1 }
 0x7eb   :  { %5487 = vmatprep.subr.bf16.mxu0 %v6389_v2 }
 0x7ee   :  { %5488 = vmatpush3.bf16.msra.mxu0 %v6390_v3 }
 0x7ef   :  { %5489 = vmatprep.subr.bf16.mxu0 %v6391_v4 }
 0x7f2   :  { %5490 = vmatpush3.bf16.msra.mxu0 %v6392_v5 }
 0x7f3   :  { %5491 = vmatprep.subr.bf16.mxu0 %v6393_v6 }
 0x7f6   :  { %5492 = vmatpush3.bf16.msra.mxu0 %v6394_v7 }
 0x7f7   :  { %5493 = vmatprep.subr.bf16.mxu0 %v6395_v8 }
 0x7fa   :  { %5494 = vmatpush3.bf16.msra.mxu0 %v6396_v49 }
 0x7fb   :  { %5495 = vmatprep.subr.bf16.mxu0 %v6397_v9 }
 0x7fe   :  { %5496 = vmatpush3.bf16.msra.mxu0 %v6398_v10 }
 0x801   :  { %4713 = vmatmul.mubr.bf16.vlgmr.msra.gmra.mrb[20].mxu0 %v7274_v52 }
 0x874   :  { %v4550_v18 = vpop.f32.mrb[12].mxu0  ;;  %v4591_v19 = vpop.f32.mrb[24].mxu1 }
 0x875   :  { %v4551_v20 = vadd.f32 %v4550_v18, %v3738_v14  ;;  %v4592_v21 = vadd.f32 %v4591_v19, %v3746_v15  ;;  %v4552_v11 = vpop.f32.mrb[13].mxu0  ;;  %v4593_v22 = vpop.f32.mrb[25].mxu1 }
 0x876   :  { %v4553_v13 = vadd.f32 %v4552_v11, %v3742_v16  ;;  %v4594_v23 = vadd.f32 %v4593_v22, %v3750_v17  ;;  %v4554_v52 = vpop.f32.mrb[14].mxu0  ;;  %v4595_v24 = vpop.f32.mrb[26].mxu1  ;;  %v5293_v22 = vld [vmem:[#allocation21 + $0x8] ss:$0 sm:$0xff] }
 0x877   :  { %v5438_v25 = vmul.f32 -1.442695, %v4551_v20  ;;  %v5440_v59 = vmul.f32 -1.442695, %v4592_v21  ;;  %v4555_v26 = vpop.f32.mrb[15].mxu0  ;;  %v4596_v27 = vpop.f32.mrb[27].mxu1 }
 0x878   :  { %v5439_v44 = vmul.f32 -1.442695, %v4553_v13  ;;  %v5441_v28 = vmul.f32 -1.442695, %v4594_v23 }
 0x879   :  { %6401 = vpow2.f32 %v5438_v25 }
 0x87a   :  { %6403 = vpow2.f32 %v5440_v59 }
 0x87b   :  { %6405 = vpow2.f32 %v5439_v44 }
 0x87c   :  { %6407 = vpow2.f32 %v5441_v28 }
 0x883   :  { %v6402_v61 = vpop.eup %6401 }
 0x884   :  { %v6404_v62 = vpop.eup %6403  ;;  %v4766_v29 = vadd.f32 1.0, %v6402_v61 }
 0x885   :  { %v6406_v30 = vpop.eup %6405  ;;  %v4768_v31 = vadd.f32 1.0, %v6404_v62 }
 0x886   :  { %v6408_v32 = vpop.eup %6407  ;;  %6409 = vrcp.f32 %v4766_v29  ;;  %v4767_v33 = vadd.f32 1.0, %v6406_v30 }
 0x887   :  { %6411 = vrcp.f32 %v4768_v31  ;;  %v4769_v34 = vadd.f32 1.0, %v6408_v32 }
 0x888   :  { %6413 = vrcp.f32 %v4767_v33 }
 0x889   :  { %6415 = vrcp.f32 %v4769_v34 }
 0x890   :  { %v6410_v35 = vpop.eup %6409 }
 0x891   :  { %v6412_v36 = vpop.eup %6411 }
 0x892   :  { %v6414_v37 = vpop.eup %6413 }
 0x893   :  { %v6416_v38 = vpop.eup %6415  ;;  %v5452_v39 = vpack.c.bf16 %v6414_v37, %v6410_v35 }
 0x894   :  { %v5453_v40 = vpack.c.bf16 %v6416_v38, %v6412_v36 }
 0x895   :  { %4842 = vst [vmem:[%s7333_s22] sm:$0xff] %v5452_v39 }
 0x896   :  { %4843 = vst [vmem:[%s7333_s22 + $0x8] sm:$0xff] %v5453_v40 }
 0x8b4   :  { %v4632_v51 = vpop.f32.mrb[16].mxu0  ;;  %v4673_v53 = vpop.f32.mrb[28].mxu1 }
 0x8b5   :  { %v4633_v54 = vadd.f32 %v4632_v51, %v3754_v46  ;;  %v4674_v55 = vadd.f32 %v4673_v53, %v3762_v47  ;;  %v4634_v56 = vpop.f32.mrb[17].mxu0  ;;  %v4675_v57 = vpop.f32.mrb[29].mxu1 }
 0x8b6   :  { %v4635_v60 = vadd.f32 %v4634_v56, %v3758_v48  ;;  %v4676_v63 = vadd.f32 %v4675_v57, %v3766_v50  ;;  %v4636_v0 = vpop.f32.mrb[18].mxu0  ;;  %v4677_v1 = vpop.f32.mrb[30].mxu1 }
 0x8b7   :  { %v5442_v2 = vmul.f32 -1.442695, %v4633_v54  ;;  %v5444_v3 = vmul.f32 -1.442695, %v4674_v55  ;;  %v4637_v4 = vpop.f32.mrb[19].mxu0  ;;  %v4678_v5 = vpop.f32.mrb[31].mxu1 }
 0x8b8   :  { %v5443_v6 = vmul.f32 -1.442695, %v4635_v60  ;;  %v5445_v58 = vmul.f32 -1.442695, %v4676_v63 }
 0x8b9   :  { %6417 = vpow2.f32 %v5442_v2 }
 0x8ba   :  { %6419 = vpow2.f32 %v5444_v3 }
 0x8bb   :  { %6421 = vpow2.f32 %v5443_v6 }
 0x8bc   :  { %6423 = vpow2.f32 %v5445_v58 }
 0x8c3   :  { %v6418_v7 = vpop.eup %6417 }
 0x8c4   :  { %v6420_v8 = vpop.eup %6419  ;;  %v4770_v49 = vadd.f32 1.0, %v6418_v7 }
 0x8c5   :  { %v6422_v9 = vpop.eup %6421  ;;  %v4772_v10 = vadd.f32 1.0, %v6420_v8 }
 0x8c6   :  { %v6424_v12 = vpop.eup %6423  ;;  %6425 = vrcp.f32 %v4770_v49  ;;  %v4771_v14 = vadd.f32 1.0, %v6422_v9 }
 0x8c7   :  { %6427 = vrcp.f32 %v4772_v10  ;;  %v4773_v15 = vadd.f32 1.0, %v6424_v12 }
 0x8c8   :  { %6429 = vrcp.f32 %v4771_v14 }
 0x8c9   :  { %6431 = vrcp.f32 %v4773_v15 }
 0x8d0   :  { %v6426_v16 = vpop.eup %6425 }
 0x8d1   :  { %v6428_v17 = vpop.eup %6427 }
 0x8d2   :  { %v6430_v18 = vpop.eup %6429 }
 0x8d3   :  { %v6432_v19 = vpop.eup %6431  ;;  %v5454_v20 = vpack.c.bf16 %v6430_v18, %v6426_v16 }
 0x8d4   :  { %v5455_v21 = vpack.c.bf16 %v6432_v19, %v6428_v17  ;;  %v5497_v11 = vpop.f32.mrb[20].mxu0 }
 0x8d5   :  { %4844 = vst [vmem:[%s7333_s22 + $0x10] sm:$0xff] %v5454_v20  ;;  %v5498_v13 = vpop.f32.mrb[21].mxu0 }
 0x8d6   :  { %4845 = vst [vmem:[%s7333_s22 + $0x18] sm:$0xff] %v5455_v21  ;;  %v5499_v23 = vadd.f32 %v5498_v13, %v5497_v11  ;;  %v5500_v52 = vpop.f32.mrb[22].mxu0 }
 0x8d7   :  { %v5501_v24 = vpop.f32.mrb[23].mxu0 }
 0x8d8   :  { %v4715_v25 = vadd.f32 %v5499_v23, %v5293_v22 }
 0x8da   :  { %v5456_v59 = vpack.c.bf16 %v4715_v25, %v4715_v25 }
 0x8dc   :  { %4846 = vst [vmem:[%s7333_s22 + $0x20] sm:$0xf] %v5456_v59 }
 0x8dd   :  { %4859 = vsyncpa [#allocation3], 1 }
 0x8de   :  { %4860 = vsyncpa [#allocation5], 1 }
 0x8df   :  { %4861 = vsyncpa [#allocation8], 1 }
 0x8e0   :  { %4862 = vsyncpa [#allocation11], 1 }
 0x8e1   :  { %4863 = vsyncpa [#allocation14], 1 }
 0x8e2   :  { %4864 = vsyncpa [#allocation17], 1 }
 0x8e3   :  { %4865 = vsyncpa [#allocation20], 1 }

</bundles_post_ra>
